<compile_context>
chip_gen: v7x
topology: tpu7x:2x2x1
jax: 0.10.0
libtpu: 0.0.40
codegen_flags: <defaults>
</compile_context>

<pallas_src>
import jax
import jax.numpy as jnp
from jax.experimental import pallas as pl
from jax.experimental.pallas import tpu as pltpu

HP = 128  # padded LSTM hidden size (lane-aligned); logical H = 100


# ----------------------------- Fused kernel -----------------------------------------------
def rcnn_kernel(x_ref, w1_ref, b1_ref, w2_ref, b2_ref,
                wih_ref, whh_ref, bl_ref,
                f1w_ref, f1b_ref, f2w_ref, f2b_ref, o_ref):
    # x_ref:  (B, 1, L)          w1_ref: (K, C1)        b1_ref: (1, C1)
    # w2_ref: (K*C1, C2)         b2_ref: (1, C2)
    # wih_ref:(C2, 4*Hp)         whh_ref:(Hp, 4*Hp)     bl_ref: (1, 4*Hp)   (gate order i,f,g,o)
    # f1w_ref:(Hp, F1)           f1b_ref:(1, F1)        f2w_ref:(F1, NC)    f2b_ref:(1, NC)
    # o_ref:  (B, NC)
    B = x_ref.shape[0]
    L = x_ref.shape[2]
    K, C1 = w1_ref.shape
    C2 = w2_ref.shape[1]
    Hp = whh_ref.shape[0]

    # ---- conv1 (1 -> C1, k=K, valid) + ReLU + MaxPool1d(2, floor) ----
    x = x_ref[...][:, 0, :]                                  # (B, L)
    L1 = L - K + 1
    w1 = w1_ref[...]                                         # (K, C1), loaded once
    acc1 = jnp.zeros((B, L1, C1), jnp.float32)
    for k in range(K):                                       # 5 broadcast MACs on the VPU
        acc1 = acc1 + x[:, k:k + L1, None] * w1[k:k + 1, :][None, :, :]
    acc1 = jnp.maximum(acc1 + b1_ref[...].reshape(1, 1, C1), 0.0)
    L1p = L1 // 2
    acc1 = acc1[:, :2 * L1p, :].reshape(B, L1p, 2, C1)
    y1 = jnp.maximum(acc1[:, :, 0, :], acc1[:, :, 1, :])     # (B, L1p, C1)

    # ---- conv2 (C1 -> C2, k=K, valid) as a single im2col matmul + ReLU + MaxPool1d(2) ----
    L2 = L1p - K + 1
    # cols2[b, t, k*C1 + c1] = y1[b, t+k, c1]
    cols2 = jnp.concatenate([y1[:, k:k + L2, :] for k in range(K)], axis=-1)  # (B, L2, K*C1)
    y2 = jnp.dot(cols2.reshape(B * L2, K * C1), w2_ref[...],
                 preferred_element_type=jnp.float32)          # (B*L2, C2)
    y2 = jnp.maximum(y2.reshape(B, L2, C2) + b2_ref[...].reshape(1, 1, C2), 0.0)
    T = L2 // 2
    y2 = y2[:, :2 * T, :].reshape(B, T, 2, C2)
    y2 = jnp.maximum(y2[:, :, 0, :], y2[:, :, 1, :])          # (B, T, C2)  == LSTM input

    # ---- LSTM: hoist the input projection out of the recurrence ----
    gx = jnp.dot(y2.reshape(B * T, C2), wih_ref[...],
                 preferred_element_type=jnp.float32)          # (B*T, 4*Hp)
    gx = (gx + bl_ref[...]).reshape(B, T, 4 * Hp)

    whh = whh_ref[...]                                        # (Hp, 4*Hp), loaded once
    h = jnp.zeros((B, Hp), jnp.float32)
    c = jnp.zeros((B, Hp), jnp.float32)
    # Static unroll: T is known at trace time (9 for L=48), so the LLO scheduler sees
    # the whole recurrence and can overlap the MXU push of step t with gate math of t-1.
    for t in range(T):
        gates = gx[:, t, :] + jnp.dot(h, whh, preferred_element_type=jnp.float32)  # (B, 4*Hp)
        # lane-aligned gate slices (PyTorch order i, f, g, o); padded lanes stay exactly 0
        # because the padded weight rows/cols and bias lanes are zero and c0 == 0.
        i = jax.nn.sigmoid(gates[:, 0:Hp])
        f = jax.nn.sigmoid(gates[:, Hp:2 * Hp])
        g = jnp.tanh(gates[:, 2 * Hp:3 * Hp])
        o = jax.nn.sigmoid(gates[:, 3 * Hp:4 * Hp])
        c = f * c + i * g
        h = o * jnp.tanh(c)

    # ---- last timestep -> fc1 + ReLU -> (dropout = identity in eval) -> fc2 ----
    z = jnp.dot(h, f1w_ref[...], preferred_element_type=jnp.float32) + f1b_ref[...]
    z = jnp.maximum(z, 0.0)
    # TODO(synk): nn.Dropout(0.2) is identity in eval mode; not applied here.
    o_ref[...] = jnp.dot(z, f2w_ref[...], preferred_element_type=jnp.float32) + f2b_ref[...]


# ----------------------------- Wrapper ----------------------------------------------------
def rcnn_forward(x, kp):
    """x: (B, 1, L) float32 (PyTorch NCL layout). kp: kernel-ready params (prepare_params).
    Returns logits (B, num_classes)."""
    B = x.shape[0]
    NC = kp["fc2_w"].shape[1]
    vmem = pl.BlockSpec(memory_space=pltpu.MemorySpace.VMEM)
    args = (x,
            kp["conv1_w"], kp["conv1_b"], kp["conv2_w"], kp["conv2_b"],
            kp["lstm_wih"], kp["lstm_whh"], kp["lstm_b"],
            kp["fc1_w"], kp["fc1_b"], kp["fc2_w"], kp["fc2_b"])
    return pl.pallas_call(
        rcnn_kernel,
        out_shape=jax.ShapeDtypeStruct((B, NC), jnp.float32),
        in_specs=[vmem] * len(args),
        out_specs=vmem,
        # Gridless whole-array blocks: total live data (~0.4 MiB) fits VMEM on v5e/v6e/v7x.
    )(*args)


# ----------------------------- Parameters --------------------------------------------------
def init_params(key, num_classes):
    """Logical parameters, matching (transposed) PyTorch shapes. Gate order: i, f, g, o."""
    C1, C2, K, H, F1 = 64, 128, 5, 100, 50
    ks = jax.random.split(key, 9)
    s = 0.05
    return {
        # conv1: torch weight (64, 1, 5)  -> stored (K, C1):       w[k, c1]       = W[c1, 0, k]
        "conv1_w": s * jax.random.normal(ks[0], (K, C1), jnp.float32),
        "conv1_b": s * jax.random.normal(ks[1], (1, C1), jnp.float32),
        # conv2: torch weight (128, 64, 5) -> stored (K, C1, C2):  w[k, c1, c2]   = W[c2, c1, k]
        "conv2_w": s * jax.random.normal(ks[2], (K, C1, C2), jnp.float32),
        "conv2_b": s * jax.random.normal(ks[3], (1, C2), jnp.float32),
        # LSTM: torch weight_ih (400,128) -> (128,400); weight_hh (400,100) -> (100,400)
        "lstm_wih": s * jax.random.normal(ks[4], (C2, 4 * H), jnp.float32),
        "lstm_whh": s * jax.random.normal(ks[5], (H, 4 * H), jnp.float32),
        "lstm_b":   s * jax.random.normal(ks[6], (1, 4 * H), jnp.float32),  # b_ih + b_hh folded
        # fc1: torch (50, 100) -> (100, 50); fc2: torch (NC, 50) -> (50, NC)
        "fc1_w": s * jax.random.normal(ks[7], (H, F1), jnp.float32),
        "fc1_b": jnp.zeros((1, F1), jnp.float32),
        "fc2_w": s * jax.random.normal(ks[8], (F1, num_classes), jnp.float32),
        "fc2_b": jnp.zeros((1, num_classes), jnp.float32),
    }


def _pad_gate_cols(w, H, Hp):
    """(..., 4*H) -> (..., 4*Hp) zero-padding each of the 4 gate blocks to Hp lanes."""
    lead = w.shape[:-1]
    w4 = w.reshape(lead + (4, H))
    pad = [(0, 0)] * (w4.ndim - 1) + [(0, Hp - H)]
    return jnp.pad(w4, pad).reshape(lead + (4 * Hp,))


def prepare_params(p, Hp=HP):
    """One-time repack of logical params into the kernel layout:
       - conv2 weight flattened to the im2col layout (K*C1, C2)
       - LSTM hidden padded H=100 -> Hp=128 with zero rows/cols (lane-aligned gates)
       - fc1 weight rows 100..127 zeroed so padded h columns never contribute."""
    K, C1, C2 = p["conv2_w"].shape
    H = p["lstm_whh"].shape[0]
    kp = dict(p)
    kp["conv2_w"] = p["conv2_w"].reshape(K * C1, C2)
    kp["lstm_wih"] = _pad_gate_cols(p["lstm_wih"], H, Hp)                       # (C2, 4*Hp)
    kp["lstm_whh"] = _pad_gate_cols(jnp.pad(p["lstm_whh"], ((0, Hp - H), (0, 0))), H, Hp)
    kp["lstm_b"] = _pad_gate_cols(p["lstm_b"], H, Hp)                           # (1, 4*Hp)
    kp["fc1_w"] = jnp.pad(p["fc1_w"], ((0, Hp - H), (0, 0)))                    # (Hp, F1)
    return kp


if __name__ == "__main__":
    key = jax.random.PRNGKey(0)
    kx, kparam = jax.random.split(key)

    B, L, num_classes = 2, 48, 4                          # input_size=48 -> T=9 LSTM steps
    x = jax.random.normal(kx, (B, 1, L), jnp.float32)     # NCL, matching nn.Conv1d(1, 64, 5)

    params = init_params(kparam, num_classes)
    kernel_params = prepare_params(params)                # repacked once, outside jit

    logits = jax.jit(rcnn_forward)(x, kernel_params)
    jax.block_until_ready(logits)
    assert logits.shape == (B, num_classes)
    print("KERNEL_OK")
</pallas_src>

<mosaic_0001>
module attributes {stable_mosaic.version = 11 : i64} {
  func.func @rcnn_kernel(%arg0: memref<2x1x48xf32, #tpu.memory_space<vmem>>, %arg1: memref<5x64xf32, #tpu.memory_space<vmem>>, %arg2: memref<1x64xf32, #tpu.memory_space<vmem>>, %arg3: memref<320x128xf32, #tpu.memory_space<vmem>>, %arg4: memref<1x128xf32, #tpu.memory_space<vmem>>, %arg5: memref<128x512xf32, #tpu.memory_space<vmem>>, %arg6: memref<128x512xf32, #tpu.memory_space<vmem>>, %arg7: memref<1x512xf32, #tpu.memory_space<vmem>>, %arg8: memref<128x50xf32, #tpu.memory_space<vmem>>, %arg9: memref<1x50xf32, #tpu.memory_space<vmem>>, %arg10: memref<50x4xf32, #tpu.memory_space<vmem>>, %arg11: memref<1x4xf32, #tpu.memory_space<vmem>>, %arg12: memref<2x4xf32, #tpu.memory_space<vmem>>) attributes {dimension_semantics = [], scalar_prefetch = 0 : i64, scratch_operands = 0 : i64, tpu.core_type = #tpu.core_type<tc>} {
    %c0 = arith.constant 0 : index
    %c0_0 = arith.constant 0 : index
    %c0_1 = arith.constant 0 : index
    %0 = vector.load %arg0[%c0, %c0_0, %c0_1] : memref<2x1x48xf32, #tpu.memory_space<vmem>>, vector<2x1x48xf32>
    %1 = vector.shape_cast %0 : vector<2x1x48xf32> to vector<2x48xf32>
    %c0_2 = arith.constant 0 : index
    %c0_3 = arith.constant 0 : index
    %2 = vector.load %arg1[%c0_2, %c0_3] : memref<5x64xf32, #tpu.memory_space<vmem>>, vector<5x64xf32>
    %cst = arith.constant 0.000000e+00 : f32
    %3 = vector.broadcast %cst : f32 to vector<2x44x64xf32>
    %4 = vector.extract_strided_slice %1 {offsets = [0, 0], sizes = [2, 44], strides = [1, 1]} : vector<2x48xf32> to vector<2x44xf32>
    %5 = vector.shape_cast %4 : vector<2x44xf32> to vector<2x44x1xf32>
    %6 = vector.extract_strided_slice %2 {offsets = [0, 0], sizes = [1, 64], strides = [1, 1]} : vector<5x64xf32> to vector<1x64xf32>
    %7 = vector.shape_cast %6 : vector<1x64xf32> to vector<1x1x64xf32>
    %8 = vector.broadcast %5 : vector<2x44x1xf32> to vector<2x44x64xf32>
    %9 = vector.broadcast %7 : vector<1x1x64xf32> to vector<2x44x64xf32>
    %10 = arith.mulf %8, %9 : vector<2x44x64xf32>
    %11 = arith.addf %3, %10 : vector<2x44x64xf32>
    %12 = vector.extract_strided_slice %1 {offsets = [0, 1], sizes = [2, 44], strides = [1, 1]} : vector<2x48xf32> to vector<2x44xf32>
    %13 = vector.shape_cast %12 : vector<2x44xf32> to vector<2x44x1xf32>
    %14 = vector.extract_strided_slice %2 {offsets = [1, 0], sizes = [1, 64], strides = [1, 1]} : vector<5x64xf32> to vector<1x64xf32>
    %15 = vector.shape_cast %14 : vector<1x64xf32> to vector<1x1x64xf32>
    %16 = vector.broadcast %13 : vector<2x44x1xf32> to vector<2x44x64xf32>
    %17 = vector.broadcast %15 : vector<1x1x64xf32> to vector<2x44x64xf32>
    %18 = arith.mulf %16, %17 : vector<2x44x64xf32>
    %19 = arith.addf %11, %18 : vector<2x44x64xf32>
    %20 = vector.extract_strided_slice %1 {offsets = [0, 2], sizes = [2, 44], strides = [1, 1]} : vector<2x48xf32> to vector<2x44xf32>
    %21 = vector.shape_cast %20 : vector<2x44xf32> to vector<2x44x1xf32>
    %22 = vector.extract_strided_slice %2 {offsets = [2, 0], sizes = [1, 64], strides = [1, 1]} : vector<5x64xf32> to vector<1x64xf32>
    %23 = vector.shape_cast %22 : vector<1x64xf32> to vector<1x1x64xf32>
    %24 = vector.broadcast %21 : vector<2x44x1xf32> to vector<2x44x64xf32>
    %25 = vector.broadcast %23 : vector<1x1x64xf32> to vector<2x44x64xf32>
    %26 = arith.mulf %24, %25 : vector<2x44x64xf32>
    %27 = arith.addf %19, %26 : vector<2x44x64xf32>
    %28 = vector.extract_strided_slice %1 {offsets = [0, 3], sizes = [2, 44], strides = [1, 1]} : vector<2x48xf32> to vector<2x44xf32>
    %29 = vector.shape_cast %28 : vector<2x44xf32> to vector<2x44x1xf32>
    %30 = vector.extract_strided_slice %2 {offsets = [3, 0], sizes = [1, 64], strides = [1, 1]} : vector<5x64xf32> to vector<1x64xf32>
    %31 = vector.shape_cast %30 : vector<1x64xf32> to vector<1x1x64xf32>
    %32 = vector.broadcast %29 : vector<2x44x1xf32> to vector<2x44x64xf32>
    %33 = vector.broadcast %31 : vector<1x1x64xf32> to vector<2x44x64xf32>
    %34 = arith.mulf %32, %33 : vector<2x44x64xf32>
    %35 = arith.addf %27, %34 : vector<2x44x64xf32>
    %36 = vector.extract_strided_slice %1 {offsets = [0, 4], sizes = [2, 44], strides = [1, 1]} : vector<2x48xf32> to vector<2x44xf32>
    %37 = vector.shape_cast %36 : vector<2x44xf32> to vector<2x44x1xf32>
    %38 = vector.extract_strided_slice %2 {offsets = [4, 0], sizes = [1, 64], strides = [1, 1]} : vector<5x64xf32> to vector<1x64xf32>
    %39 = vector.shape_cast %38 : vector<1x64xf32> to vector<1x1x64xf32>
    %40 = vector.broadcast %37 : vector<2x44x1xf32> to vector<2x44x64xf32>
    %41 = vector.broadcast %39 : vector<1x1x64xf32> to vector<2x44x64xf32>
    %42 = arith.mulf %40, %41 : vector<2x44x64xf32>
    %43 = arith.addf %35, %42 : vector<2x44x64xf32>
    %c0_4 = arith.constant 0 : index
    %c0_5 = arith.constant 0 : index
    %44 = vector.load %arg2[%c0_4, %c0_5] : memref<1x64xf32, #tpu.memory_space<vmem>>, vector<1x64xf32>
    %45 = vector.shape_cast %44 : vector<1x64xf32> to vector<1x1x64xf32>
    %46 = vector.broadcast %45 : vector<1x1x64xf32> to vector<2x44x64xf32>
    %47 = arith.addf %43, %46 : vector<2x44x64xf32>
    %cst_6 = arith.constant 0.000000e+00 : f32
    %48 = vector.broadcast %cst_6 : f32 to vector<2x44x64xf32>
    %49 = arith.maximumf %47, %48 : vector<2x44x64xf32>
    %50 = vector.shape_cast %49 : vector<2x44x64xf32> to vector<2x22x2x64xf32>
    %51 = vector.extract_strided_slice %50 {offsets = [0, 0, 0, 0], sizes = [2, 22, 1, 64], strides = [1, 1, 1, 1]} : vector<2x22x2x64xf32> to vector<2x22x1x64xf32>
    %52 = vector.shape_cast %51 : vector<2x22x1x64xf32> to vector<2x22x64xf32>
    %53 = vector.extract_strided_slice %50 {offsets = [0, 0, 1, 0], sizes = [2, 22, 1, 64], strides = [1, 1, 1, 1]} : vector<2x22x2x64xf32> to vector<2x22x1x64xf32>
    %54 = vector.shape_cast %53 : vector<2x22x1x64xf32> to vector<2x22x64xf32>
    %55 = arith.maximumf %52, %54 : vector<2x22x64xf32>
    %56 = vector.extract_strided_slice %55 {offsets = [0, 0, 0], sizes = [2, 18, 64], strides = [1, 1, 1]} : vector<2x22x64xf32> to vector<2x18x64xf32>
    %57 = vector.extract_strided_slice %55 {offsets = [0, 1, 0], sizes = [2, 18, 64], strides = [1, 1, 1]} : vector<2x22x64xf32> to vector<2x18x64xf32>
    %58 = vector.extract_strided_slice %55 {offsets = [0, 2, 0], sizes = [2, 18, 64], strides = [1, 1, 1]} : vector<2x22x64xf32> to vector<2x18x64xf32>
    %59 = vector.extract_strided_slice %55 {offsets = [0, 3, 0], sizes = [2, 18, 64], strides = [1, 1, 1]} : vector<2x22x64xf32> to vector<2x18x64xf32>
    %60 = vector.extract_strided_slice %55 {offsets = [0, 4, 0], sizes = [2, 18, 64], strides = [1, 1, 1]} : vector<2x22x64xf32> to vector<2x18x64xf32>
    %61 = tpu.concatenate %56, %57, %58, %59, %60 in 2 : vector<2x18x64xf32>, vector<2x18x64xf32>, vector<2x18x64xf32>, vector<2x18x64xf32>, vector<2x18x64xf32> -> vector<2x18x320xf32>
    %62 = vector.shape_cast %61 : vector<2x18x320xf32> to vector<36x320xf32>
    %c0_7 = arith.constant 0 : index
    %c0_8 = arith.constant 0 : index
    %63 = vector.load %arg3[%c0_7, %c0_8] : memref<320x128xf32, #tpu.memory_space<vmem>>, vector<320x128xf32>
    %cst_9 = arith.constant dense<0.000000e+00> : vector<36x128xf32>
    %64 = tpu.matmul %62, %63, %cst_9 {dimension_numbers = #tpu.dot_dimension_numbers<[1], [0], [0], [1], [0, 0, 1, 1], [], []>} : vector<36x320xf32>, vector<320x128xf32>, vector<36x128xf32> -> vector<36x128xf32>
    %65 = vector.shape_cast %64 : vector<36x128xf32> to vector<2x18x128xf32>
    %c0_10 = arith.constant 0 : index
    %c0_11 = arith.constant 0 : index
    %66 = vector.load %arg4[%c0_10, %c0_11] : memref<1x128xf32, #tpu.memory_space<vmem>>, vector<1x128xf32>
    %67 = vector.shape_cast %66 : vector<1x128xf32> to vector<1x1x128xf32>
    %68 = vector.broadcast %67 : vector<1x1x128xf32> to vector<2x18x128xf32>
    %69 = arith.addf %65, %68 : vector<2x18x128xf32>
    %cst_12 = arith.constant 0.000000e+00 : f32
    %70 = vector.broadcast %cst_12 : f32 to vector<2x18x128xf32>
    %71 = arith.maximumf %69, %70 : vector<2x18x128xf32>
    %72 = vector.shape_cast %71 : vector<2x18x128xf32> to vector<2x9x2x128xf32>
    %73 = vector.extract_strided_slice %72 {offsets = [0, 0, 0, 0], sizes = [2, 9, 1, 128], strides = [1, 1, 1, 1]} : vector<2x9x2x128xf32> to vector<2x9x1x128xf32>
    %74 = vector.shape_cast %73 : vector<2x9x1x128xf32> to vector<2x9x128xf32>
    %75 = vector.extract_strided_slice %72 {offsets = [0, 0, 1, 0], sizes = [2, 9, 1, 128], strides = [1, 1, 1, 1]} : vector<2x9x2x128xf32> to vector<2x9x1x128xf32>
    %76 = vector.shape_cast %75 : vector<2x9x1x128xf32> to vector<2x9x128xf32>
    %77 = arith.maximumf %74, %76 : vector<2x9x128xf32>
    %78 = vector.shape_cast %77 : vector<2x9x128xf32> to vector<18x128xf32>
    %c0_13 = arith.constant 0 : index
    %c0_14 = arith.constant 0 : index
    %79 = vector.load %arg5[%c0_13, %c0_14] : memref<128x512xf32, #tpu.memory_space<vmem>>, vector<128x512xf32>
    %cst_15 = arith.constant dense<0.000000e+00> : vector<18x512xf32>
    %80 = tpu.matmul %78, %79, %cst_15 {dimension_numbers = #tpu.dot_dimension_numbers<[1], [0], [0], [1], [0, 0, 1, 1], [], []>} : vector<18x128xf32>, vector<128x512xf32>, vector<18x512xf32> -> vector<18x512xf32>
    %c0_16 = arith.constant 0 : index
    %c0_17 = arith.constant 0 : index
    %81 = vector.load %arg7[%c0_16, %c0_17] : memref<1x512xf32, #tpu.memory_space<vmem>>, vector<1x512xf32>
    %82 = vector.broadcast %81 : vector<1x512xf32> to vector<18x512xf32>
    %83 = arith.addf %80, %82 : vector<18x512xf32>
    %84 = vector.shape_cast %83 : vector<18x512xf32> to vector<2x9x512xf32>
    %c0_18 = arith.constant 0 : index
    %c0_19 = arith.constant 0 : index
    %85 = vector.load %arg6[%c0_18, %c0_19] : memref<128x512xf32, #tpu.memory_space<vmem>>, vector<128x512xf32>
    %cst_20 = arith.constant 0.000000e+00 : f32
    %86 = vector.broadcast %cst_20 : f32 to vector<2x128xf32>
    %cst_21 = arith.constant 0.000000e+00 : f32
    %87 = vector.broadcast %cst_21 : f32 to vector<2x128xf32>
    %88 = vector.extract_strided_slice %84 {offsets = [0, 0, 0], sizes = [2, 1, 512], strides = [1, 1, 1]} : vector<2x9x512xf32> to vector<2x1x512xf32>
    %89 = vector.shape_cast %88 : vector<2x1x512xf32> to vector<2x512xf32>
    %cst_22 = arith.constant dense<0.000000e+00> : vector<2x512xf32>
    %90 = tpu.matmul %86, %85, %cst_22 {dimension_numbers = #tpu.dot_dimension_numbers<[1], [0], [0], [1], [0, 0, 1, 1], [], []>} : vector<2x128xf32>, vector<128x512xf32>, vector<2x512xf32> -> vector<2x512xf32>
    %91 = arith.addf %89, %90 : vector<2x512xf32>
    %92 = vector.extract_strided_slice %91 {offsets = [0, 0], sizes = [2, 128], strides = [1, 1]} : vector<2x512xf32> to vector<2x128xf32>
    %93 = arith.negf %92 : vector<2x128xf32>
    %94 = math.exp %93 : vector<2x128xf32>
    %cst_23 = arith.constant 1.000000e+00 : f32
    %95 = vector.broadcast %cst_23 : f32 to vector<2x128xf32>
    %96 = arith.addf %95, %94 : vector<2x128xf32>
    %97 = arith.divf %95, %96 : vector<2x128xf32>
    %98 = vector.extract_strided_slice %91 {offsets = [0, 128], sizes = [2, 128], strides = [1, 1]} : vector<2x512xf32> to vector<2x128xf32>
    %99 = arith.negf %98 : vector<2x128xf32>
    %100 = math.exp %99 : vector<2x128xf32>
    %cst_24 = arith.constant 1.000000e+00 : f32
    %101 = vector.broadcast %cst_24 : f32 to vector<2x128xf32>
    %102 = arith.addf %101, %100 : vector<2x128xf32>
    %103 = arith.divf %101, %102 : vector<2x128xf32>
    %104 = vector.extract_strided_slice %91 {offsets = [0, 256], sizes = [2, 128], strides = [1, 1]} : vector<2x512xf32> to vector<2x128xf32>
    %105 = math.tanh %104 : vector<2x128xf32>
    %106 = vector.extract_strided_slice %91 {offsets = [0, 384], sizes = [2, 128], strides = [1, 1]} : vector<2x512xf32> to vector<2x128xf32>
    %107 = arith.negf %106 : vector<2x128xf32>
    %108 = math.exp %107 : vector<2x128xf32>
    %cst_25 = arith.constant 1.000000e+00 : f32
    %109 = vector.broadcast %cst_25 : f32 to vector<2x128xf32>
    %110 = arith.addf %109, %108 : vector<2x128xf32>
    %111 = arith.divf %109, %110 : vector<2x128xf32>
    %112 = arith.mulf %103, %87 : vector<2x128xf32>
    %113 = arith.mulf %97, %105 : vector<2x128xf32>
    %114 = arith.addf %112, %113 : vector<2x128xf32>
    %115 = math.tanh %114 : vector<2x128xf32>
    %116 = arith.mulf %111, %115 : vector<2x128xf32>
    %117 = vector.extract_strided_slice %84 {offsets = [0, 1, 0], sizes = [2, 1, 512], strides = [1, 1, 1]} : vector<2x9x512xf32> to vector<2x1x512xf32>
    %118 = vector.shape_cast %117 : vector<2x1x512xf32> to vector<2x512xf32>
    %cst_26 = arith.constant dense<0.000000e+00> : vector<2x512xf32>
    %119 = tpu.matmul %116, %85, %cst_26 {dimension_numbers = #tpu.dot_dimension_numbers<[1], [0], [0], [1], [0, 0, 1, 1], [], []>} : vector<2x128xf32>, vector<128x512xf32>, vector<2x512xf32> -> vector<2x512xf32>
    %120 = arith.addf %118, %119 : vector<2x512xf32>
    %121 = vector.extract_strided_slice %120 {offsets = [0, 0], sizes = [2, 128], strides = [1, 1]} : vector<2x512xf32> to vector<2x128xf32>
    %122 = arith.negf %121 : vector<2x128xf32>
    %123 = math.exp %122 : vector<2x128xf32>
    %cst_27 = arith.constant 1.000000e+00 : f32
    %124 = vector.broadcast %cst_27 : f32 to vector<2x128xf32>
    %125 = arith.addf %124, %123 : vector<2x128xf32>
    %126 = arith.divf %124, %125 : vector<2x128xf32>
    %127 = vector.extract_strided_slice %120 {offsets = [0, 128], sizes = [2, 128], strides = [1, 1]} : vector<2x512xf32> to vector<2x128xf32>
    %128 = arith.negf %127 : vector<2x128xf32>
    %129 = math.exp %128 : vector<2x128xf32>
    %cst_28 = arith.constant 1.000000e+00 : f32
    %130 = vector.broadcast %cst_28 : f32 to vector<2x128xf32>
    %131 = arith.addf %130, %129 : vector<2x128xf32>
    %132 = arith.divf %130, %131 : vector<2x128xf32>
    %133 = vector.extract_strided_slice %120 {offsets = [0, 256], sizes = [2, 128], strides = [1, 1]} : vector<2x512xf32> to vector<2x128xf32>
    %134 = math.tanh %133 : vector<2x128xf32>
    %135 = vector.extract_strided_slice %120 {offsets = [0, 384], sizes = [2, 128], strides = [1, 1]} : vector<2x512xf32> to vector<2x128xf32>
    %136 = arith.negf %135 : vector<2x128xf32>
    %137 = math.exp %136 : vector<2x128xf32>
    %cst_29 = arith.constant 1.000000e+00 : f32
    %138 = vector.broadcast %cst_29 : f32 to vector<2x128xf32>
    %139 = arith.addf %138, %137 : vector<2x128xf32>
    %140 = arith.divf %138, %139 : vector<2x128xf32>
    %141 = arith.mulf %132, %114 : vector<2x128xf32>
    %142 = arith.mulf %126, %134 : vector<2x128xf32>
    %143 = arith.addf %141, %142 : vector<2x128xf32>
    %144 = math.tanh %143 : vector<2x128xf32>
    %145 = arith.mulf %140, %144 : vector<2x128xf32>
    %146 = vector.extract_strided_slice %84 {offsets = [0, 2, 0], sizes = [2, 1, 512], strides = [1, 1, 1]} : vector<2x9x512xf32> to vector<2x1x512xf32>
    %147 = vector.shape_cast %146 : vector<2x1x512xf32> to vector<2x512xf32>
    %cst_30 = arith.constant dense<0.000000e+00> : vector<2x512xf32>
    %148 = tpu.matmul %145, %85, %cst_30 {dimension_numbers = #tpu.dot_dimension_numbers<[1], [0], [0], [1], [0, 0, 1, 1], [], []>} : vector<2x128xf32>, vector<128x512xf32>, vector<2x512xf32> -> vector<2x512xf32>
    %149 = arith.addf %147, %148 : vector<2x512xf32>
    %150 = vector.extract_strided_slice %149 {offsets = [0, 0], sizes = [2, 128], strides = [1, 1]} : vector<2x512xf32> to vector<2x128xf32>
    %151 = arith.negf %150 : vector<2x128xf32>
    %152 = math.exp %151 : vector<2x128xf32>
    %cst_31 = arith.constant 1.000000e+00 : f32
    %153 = vector.broadcast %cst_31 : f32 to vector<2x128xf32>
    %154 = arith.addf %153, %152 : vector<2x128xf32>
    %155 = arith.divf %153, %154 : vector<2x128xf32>
    %156 = vector.extract_strided_slice %149 {offsets = [0, 128], sizes = [2, 128], strides = [1, 1]} : vector<2x512xf32> to vector<2x128xf32>
    %157 = arith.negf %156 : vector<2x128xf32>
    %158 = math.exp %157 : vector<2x128xf32>
    %cst_32 = arith.constant 1.000000e+00 : f32
    %159 = vector.broadcast %cst_32 : f32 to vector<2x128xf32>
    %160 = arith.addf %159, %158 : vector<2x128xf32>
    %161 = arith.divf %159, %160 : vector<2x128xf32>
    %162 = vector.extract_strided_slice %149 {offsets = [0, 256], sizes = [2, 128], strides = [1, 1]} : vector<2x512xf32> to vector<2x128xf32>
    %163 = math.tanh %162 : vector<2x128xf32>
    %164 = vector.extract_strided_slice %149 {offsets = [0, 384], sizes = [2, 128], strides = [1, 1]} : vector<2x512xf32> to vector<2x128xf32>
    %165 = arith.negf %164 : vector<2x128xf32>
    %166 = math.exp %165 : vector<2x128xf32>
    %cst_33 = arith.constant 1.000000e+00 : f32
    %167 = vector.broadcast %cst_33 : f32 to vector<2x128xf32>
    %168 = arith.addf %167, %166 : vector<2x128xf32>
    %169 = arith.divf %167, %168 : vector<2x128xf32>
    %170 = arith.mulf %161, %143 : vector<2x128xf32>
    %171 = arith.mulf %155, %163 : vector<2x128xf32>
    %172 = arith.addf %170, %171 : vector<2x128xf32>
    %173 = math.tanh %172 : vector<2x128xf32>
    %174 = arith.mulf %169, %173 : vector<2x128xf32>
    %175 = vector.extract_strided_slice %84 {offsets = [0, 3, 0], sizes = [2, 1, 512], strides = [1, 1, 1]} : vector<2x9x512xf32> to vector<2x1x512xf32>
    %176 = vector.shape_cast %175 : vector<2x1x512xf32> to vector<2x512xf32>
    %cst_34 = arith.constant dense<0.000000e+00> : vector<2x512xf32>
    %177 = tpu.matmul %174, %85, %cst_34 {dimension_numbers = #tpu.dot_dimension_numbers<[1], [0], [0], [1], [0, 0, 1, 1], [], []>} : vector<2x128xf32>, vector<128x512xf32>, vector<2x512xf32> -> vector<2x512xf32>
    %178 = arith.addf %176, %177 : vector<2x512xf32>
    %179 = vector.extract_strided_slice %178 {offsets = [0, 0], sizes = [2, 128], strides = [1, 1]} : vector<2x512xf32> to vector<2x128xf32>
    %180 = arith.negf %179 : vector<2x128xf32>
    %181 = math.exp %180 : vector<2x128xf32>
    %cst_35 = arith.constant 1.000000e+00 : f32
    %182 = vector.broadcast %cst_35 : f32 to vector<2x128xf32>
    %183 = arith.addf %182, %181 : vector<2x128xf32>
    %184 = arith.divf %182, %183 : vector<2x128xf32>
    %185 = vector.extract_strided_slice %178 {offsets = [0, 128], sizes = [2, 128], strides = [1, 1]} : vector<2x512xf32> to vector<2x128xf32>
    %186 = arith.negf %185 : vector<2x128xf32>
    %187 = math.exp %186 : vector<2x128xf32>
    %cst_36 = arith.constant 1.000000e+00 : f32
    %188 = vector.broadcast %cst_36 : f32 to vector<2x128xf32>
    %189 = arith.addf %188, %187 : vector<2x128xf32>
    %190 = arith.divf %188, %189 : vector<2x128xf32>
    %191 = vector.extract_strided_slice %178 {offsets = [0, 256], sizes = [2, 128], strides = [1, 1]} : vector<2x512xf32> to vector<2x128xf32>
    %192 = math.tanh %191 : vector<2x128xf32>
    %193 = vector.extract_strided_slice %178 {offsets = [0, 384], sizes = [2, 128], strides = [1, 1]} : vector<2x512xf32> to vector<2x128xf32>
    %194 = arith.negf %193 : vector<2x128xf32>
    %195 = math.exp %194 : vector<2x128xf32>
    %cst_37 = arith.constant 1.000000e+00 : f32
    %196 = vector.broadcast %cst_37 : f32 to vector<2x128xf32>
    %197 = arith.addf %196, %195 : vector<2x128xf32>
    %198 = arith.divf %196, %197 : vector<2x128xf32>
    %199 = arith.mulf %190, %172 : vector<2x128xf32>
    %200 = arith.mulf %184, %192 : vector<2x128xf32>
    %201 = arith.addf %199, %200 : vector<2x128xf32>
    %202 = math.tanh %201 : vector<2x128xf32>
    %203 = arith.mulf %198, %202 : vector<2x128xf32>
    %204 = vector.extract_strided_slice %84 {offsets = [0, 4, 0], sizes = [2, 1, 512], strides = [1, 1, 1]} : vector<2x9x512xf32> to vector<2x1x512xf32>
    %205 = vector.shape_cast %204 : vector<2x1x512xf32> to vector<2x512xf32>
    %cst_38 = arith.constant dense<0.000000e+00> : vector<2x512xf32>
    %206 = tpu.matmul %203, %85, %cst_38 {dimension_numbers = #tpu.dot_dimension_numbers<[1], [0], [0], [1], [0, 0, 1, 1], [], []>} : vector<2x128xf32>, vector<128x512xf32>, vector<2x512xf32> -> vector<2x512xf32>
    %207 = arith.addf %205, %206 : vector<2x512xf32>
    %208 = vector.extract_strided_slice %207 {offsets = [0, 0], sizes = [2, 128], strides = [1, 1]} : vector<2x512xf32> to vector<2x128xf32>
    %209 = arith.negf %208 : vector<2x128xf32>
    %210 = math.exp %209 : vector<2x128xf32>
    %cst_39 = arith.constant 1.000000e+00 : f32
    %211 = vector.broadcast %cst_39 : f32 to vector<2x128xf32>
    %212 = arith.addf %211, %210 : vector<2x128xf32>
    %213 = arith.divf %211, %212 : vector<2x128xf32>
    %214 = vector.extract_strided_slice %207 {offsets = [0, 128], sizes = [2, 128], strides = [1, 1]} : vector<2x512xf32> to vector<2x128xf32>
    %215 = arith.negf %214 : vector<2x128xf32>
    %216 = math.exp %215 : vector<2x128xf32>
    %cst_40 = arith.constant 1.000000e+00 : f32
    %217 = vector.broadcast %cst_40 : f32 to vector<2x128xf32>
    %218 = arith.addf %217, %216 : vector<2x128xf32>
    %219 = arith.divf %217, %218 : vector<2x128xf32>
    %220 = vector.extract_strided_slice %207 {offsets = [0, 256], sizes = [2, 128], strides = [1, 1]} : vector<2x512xf32> to vector<2x128xf32>
    %221 = math.tanh %220 : vector<2x128xf32>
    %222 = vector.extract_strided_slice %207 {offsets = [0, 384], sizes = [2, 128], strides = [1, 1]} : vector<2x512xf32> to vector<2x128xf32>
    %223 = arith.negf %222 : vector<2x128xf32>
    %224 = math.exp %223 : vector<2x128xf32>
    %cst_41 = arith.constant 1.000000e+00 : f32
    %225 = vector.broadcast %cst_41 : f32 to vector<2x128xf32>
    %226 = arith.addf %225, %224 : vector<2x128xf32>
    %227 = arith.divf %225, %226 : vector<2x128xf32>
    %228 = arith.mulf %219, %201 : vector<2x128xf32>
    %229 = arith.mulf %213, %221 : vector<2x128xf32>
    %230 = arith.addf %228, %229 : vector<2x128xf32>
    %231 = math.tanh %230 : vector<2x128xf32>
    %232 = arith.mulf %227, %231 : vector<2x128xf32>
    %233 = vector.extract_strided_slice %84 {offsets = [0, 5, 0], sizes = [2, 1, 512], strides = [1, 1, 1]} : vector<2x9x512xf32> to vector<2x1x512xf32>
    %234 = vector.shape_cast %233 : vector<2x1x512xf32> to vector<2x512xf32>
    %cst_42 = arith.constant dense<0.000000e+00> : vector<2x512xf32>
    %235 = tpu.matmul %232, %85, %cst_42 {dimension_numbers = #tpu.dot_dimension_numbers<[1], [0], [0], [1], [0, 0, 1, 1], [], []>} : vector<2x128xf32>, vector<128x512xf32>, vector<2x512xf32> -> vector<2x512xf32>
    %236 = arith.addf %234, %235 : vector<2x512xf32>
    %237 = vector.extract_strided_slice %236 {offsets = [0, 0], sizes = [2, 128], strides = [1, 1]} : vector<2x512xf32> to vector<2x128xf32>
    %238 = arith.negf %237 : vector<2x128xf32>
    %239 = math.exp %238 : vector<2x128xf32>
    %cst_43 = arith.constant 1.000000e+00 : f32
    %240 = vector.broadcast %cst_43 : f32 to vector<2x128xf32>
    %241 = arith.addf %240, %239 : vector<2x128xf32>
    %242 = arith.divf %240, %241 : vector<2x128xf32>
    %243 = vector.extract_strided_slice %236 {offsets = [0, 128], sizes = [2, 128], strides = [1, 1]} : vector<2x512xf32> to vector<2x128xf32>
    %244 = arith.negf %243 : vector<2x128xf32>
    %245 = math.exp %244 : vector<2x128xf32>
    %cst_44 = arith.constant 1.000000e+00 : f32
    %246 = vector.broadcast %cst_44 : f32 to vector<2x128xf32>
    %247 = arith.addf %246, %245 : vector<2x128xf32>
    %248 = arith.divf %246, %247 : vector<2x128xf32>
    %249 = vector.extract_strided_slice %236 {offsets = [0, 256], sizes = [2, 128], strides = [1, 1]} : vector<2x512xf32> to vector<2x128xf32>
    %250 = math.tanh %249 : vector<2x128xf32>
    %251 = vector.extract_strided_slice %236 {offsets = [0, 384], sizes = [2, 128], strides = [1, 1]} : vector<2x512xf32> to vector<2x128xf32>
    %252 = arith.negf %251 : vector<2x128xf32>
    %253 = math.exp %252 : vector<2x128xf32>
    %cst_45 = arith.constant 1.000000e+00 : f32
    %254 = vector.broadcast %cst_45 : f32 to vector<2x128xf32>
    %255 = arith.addf %254, %253 : vector<2x128xf32>
    %256 = arith.divf %254, %255 : vector<2x128xf32>
    %257 = arith.mulf %248, %230 : vector<2x128xf32>
    %258 = arith.mulf %242, %250 : vector<2x128xf32>
    %259 = arith.addf %257, %258 : vector<2x128xf32>
    %260 = math.tanh %259 : vector<2x128xf32>
    %261 = arith.mulf %256, %260 : vector<2x128xf32>
    %262 = vector.extract_strided_slice %84 {offsets = [0, 6, 0], sizes = [2, 1, 512], strides = [1, 1, 1]} : vector<2x9x512xf32> to vector<2x1x512xf32>
    %263 = vector.shape_cast %262 : vector<2x1x512xf32> to vector<2x512xf32>
    %cst_46 = arith.constant dense<0.000000e+00> : vector<2x512xf32>
    %264 = tpu.matmul %261, %85, %cst_46 {dimension_numbers = #tpu.dot_dimension_numbers<[1], [0], [0], [1], [0, 0, 1, 1], [], []>} : vector<2x128xf32>, vector<128x512xf32>, vector<2x512xf32> -> vector<2x512xf32>
    %265 = arith.addf %263, %264 : vector<2x512xf32>
    %266 = vector.extract_strided_slice %265 {offsets = [0, 0], sizes = [2, 128], strides = [1, 1]} : vector<2x512xf32> to vector<2x128xf32>
    %267 = arith.negf %266 : vector<2x128xf32>
    %268 = math.exp %267 : vector<2x128xf32>
    %cst_47 = arith.constant 1.000000e+00 : f32
    %269 = vector.broadcast %cst_47 : f32 to vector<2x128xf32>
    %270 = arith.addf %269, %268 : vector<2x128xf32>
    %271 = arith.divf %269, %270 : vector<2x128xf32>
    %272 = vector.extract_strided_slice %265 {offsets = [0, 128], sizes = [2, 128], strides = [1, 1]} : vector<2x512xf32> to vector<2x128xf32>
    %273 = arith.negf %272 : vector<2x128xf32>
    %274 = math.exp %273 : vector<2x128xf32>
    %cst_48 = arith.constant 1.000000e+00 : f32
    %275 = vector.broadcast %cst_48 : f32 to vector<2x128xf32>
    %276 = arith.addf %275, %274 : vector<2x128xf32>
    %277 = arith.divf %275, %276 : vector<2x128xf32>
    %278 = vector.extract_strided_slice %265 {offsets = [0, 256], sizes = [2, 128], strides = [1, 1]} : vector<2x512xf32> to vector<2x128xf32>
    %279 = math.tanh %278 : vector<2x128xf32>
    %280 = vector.extract_strided_slice %265 {offsets = [0, 384], sizes = [2, 128], strides = [1, 1]} : vector<2x512xf32> to vector<2x128xf32>
    %281 = arith.negf %280 : vector<2x128xf32>
    %282 = math.exp %281 : vector<2x128xf32>
    %cst_49 = arith.constant 1.000000e+00 : f32
    %283 = vector.broadcast %cst_49 : f32 to vector<2x128xf32>
    %284 = arith.addf %283, %282 : vector<2x128xf32>
    %285 = arith.divf %283, %284 : vector<2x128xf32>
    %286 = arith.mulf %277, %259 : vector<2x128xf32>
    %287 = arith.mulf %271, %279 : vector<2x128xf32>
    %288 = arith.addf %286, %287 : vector<2x128xf32>
    %289 = math.tanh %288 : vector<2x128xf32>
    %290 = arith.mulf %285, %289 : vector<2x128xf32>
    %291 = vector.extract_strided_slice %84 {offsets = [0, 7, 0], sizes = [2, 1, 512], strides = [1, 1, 1]} : vector<2x9x512xf32> to vector<2x1x512xf32>
    %292 = vector.shape_cast %291 : vector<2x1x512xf32> to vector<2x512xf32>
    %cst_50 = arith.constant dense<0.000000e+00> : vector<2x512xf32>
    %293 = tpu.matmul %290, %85, %cst_50 {dimension_numbers = #tpu.dot_dimension_numbers<[1], [0], [0], [1], [0, 0, 1, 1], [], []>} : vector<2x128xf32>, vector<128x512xf32>, vector<2x512xf32> -> vector<2x512xf32>
    %294 = arith.addf %292, %293 : vector<2x512xf32>
    %295 = vector.extract_strided_slice %294 {offsets = [0, 0], sizes = [2, 128], strides = [1, 1]} : vector<2x512xf32> to vector<2x128xf32>
    %296 = arith.negf %295 : vector<2x128xf32>
    %297 = math.exp %296 : vector<2x128xf32>
    %cst_51 = arith.constant 1.000000e+00 : f32
    %298 = vector.broadcast %cst_51 : f32 to vector<2x128xf32>
    %299 = arith.addf %298, %297 : vector<2x128xf32>
    %300 = arith.divf %298, %299 : vector<2x128xf32>
    %301 = vector.extract_strided_slice %294 {offsets = [0, 128], sizes = [2, 128], strides = [1, 1]} : vector<2x512xf32> to vector<2x128xf32>
    %302 = arith.negf %301 : vector<2x128xf32>
    %303 = math.exp %302 : vector<2x128xf32>
    %cst_52 = arith.constant 1.000000e+00 : f32
    %304 = vector.broadcast %cst_52 : f32 to vector<2x128xf32>
    %305 = arith.addf %304, %303 : vector<2x128xf32>
    %306 = arith.divf %304, %305 : vector<2x128xf32>
    %307 = vector.extract_strided_slice %294 {offsets = [0, 256], sizes = [2, 128], strides = [1, 1]} : vector<2x512xf32> to vector<2x128xf32>
    %308 = math.tanh %307 : vector<2x128xf32>
    %309 = vector.extract_strided_slice %294 {offsets = [0, 384], sizes = [2, 128], strides = [1, 1]} : vector<2x512xf32> to vector<2x128xf32>
    %310 = arith.negf %309 : vector<2x128xf32>
    %311 = math.exp %310 : vector<2x128xf32>
    %cst_53 = arith.constant 1.000000e+00 : f32
    %312 = vector.broadcast %cst_53 : f32 to vector<2x128xf32>
    %313 = arith.addf %312, %311 : vector<2x128xf32>
    %314 = arith.divf %312, %313 : vector<2x128xf32>
    %315 = arith.mulf %306, %288 : vector<2x128xf32>
    %316 = arith.mulf %300, %308 : vector<2x128xf32>
    %317 = arith.addf %315, %316 : vector<2x128xf32>
    %318 = math.tanh %317 : vector<2x128xf32>
    %319 = arith.mulf %314, %318 : vector<2x128xf32>
    %320 = vector.extract_strided_slice %84 {offsets = [0, 8, 0], sizes = [2, 1, 512], strides = [1, 1, 1]} : vector<2x9x512xf32> to vector<2x1x512xf32>
    %321 = vector.shape_cast %320 : vector<2x1x512xf32> to vector<2x512xf32>
    %cst_54 = arith.constant dense<0.000000e+00> : vector<2x512xf32>
    %322 = tpu.matmul %319, %85, %cst_54 {dimension_numbers = #tpu.dot_dimension_numbers<[1], [0], [0], [1], [0, 0, 1, 1], [], []>} : vector<2x128xf32>, vector<128x512xf32>, vector<2x512xf32> -> vector<2x512xf32>
    %323 = arith.addf %321, %322 : vector<2x512xf32>
    %324 = vector.extract_strided_slice %323 {offsets = [0, 0], sizes = [2, 128], strides = [1, 1]} : vector<2x512xf32> to vector<2x128xf32>
    %325 = arith.negf %324 : vector<2x128xf32>
    %326 = math.exp %325 : vector<2x128xf32>
    %cst_55 = arith.constant 1.000000e+00 : f32
    %327 = vector.broadcast %cst_55 : f32 to vector<2x128xf32>
    %328 = arith.addf %327, %326 : vector<2x128xf32>
    %329 = arith.divf %327, %328 : vector<2x128xf32>
    %330 = vector.extract_strided_slice %323 {offsets = [0, 128], sizes = [2, 128], strides = [1, 1]} : vector<2x512xf32> to vector<2x128xf32>
    %331 = arith.negf %330 : vector<2x128xf32>
    %332 = math.exp %331 : vector<2x128xf32>
    %cst_56 = arith.constant 1.000000e+00 : f32
    %333 = vector.broadcast %cst_56 : f32 to vector<2x128xf32>
    %334 = arith.addf %333, %332 : vector<2x128xf32>
    %335 = arith.divf %333, %334 : vector<2x128xf32>
    %336 = vector.extract_strided_slice %323 {offsets = [0, 256], sizes = [2, 128], strides = [1, 1]} : vector<2x512xf32> to vector<2x128xf32>
    %337 = math.tanh %336 : vector<2x128xf32>
    %338 = vector.extract_strided_slice %323 {offsets = [0, 384], sizes = [2, 128], strides = [1, 1]} : vector<2x512xf32> to vector<2x128xf32>
    %339 = arith.negf %338 : vector<2x128xf32>
    %340 = math.exp %339 : vector<2x128xf32>
    %cst_57 = arith.constant 1.000000e+00 : f32
    %341 = vector.broadcast %cst_57 : f32 to vector<2x128xf32>
    %342 = arith.addf %341, %340 : vector<2x128xf32>
    %343 = arith.divf %341, %342 : vector<2x128xf32>
    %344 = arith.mulf %335, %317 : vector<2x128xf32>
    %345 = arith.mulf %329, %337 : vector<2x128xf32>
    %346 = arith.addf %344, %345 : vector<2x128xf32>
    %347 = math.tanh %346 : vector<2x128xf32>
    %348 = arith.mulf %343, %347 : vector<2x128xf32>
    %c0_58 = arith.constant 0 : index
    %c0_59 = arith.constant 0 : index
    %349 = vector.load %arg8[%c0_58, %c0_59] : memref<128x50xf32, #tpu.memory_space<vmem>>, vector<128x50xf32>
    %cst_60 = arith.constant dense<0.000000e+00> : vector<2x50xf32>
    %350 = tpu.matmul %348, %349, %cst_60 {dimension_numbers = #tpu.dot_dimension_numbers<[1], [0], [0], [1], [0, 0, 1, 1], [], []>} : vector<2x128xf32>, vector<128x50xf32>, vector<2x50xf32> -> vector<2x50xf32>
    %c0_61 = arith.constant 0 : index
    %c0_62 = arith.constant 0 : index
    %351 = vector.load %arg9[%c0_61, %c0_62] : memref<1x50xf32, #tpu.memory_space<vmem>>, vector<1x50xf32>
    %352 = vector.broadcast %351 : vector<1x50xf32> to vector<2x50xf32>
    %353 = arith.addf %350, %352 : vector<2x50xf32>
    %cst_63 = arith.constant 0.000000e+00 : f32
    %354 = vector.broadcast %cst_63 : f32 to vector<2x50xf32>
    %355 = arith.maximumf %353, %354 : vector<2x50xf32>
    %c0_64 = arith.constant 0 : index
    %c0_65 = arith.constant 0 : index
    %356 = vector.load %arg10[%c0_64, %c0_65] : memref<50x4xf32, #tpu.memory_space<vmem>>, vector<50x4xf32>
    %cst_66 = arith.constant dense<0.000000e+00> : vector<2x4xf32>
    %357 = tpu.matmul %355, %356, %cst_66 {dimension_numbers = #tpu.dot_dimension_numbers<[1], [0], [0], [1], [0, 0, 1, 1], [], []>} : vector<2x50xf32>, vector<50x4xf32>, vector<2x4xf32> -> vector<2x4xf32>
    %c0_67 = arith.constant 0 : index
    %c0_68 = arith.constant 0 : index
    %358 = vector.load %arg11[%c0_67, %c0_68] : memref<1x4xf32, #tpu.memory_space<vmem>>, vector<1x4xf32>
    %359 = vector.broadcast %358 : vector<1x4xf32> to vector<2x4xf32>
    %360 = arith.addf %357, %359 : vector<2x4xf32>
    %c0_69 = arith.constant 0 : index
    %c0_70 = arith.constant 0 : index
    %361 = vector.load %arg12[%c0_69, %c0_70] : memref<2x4xf32, #tpu.memory_space<vmem>>, vector<2x4xf32>
    tpu.vector_store %arg12[%c0_69, %c0_70], %360 {strides = array<i32>} : memref<2x4xf32, #tpu.memory_space<vmem>>, vector<2x4xf32>,
    return
  }
}

</mosaic_0001>

<bundles_post_ra>
// kernel: rcnn_forward.1
= control target key start
LH: loop header
LB: loop body
LE: loop exit
PB: predicated region body
PF: predicated region fallthrough
CT: control target
= control target key end

     0   :  { %17 = vsyncpa [#allocation3], 0  ;;  %s8494_s0 = inlined_call_operand.vmem [shape: f32[2,1,48], index: 0, kind: input, shape index: {}]   ;;  %s8495_s1 = inlined_call_operand.vmem [shape: f32[5,64], index: 1, kind: input, shape index: {}]   ;;  %s8496_s2 = inlined_call_operand.vmem [shape: f32[1,64], index: 2, kind: input, shape index: {}]   ;;  %s8497_s3 = inlined_call_operand.hbm [shape: f32[320,128], index: 3, kind: input, shape index: {}]   ;;  %s8498_s4 = inlined_call_operand.vmem [shape: f32[1,128], index: 4, kind: input, shape index: {}]   ;;  %s8499_s5 = inlined_call_operand.hbm [shape: f32[128,512], index: 5, kind: input, shape index: {}]   ;;  %s8500_s6 = inlined_call_operand.hbm [shape: f32[128,512], index: 6, kind: input, shape index: {}]   ;;  %s8501_s7 = inlined_call_operand.vmem [shape: f32[1,512], index: 7, kind: input, shape index: {}]   ;;  %s8502_s8 = inlined_call_operand.vmem [shape: f32[128,50], index: 8, kind: input, shape index: {}]   ;;  %s8503_s9 = inlined_call_operand.vmem [shape: f32[1,50], index: 9, kind: input, shape index: {}]   ;;  %s8504_s10 = inlined_call_operand.vmem [shape: f32[50,4], index: 10, kind: input, shape index: {}]   ;;  %s8505_s11 = inlined_call_operand.vmem [shape: f32[1,4], index: 11, kind: input, shape index: {}]   ;;  %s8506_s12 = inlined_call_operand.hbm [shape: f32[2,4], index: 12, kind: output, shape index: {}]  }
   0x1   :  { %18 = vsyncpa [#allocation6], 0 }
   0x2   :  { %19 = vsyncpa [#allocation4], 0  ;;  %s6796_s21 = smov [#allocation5]   ;;  %s6702_s25 = scalar_lea.hbm %s8499_s5, 8192 }
   0x3   :  { %s45_s22 = sshll.u32 %s6796_s21, 4  ;;  %p6703_p0 = scmp.ne.s32.totalorder %s8499_s5, %s6702_s25  ;;  %s46_s22 = int_to_ptr.vmem [resolvable:$true] %s45_s22 }
   0x4   :  { %p6706_p1 = scmp.lt.u32.totalorder %s6702_s25, %s8499_s5 }
   0x6   :  { %p6708_p2 = pnand %p6706_p1, %p6703_p0 }
   0x8   :  { %6711 = shalt.err (!%p6708_p2)
}
   0x9   :  { %s6712_s30 = scalar_lea.vmem %s46_s22, 8192  ;;  %p6717_p4 = scmp.lt.s32.totalorder %s46_s22, %s46_s22 }
   0xa   :  { %p6713_p3 = scmp.ne.s32.totalorder %s46_s22, %s6712_s30  ;;  %p6718_p5 = scmp.lt.s32.totalorder %s6712_s30, %s6712_s30 }
   0xc   :  { %p6719_p6 = por %p6718_p5, %p6717_p4 }
   0xe   :  { %p6720_p7 = pnand %p6719_p6, %p6713_p3 }
  0x10   :  { %6723 = shalt.err (!%p6720_p7)
}
  0x11   :  { %s6797_s13 = smov 512   ;;  %s6798_s14 = smov 32  }
  0x12   :  { %51 = dma.hbm_to_vmem [thread:$0]  %s8499_s5, 8192, %s46_s22, [#allocation6], %s6797_s13, %s6797_s13, %s6798_s14  }
  0x13   :  { %s6799_s17 = smov [#allocation2]   ;;  %s6724_s21 = scalar_lea.hbm %s8497_s3, 5120 }
  0x14   :  { %s31_s18 = sshll.u32 %s6799_s17, 4  ;;  %p6725_p8 = scmp.ne.s32.totalorder %s8497_s3, %s6724_s21  ;;  %s32_s18 = int_to_ptr.vmem [resolvable:$true] %s31_s18 }
  0x15   :  { %p6728_p9 = scmp.lt.u32.totalorder %s6724_s21, %s8497_s3 }
  0x17   :  { %p6730_p10 = pnand %p6728_p9, %p6725_p8 }
  0x19   :  { %6733 = shalt.err (!%p6730_p10)
}
  0x1a   :  { %s6734_s27 = scalar_lea.vmem %s32_s18, 5120  ;;  %p6739_p12 = scmp.lt.s32.totalorder %s32_s18, %s32_s18 }
  0x1b   :  { %p6735_p11 = scmp.ne.s32.totalorder %s32_s18, %s6734_s27  ;;  %p6740_p13 = scmp.lt.s32.totalorder %s6734_s27, %s6734_s27 }
  0x1d   :  { %p6741_p0 = por %p6740_p13, %p6739_p12 }
  0x1f   :  { %p6742_p1 = pnand %p6741_p0, %p6735_p11 }
  0x21   :  { %6745 = shalt.err (!%p6742_p1)
}
  0x22   :  { %s6800_s5 = smov 128   ;;  %s6801_s22 = smov 8  }
  0x23   :  { %37 = dma.hbm_to_vmem [thread:$0]  %s8497_s3, 5120, %s32_s18, [#allocation3], %s6800_s5, %s6800_s5, %s6801_s22  }
  0x24   :  { %s6802_s30 = smov [#allocation7]   ;;  %s6746_s19 = scalar_lea.hbm %s8500_s6, 8192 }
  0x25   :  { %s57_s15 = sshll.u32 %s6802_s30, 4  ;;  %p6747_p2 = scmp.ne.s32.totalorder %s8500_s6, %s6746_s19  ;;  %s58_s15 = int_to_ptr.vmem [resolvable:$true] %s57_s15 }
  0x26   :  { %p6750_p3 = scmp.lt.u32.totalorder %s6746_s19, %s8500_s6 }
  0x28   :  { %p6752_p4 = pnand %p6750_p3, %p6747_p2 }
  0x2a   :  { %6755 = shalt.err (!%p6752_p4)
}
  0x2b   :  { %s6756_s25 = scalar_lea.vmem %s58_s15, 8192  ;;  %p6761_p6 = scmp.lt.s32.totalorder %s58_s15, %s58_s15 }
  0x2c   :  { %p6757_p5 = scmp.ne.s32.totalorder %s58_s15, %s6756_s25  ;;  %p6762_p7 = scmp.lt.s32.totalorder %s6756_s25, %s6756_s25 }
  0x2e   :  { %p6763_p8 = por %p6762_p7, %p6761_p6 }
  0x30   :  { %p6764_p9 = pnand %p6763_p8, %p6757_p5 }
  0x32   :  { %6767 = shalt.err (!%p6764_p9)
}
  0x33   :  { %63 = dma.hbm_to_vmem [thread:$0]  %s8500_s6, 8192, %s58_s15, [#allocation6], %s6797_s13, %s6797_s13, %s6798_s14  }
  0x34   :  { %6790 = dma.done.wait [#allocation3], 5120  }
  0x35   :  { %6791 = vsyncadd [#allocation3], 4294962176 }
  0x36   :  { %6792 = dma.done.wait [#allocation6], 16384  }
  0x37   :  { %6793 = vsyncadd [#allocation6], 4294950912  ;;  %v6920_v0 = vld [vmem:[%s8494_s0] ss:$0 sm:$0xff]  ;;  %v1576_v2 = vld [vmem:[#allocation2 + $0x108] sm:$0xff]  ;;  %v8507_v4 = vmov 0.0|0.0   ;;  %v140_v16 = vlaneseq }
  0x38   :  { %246 = vbcast.lane.b32.xlu1 %v6920_v0, 258  ;;  %91 = vbcast.lane.b32.xlu0 %v6920_v0, 256  ;;  %v1575_v1 = vld [vmem:[#allocation2 + $0x100] sm:$0xff]  ;;  %v1577_v5 = vld [vmem:[#allocation2 + $0x110] sm:$0xff]  ;;  %v1578_v6 = vld [vmem:[#allocation2 + $0x118] sm:$0xff]  ;;  %vm6804_vm0 = vmmov 0  }
  0x39   :  { %v5716_v3 = vpack.c.bf16 %v1576_v2, %v1575_v1  ;;  %5715 = vmatprep.subr.bf16.mxu1 %v8507_v4  ;;  %v5719_v7 = vpack.c.bf16 %v1578_v6, %v1577_v5  ;;  %v5377_v8 = vld [vmem:[%s8494_s0 + $0x1] ss:$0 sm:$0xff]  ;;  %v1580_v10 = vld [vmem:[#allocation2 + $0x128] sm:$0xff]  ;;  %v1581_v12 = vld [vmem:[#allocation2 + $0x130] sm:$0xff]  ;;  %v8512_v15 = vmov 0.0   ;;  %v6961_v19 = vshrl.u32 %v140_v16, 7 }
  0x3a   :  { %v1579_v9 = vld [vmem:[#allocation2 + $0x120] sm:$0xff]  ;;  %v1582_v13 = vld [vmem:[#allocation2 + $0x138] sm:$0xff]  ;;  %5616 = vmatprep.mubr.msk.f32.mxu1 %vm6804_vm0, %v8512_v15  ;;  %v1560_v36 = vld [vmem:[#allocation2 + $0x88] sm:$0xff]  ;;  %v6806_v56 = vmov 1983009808   ;;  %vm1101_vm1 = vcmask 1041409  }
  0x3b   :  { %5717 = vmatpush3.bf16.msra.mxu1 %v5716_v3  ;;  %v5722_v11 = vpack.c.bf16 %v1580_v10, %v1579_v9  ;;  %v5725_v14 = vpack.c.bf16 %v1582_v13, %v1581_v12  ;;  %8528 = vst [vmem:[#allocation12_spill] sm:$0xff] %v6961_v19  ;;  %v8510_v20 = vsub.s32 1, %v6961_v19  ;;  %v6967_v23 = vsub.s32 0, %v6961_v19  ;;  %v85_v24 = vld [vmem:[%s8495_s1] sm:$0x1f]  ;;  %v1544_v42 = vld [vmem:[#allocation2 + $0x8] sm:$0xff] }
  0x3c   :  { %95 = vbcast.lane.b32.xlu1 %v6920_v0, 264  ;;  %170 = vbcast.lane.b32.xlu0 %v6920_v0, 257  ;;  %v8511_v25 = vsub.s32 2, %v6961_v19  ;;  %v8509_v30 = vsub.s32 3, %v6961_v19  ;;  %v1559_v35 = vld [vmem:[#allocation2 + $0x80] sm:$0xff]  ;;  %v446_v40 = vsub.s32 4, %v6961_v19  ;;  %v517_v57 = vunpack.c.l.s4 %v6806_v56 }
  0x3d   :  { %5718 = vmatprep.subr.bf16.mxu1 %v8507_v4  ;;  %v6975_v26 = vrot.slane %v85_v24, %v8510_v20  ;;  %v6982_v29 = vrot.slane %v85_v24, %v6967_v23  ;;  %v1543_v37 = vld [vmem:[#allocation2] sm:$0xff]  ;;  %v5683_v41 = vpack.c.bf16 %v1560_v36, %v1559_v35  ;;  %v1561_v43 = vld [vmem:[#allocation2 + $0x90] sm:$0xff]  ;;  %v1562_v44 = vld [vmem:[#allocation2 + $0x98] sm:$0xff]  ;;  %vm1103_vm2 = vcmask 1042434   ;;  %s6809_s28 = smov [#allocation8]  }
  0x3e   :  { %v6987_v31 = vrot.slane %v85_v24, %v8511_v25  ;;  %v6995_v39 = vrot.slane %v85_v24, %v8509_v30  ;;  %v5685_v45 = vpack.c.bf16 %v1544_v42, %v1543_v37  ;;  %v5687_v46 = vpack.c.bf16 %v1562_v44, %v1561_v43  ;;  %v1545_v47 = vld [vmem:[#allocation2 + $0x10] sm:$0xff]  ;;  %v1546_v48 = vld [vmem:[#allocation2 + $0x18] sm:$0xff]  ;;  %v1563_v49 = vld [vmem:[#allocation2 + $0xa0] sm:$0xff] }
  0x3f   :  { %5720 = vmatpush3.bf16.msra.mxu1 %v5719_v7  ;;  %5684 = vmatprep.subr.bf16.mxu0 %v5683_v41  ;;  %v1564_v52 = vld [vmem:[#allocation2 + $0xa8] sm:$0xff]  ;;  %v5689_v55 = vpack.c.bf16 %v1546_v48, %v1545_v47  ;;  %v7000_v59 = vrot.slane %v85_v24, %v446_v40  ;;  %v1547_v61 = vld [vmem:[#allocation2 + $0x20] sm:$0xff]  ;;  %v1565_v63 = vld [vmem:[#allocation2 + $0xb0] sm:$0xff]  ;;  %v518_v6 = vunpack.c.0.s8 %v517_v57  ;;  %vm1105_vm3 = vcmask 1043459  }
  0x40   :  { %99 = vbcast.lane.b32.xlu1 %v6920_v0, 272  ;;  %174 = vbcast.lane.b32.xlu0 %v6920_v0, 265  ;;  %v5691_v60 = vpack.c.bf16 %v1564_v52, %v1563_v49  ;;  %v1548_v62 = vld [vmem:[#allocation2 + $0x28] sm:$0xff]  ;;  %v1549_v10 = vld [vmem:[#allocation2 + $0x30] sm:$0xff]  ;;  %v7008_v12 = vld [vmem:[%s8496_s2] ss:$0 sm:$0xff] }
  0x41   :  { %5721 = vmatprep.subr.bf16.mxu1 %v8507_v4  ;;  %5686 = vmatpush3.bf16.msra.mxu0 %v5685_v45  ;;  %v5693_v5 = vpack.c.bf16 %v1548_v62, %v1547_v61  ;;  %v1567_v13 = vld [vmem:[#allocation2 + $0xc0] sm:$0xff]  ;;  %v7011_v24 = vsub.s32 %v518_v6, %v6961_v19  ;;  %v1552_v36 = vld [vmem:[#allocation2 + $0x48] sm:$0xff]  ;;  %vm1109_vm4 = vcmask 1045509   ;;  %vm1107_vm5 = vcmask 1044484   ;;  %s6807_s2 = smov 64  }
  0x42   :  { %5688 = vmatprep.subr.bf16.mxu0 %v5687_v46  ;;  %v1551_v35 = vld [vmem:[#allocation2 + $0x40] sm:$0xff]  ;;  %vm1111_vm6 = vcmask 1046534   ;;  %vm1113_vm7 = vcmask 1047559   ;;  %vm1346_vm8 = vcmask 523264   ;;  %vm5284_vm9 = vcmask 1041408  }
  0x43   :  { %5723 = vmatpush3.bf16.msra.mxu1 %v5722_v11  ;;  %v1550_v11 = vld [vmem:[#allocation2 + $0x38] sm:$0xff]  ;;  %v5701_v47 = vpack.c.bf16 %v1552_v36, %v1551_v35  ;;  %vm5280_vm10 = vcmask 408576   ;;  %vm5358_vm11 = vcmask 25600  }
  0x44   :  { %322 = vbcast.lane.b32.xlu1 %v6920_v0, 259  ;;  %178 = vbcast.lane.b32.xlu0 %v6920_v0, 273 }
  0x45   :  { %5724 = vmatprep.subr.bf16.mxu1 %v8507_v4  ;;  %5690 = vmatpush3.bf16.msra.mxu0 %v5689_v55 }
  0x46   :  { %5692 = vmatprep.subr.bf16.mxu0 %v5691_v60 }
  0x47   :  { %5726 = vmatpush3.bf16.msra.mxu1 %v5725_v14  ;;  %v1568_v14 = vld [vmem:[#allocation2 + $0xc8] sm:$0xff] }
  0x48   :  { %254 = vbcast.lane.b32.xlu1 %v6920_v0, 274  ;;  %250 = vbcast.lane.b32.xlu0 %v6920_v0, 266 }
  0x49   :  { %5694 = vmatpush3.bf16.msra.mxu0 %v5693_v5 }
  0x4c   :  { %103 = vbcast.lane.b32.xlu1 %v6920_v0, 280  ;;  %398 = vbcast.lane.b32.xlu0 %v6920_v0, 260 }
  0x50   :  { %326 = vbcast.lane.b32.xlu1 %v6920_v0, 267  ;;  %182 = vbcast.lane.b32.xlu0 %v6920_v0, 281 }
  0x54   :  { %258 = vbcast.lane.b32.xlu1 %v6920_v0, 282  ;;  %330 = vbcast.lane.b32.xlu0 %v6920_v0, 275 }
  0x58   :  { %406 = vbcast.lane.b32.xlu1 %v6920_v0, 276  ;;  %402 = vbcast.lane.b32.xlu0 %v6920_v0, 268 }
  0x5c   :  { %186 = vbcast.lane.b32.xlu1 %v6920_v0, 289  ;;  %107 = vbcast.lane.b32.xlu0 %v6920_v0, 288 }
  0x60   :  { %262 = vbcast.lane.b32.xlu1 %v6920_v0, 290  ;;  %334 = vbcast.lane.b32.xlu0 %v6920_v0, 283 }
  0x64   :  { %338 = vbcast.lane.b32.xlu1 %v6920_v0, 291  ;;  %410 = vbcast.lane.b32.xlu0 %v6920_v0, 284 }
  0x68   :  { %118 = vbcast.lane.b32.xlu1 %v5377_v8, 256  ;;  %414 = vbcast.lane.b32.xlu0 %v6920_v0, 292 }
  0x6c   :  { %270 = vbcast.lane.b32.xlu1 %v5377_v8, 258  ;;  %194 = vbcast.lane.b32.xlu0 %v5377_v8, 257 }
  0x70   :  { %198 = vbcast.lane.b32.xlu1 %v5377_v8, 265  ;;  %122 = vbcast.lane.b32.xlu0 %v5377_v8, 264 }
  0x74   :  { %202 = vbcast.lane.b32.xlu1 %v5377_v8, 273  ;;  %126 = vbcast.lane.b32.xlu0 %v5377_v8, 272 }
  0x78   :  { %274 = vbcast.lane.b32.xlu1 %v5377_v8, 266  ;;  %346 = vbcast.lane.b32.xlu0 %v5377_v8, 259 }
  0x7c   :  { %422 = vbcast.lane.b32.xlu1 %v5377_v8, 260  ;;  %278 = vbcast.lane.b32.xlu0 %v5377_v8, 274 }
  0x80   :  { %206 = vbcast.lane.b32.xlu1 %v5377_v8, 281  ;;  %130 = vbcast.lane.b32.xlu0 %v5377_v8, 280 }
  0x84   :  { %354 = vbcast.lane.b32.xlu1 %v5377_v8, 275  ;;  %350 = vbcast.lane.b32.xlu0 %v5377_v8, 267 }
  0x88   :  { %426 = vbcast.lane.b32.xlu1 %v5377_v8, 268  ;;  %282 = vbcast.lane.b32.xlu0 %v5377_v8, 282 }
  0x8c   :  { %134 = vbcast.lane.b32.xlu1 %v5377_v8, 288  ;;  %430 = vbcast.lane.b32.xlu0 %v5377_v8, 276 }
  0x90   :  { %358 = vbcast.lane.b32.xlu1 %v5377_v8, 283  ;;  %210 = vbcast.lane.b32.xlu0 %v5377_v8, 289 }
  0x94   :  { %190 = vbcast.lane.b32.xlu1 %v6920_v0, 297  ;;  %111 = vbcast.lane.b32.xlu0 %v6920_v0, 296 }
  0x98   :  { %434 = vbcast.lane.b32.xlu1 %v5377_v8, 284  ;;  %286 = vbcast.lane.b32.xlu0 %v5377_v8, 290 }
  0x9c   :  { %362 = vbcast.lane.b32.xlu1 %v5377_v8, 291  ;;  %266 = vbcast.lane.b32.xlu0 %v6920_v0, 298 }
  0xa0   :  { %438 = vbcast.lane.b32.xlu1 %v5377_v8, 292  ;;  %342 = vbcast.lane.b32.xlu0 %v6920_v0, 299 }
  0xa4   :  { %418 = vbcast.lane.b32.xlu0 %v6920_v0, 300  ;;  %138 = vbcast.lane.b32.xlu1 %v5377_v8, 296  ;;  %v1566_v0 = vld [vmem:[#allocation2 + $0xb8] sm:$0xff] }
  0xa5   :  { %v5695_v9 = vpack.c.bf16 %v1566_v0, %v1565_v63 }
  0xa7   :  { %5696 = vmatprep.subr.bf16.mxu0 %v5695_v9 }
  0xa8   :  { %214 = vbcast.lane.b32.xlu0 %v5377_v8, 297  ;;  %290 = vbcast.lane.b32.xlu1 %v5377_v8, 298 }
  0xaa   :  { %v247_v17 = vpop.permute.xlu1 %246  ;;  %v92_v18 = vpop.permute.xlu0 %91 }
  0xab   :  { %v144_v38 = vmul.f32 %v6982_v29, %v92_v18  ;;  %v296_v50 = vmul.f32 %v6987_v31, %v247_v17 }
  0xac   :  { %366 = vbcast.lane.b32.xlu0 %v5377_v8, 299  ;;  %442 = vbcast.lane.b32.xlu1 %v5377_v8, 300 }
  0xae   :  { %v6964_v21 = vpop.permute.xlu1 %95  ;;  %v171_v22 = vpop.permute.xlu0 %170 }
  0xaf   :  { %v220_v32 = vmul.f32 %v6975_v26, %v171_v22  ;;  %v5697_v22 = vpack.c.bf16 %v1550_v11, %v1549_v10  ;;  %v145_v37 = vmul.f32 %v6982_v29, %v6964_v21 }
  0xb1   :  { %v232_v51 = vadd.f32 %v220_v32, %v144_v38  ;;  %5698 = vmatpush3.bf16.msra.mxu0 %v5697_v22 }
  0xb2   :  { %v6977_v27 = vpop.permute.xlu1 %99  ;;  %v6979_v28 = vpop.permute.xlu0 %174 }
  0xb3   :  { %v308_v1 = vadd.f32 %v296_v50, %v232_v51  ;;  %v146_v38 = vmul.f32 %v6982_v29, %v6977_v27  ;;  %v221_v40 = vmul.f32 %v6975_v26, %v6979_v28 }
  0xb5   :  { %v233_v27 = vadd.f32 %v221_v40, %v145_v37 }
  0xb6   :  { %v323_v33 = vpop.permute.xlu1 %322  ;;  %v6990_v34 = vpop.permute.xlu0 %178 }
  0xb7   :  { %v372_v58 = vmul.f32 %v6995_v39, %v323_v33  ;;  %v5699_v33 = vpack.c.bf16 %v1568_v14, %v1567_v13  ;;  %v222_v41 = vmul.f32 %v6975_v26, %v6990_v34 }
  0xb9   :  { %v384_v7 = vadd.f32 %v372_v58, %v308_v1  ;;  %5700 = vmatprep.subr.bf16.mxu0 %v5699_v33  ;;  %v234_v49 = vadd.f32 %v222_v41, %v146_v38 }
  0xba   :  { %v255_v53 = vpop.permute.xlu1 %254  ;;  %v251_v54 = vpop.permute.xlu0 %250  ;;  %5702 = vmatpush3.bf16.msra.mxu0 %v5701_v47 }
  0xbb   :  { %v298_v43 = vmul.f32 %v6987_v31, %v255_v53  ;;  %v297_v44 = vmul.f32 %v6987_v31, %v251_v54 }
  0xbd   :  { %v310_v53 = vadd.f32 %v298_v43, %v234_v49  ;;  %v309_v54 = vadd.f32 %v297_v44, %v233_v27 }
  0xbe   :  { %v7002_v2 = vpop.permute.xlu1 %103  ;;  %v399_v3 = vpop.permute.xlu0 %398 }
  0xbf   :  { %v448_v8 = vmul.f32 %v7000_v59, %v399_v3 }
  0xc1   :  { %v460_v16 = vadd.f32 %v448_v8, %v384_v7  ;;  %v147_v7 = vmul.f32 %v6982_v29, %v7002_v2 }
  0xc2   :  { %v327_v17 = vpop.permute.xlu1 %326  ;;  %v183_v18 = vpop.permute.xlu0 %182 }
  0xc3   :  { %v479_v32 = vadd.f32 %v7008_v12, %v460_v16  ;;  %v373_v28 = vmul.f32 %v6995_v39, %v327_v17  ;;  %v223_v8 = vmul.f32 %v6975_v26, %v183_v18 }
  0xc5   :  { %v491_v42 = vmax.f32 %v479_v32, 0.0  ;;  %v385_v62 = vadd.f32 %v373_v28, %v309_v54 }
  0xc6   :  { %v259_v45 = vpop.permute.xlu1 %258  ;;  %v331_v46 = vpop.permute.xlu0 %330 }
  0xc7   :  { %v515_v48 = vcombine.high %v491_v42, %v491_v42  ;;  %v522_v21 = vrot.slane %v491_v42, %v7011_v24  ;;  %v374_v50 = vmul.f32 %v6995_v39, %v331_v46  ;;  %v299_v18 = vmul.f32 %v6987_v31, %v259_v45 }
  0xc8   :  { %v235_v42 = vadd.f32 %v223_v8, %v147_v7 }
  0xc9   :  { %v529_v34 = vrot.slane %v515_v48, %v7011_v24  ;;  %v530_v51 = vcombine.high %v522_v21, %v522_v21  ;;  %v5379_v52 = vrot.slane %v522_v21, 9  ;;  %v386_v63 = vadd.f32 %v374_v50, %v310_v53 }
  0xca   :  { %v407_v55 = vpop.permute.xlu1 %406  ;;  %v403_v56 = vpop.permute.xlu0 %402  ;;  %v311_v27 = vadd.f32 %v299_v18, %v235_v42 }
  0xcb   :  { %v531_v57 = vcombine.high %v529_v34, %v529_v34  ;;  %v5380_v58 = vrot.slane %v530_v51, 9  ;;  %v5381_v60 = vrot.slane %v529_v34, 9  ;;  %v877_v61 = vmax.f32 %v522_v21, %v5379_v52 }
  0xcc   :  { %v450_v0 = vmul.f32 %v7000_v59, %v407_v55  ;;  %v449_v1 = vmul.f32 %v7000_v59, %v403_v56 }
  0xcd   :  { %v5382_v3 = vrot.slane %v531_v57, 9  ;;  %v878_v5 = vmax.f32 %v530_v51, %v5380_v58  ;;  %v879_v6 = vmax.f32 %v529_v34, %v5381_v60  ;;  %v960_v16 = vrot.slane %v877_v61, %v6967_v23 }
  0xce   :  { %v462_v9 = vadd.f32 %v450_v0, %v386_v63  ;;  %v461_v10 = vadd.f32 %v449_v1, %v385_v62  ;;  %v187_v11 = vpop.permute.xlu1 %186  ;;  %v108_v13 = vpop.permute.xlu0 %107 }
  0xcf   :  { %v880_v14 = vmax.f32 %v531_v57, %v5382_v3  ;;  %v964_v17 = vrot.slane %v878_v5, %v6967_v23  ;;  %v968_v22 = vrot.slane %v879_v6, %v6967_v23  ;;  %v224_v43 = vmul.f32 %v6975_v26, %v187_v11 }
  0xd0   :  { %v481_v32 = vadd.f32 %v7008_v12, %v462_v9  ;;  %v480_v33 = vadd.f32 %v7008_v12, %v461_v10  ;;  %v148_v44 = vmul.f32 %v6982_v29, %v108_v13 }
  0xd1   :  { %v7039_v2 = vrot.slane %v880_v14, %v6967_v23  ;;  %v1102_v35 = vsel %vm1101_vm1, %v964_v17, %v960_v16  ;;  %v1154_v57 = vsel %vm1101_vm1, %v968_v22, %v964_v17 }
  0xd2   :  { %v493_v36 = vmax.f32 %v481_v32, 0.0  ;;  %v492_v37 = vmax.f32 %v480_v33, 0.0  ;;  %v263_v38 = vpop.permute.xlu1 %262  ;;  %v335_v40 = vpop.permute.xlu0 %334  ;;  %v1104_v41 = vsel %vm1103_vm2, %v968_v22, %v1102_v35  ;;  %v236_v56 = vadd.f32 %v224_v43, %v148_v44 }
  0xd3   :  { %v7048_v46 = vsel %vm1105_vm3, %v7039_v2, %v1104_v41  ;;  %v7054_v49 = vsel %vm1101_vm1, %v7039_v2, %v968_v22  ;;  %v375_v51 = vmul.f32 %v6995_v39, %v335_v40  ;;  %v300_v61 = vmul.f32 %v6987_v31, %v263_v38 }
  0xd4   :  { %v549_v47 = vcombine.high %v493_v36, %v493_v36  ;;  %v556_v45 = vrot.slane %v493_v36, %v7011_v24  ;;  %v532_v48 = vcombine.high %v492_v37, %v492_v37  ;;  %v539_v21 = vrot.slane %v492_v37, %v7011_v24 }
  0xd5   :  { %v387_v7 = vadd.f32 %v375_v51, %v311_v27  ;;  %v312_v22 = vadd.f32 %v300_v61, %v236_v56  ;;  %v1155_v33 = vsel %vm1103_vm2, %v7039_v2, %v1154_v57 }
  0xd6   :  { %v563_v28 = vrot.slane %v549_v47, %v7011_v24  ;;  %v564_v50 = vcombine.high %v556_v45, %v556_v45  ;;  %v546_v34 = vrot.slane %v532_v48, %v7011_v24  ;;  %v339_v52 = vpop.permute.xlu1 %338  ;;  %v411_v53 = vpop.permute.xlu0 %410  ;;  %v547_v54 = vcombine.high %v539_v21, %v539_v21 }
  0xd7   :  { %v5383_v55 = vrot.slane %v539_v21, 9  ;;  %v5387_v60 = vrot.slane %v556_v45, 9  ;;  %v451_v62 = vmul.f32 %v7000_v59, %v411_v53  ;;  %v376_v8 = vmul.f32 %v6995_v39, %v339_v52 }
  0xd8   :  { %v565_v58 = vcombine.high %v563_v28, %v563_v28  ;;  %v548_v63 = vcombine.high %v546_v34, %v546_v34  ;;  %v5384_v0 = vrot.slane %v547_v54, 9  ;;  %v5385_v1 = vrot.slane %v546_v34, 9 }
  0xd9   :  { %v881_v3 = vmax.f32 %v539_v21, %v5383_v55  ;;  %v5388_v5 = vrot.slane %v564_v50, 9  ;;  %v5389_v6 = vrot.slane %v563_v28, 9  ;;  %v885_v17 = vmax.f32 %v556_v45, %v5387_v60 }
  0xda   :  { %v119_v9 = vpop.permute.xlu1 %118  ;;  %v415_v10 = vpop.permute.xlu0 %414  ;;  %v5386_v11 = vrot.slane %v548_v63, 9  ;;  %v882_v13 = vmax.f32 %v547_v54, %v5384_v0  ;;  %v883_v14 = vmax.f32 %v546_v34, %v5385_v1  ;;  %v463_v32 = vadd.f32 %v451_v62, %v387_v7 }
  0xdb   :  { %v7064_v16 = vrot.slane %v881_v3, %v6967_v23  ;;  %v5390_v18 = vrot.slane %v565_v58, 9  ;;  %v388_v38 = vadd.f32 %v376_v8, %v312_v22  ;;  %v452_v41 = vmul.f32 %v7000_v59, %v415_v10 }
  0xdc   :  { %v884_v35 = vmax.f32 %v548_v63, %v5386_v11  ;;  %v7069_v36 = vrot.slane %v882_v13, %v6967_v23  ;;  %v7072_v37 = vrot.slane %v883_v14, %v6967_v23  ;;  %v482_v40 = vadd.f32 %v7008_v12, %v463_v32 }
  0xdd   :  { %v1156_v44 = vsel %vm1105_vm3, %v7064_v16, %v1155_v33  ;;  %v886_v47 = vmax.f32 %v564_v50, %v5388_v5  ;;  %v887_v45 = vmax.f32 %v563_v28, %v5389_v6  ;;  %v7084_v27 = vrot.slane %v885_v17, %v6967_v23 }
  0xde   :  { %v271_v42 = vpop.permute.xlu1 %270  ;;  %v195_v43 = vpop.permute.xlu0 %194  ;;  %v7079_v48 = vrot.slane %v884_v35, %v6967_v23  ;;  %v1157_v21 = vsel %vm1107_vm5, %v7069_v36, %v1156_v44  ;;  %v494_v34 = vmax.f32 %v482_v40, 0.0  ;;  %v464_v51 = vadd.f32 %v452_v41, %v388_v38 }
  0xdf   :  { %8530 = vst [vmem:[#allocation14_spill] sm:$0xff] %v7084_v27  ;;  %v1158_v52 = vsel %vm1109_vm4, %v7072_v37, %v1157_v21  ;;  %v150_v53 = vmul.f32 %v6982_v29, %v119_v9  ;;  %v226_v54 = vmul.f32 %v6975_v26, %v195_v43  ;;  %v1258_v50 = vsel %vm1101_vm1, %v7064_v16, %v7039_v2 }
  0xe0   :  { %8529 = vst [vmem:[#allocation13_spill] sm:$0xff] %v7079_v48  ;;  %v1159_v28 = vsel %vm1111_vm6, %v7079_v48, %v1158_v52  ;;  %v566_v55 = vcombine.high %v494_v34, %v494_v34  ;;  %v573_v56 = vrot.slane %v494_v34, %v7011_v24  ;;  %v483_v57 = vadd.f32 %v7008_v12, %v464_v51 }
  0xe1   :  { %v1160_v60 = vsel %vm1113_vm7, %v7084_v27, %v1159_v28  ;;  %v888_v63 = vmax.f32 %v565_v58, %v5390_v18  ;;  %v7100_v0 = vrot.slane %v886_v47, %v6967_v23  ;;  %v302_v1 = vmul.f32 %v6987_v31, %v271_v42 }
  0xe2   :  { %v199_v61 = vpop.permute.xlu1 %198  ;;  %v123_v62 = vpop.permute.xlu0 %122  ;;  %1184 = vrot.lane.b32.xlu0 %v1160_v60, %s6807_s2  ;;  %v1259_v2 = vsel %vm1103_vm2, %v7069_v36, %v1258_v50  ;;  %v580_v3 = vrot.slane %v566_v55, %v7011_v24  ;;  %v581_v5 = vcombine.high %v573_v56, %v573_v56  ;;  %v5391_v6 = vrot.slane %v573_v56, 9 }
  0xe3   :  { %8531 = vst [vmem:[#allocation15_spill] sm:$0xff] %v7100_v0  ;;  %v495_v7 = vmax.f32 %v483_v57, 0.0  ;;  %v238_v8 = vadd.f32 %v226_v54, %v150_v53  ;;  %v7108_v9 = vrot.slane %v887_v45, %v6967_v23  ;;  %v1260_v58 = vsel %vm1105_vm3, %v7072_v37, %v1259_v2 }
  0xe4   :  { %v1316_v10 = vsel %vm1101_vm1, %v7069_v36, %v7064_v16  ;;  %v582_v11 = vcombine.high %v580_v3, %v580_v3  ;;  %v5392_v13 = vrot.slane %v581_v5, 9  ;;  %v5393_v14 = vrot.slane %v580_v3, 9 }
  0xe5   :  { %v227_v17 = vmul.f32 %v6975_v26, %v199_v61  ;;  %v583_v33 = vcombine.high %v495_v7, %v495_v7  ;;  %v590_v18 = vrot.slane %v495_v7, %v7011_v24  ;;  %v151_v35 = vmul.f32 %v6982_v29, %v123_v62 }
  0xe6   :  { %v203_v22 = vpop.permute.xlu1 %202  ;;  %v127_v32 = vpop.permute.xlu0 %126  ;;  %v1261_v38 = vsel %vm1107_vm5, %v7079_v48, %v1260_v58  ;;  %v7121_v40 = vrot.slane %v888_v63, %v6967_v23  ;;  %v5394_v41 = vrot.slane %v582_v11, 9  ;;  %v889_v42 = vmax.f32 %v573_v56, %v5391_v6 }
  0xe7   :  { %v890_v43 = vmax.f32 %v581_v5, %v5392_v13  ;;  %v597_v44 = vrot.slane %v583_v33, %v7011_v24  ;;  %v598_v47 = vcombine.high %v590_v18, %v590_v18  ;;  %v5395_v45 = vrot.slane %v590_v18, 9 }
  0xe8   :  { %v1262_v21 = vsel %vm1109_vm4, %v7084_v27, %v1261_v38  ;;  %v891_v34 = vmax.f32 %v580_v3, %v5393_v14  ;;  %v314_v53 = vadd.f32 %v302_v1, %v238_v8  ;;  %v1317_v28 = vsel %vm1103_vm2, %v7072_v37, %v1316_v10 }
  0xe9   :  { %v1263_v51 = vsel %vm1111_vm6, %v7100_v0, %v1262_v21  ;;  %v5396_v50 = vrot.slane %v598_v47, 9  ;;  %v893_v55 = vmax.f32 %v590_v18, %v5395_v45  ;;  %v239_v56 = vadd.f32 %v227_v17, %v151_v35 }
  0xea   :  { %v275_v52 = vpop.permute.xlu1 %274  ;;  %v347_v54 = vpop.permute.xlu0 %346  ;;  %v1161_v57 = vsel %vm1101_vm1, %v7108_v9, %v7100_v0  ;;  %v892_v60 = vmax.f32 %v582_v11, %v5394_v41  ;;  %v1264_v61 = vsel %vm1113_vm7, %v7108_v9, %v1263_v51  ;;  %v228_v62 = vmul.f32 %v6975_v26, %v203_v22 }
  0xeb   :  { %v378_v63 = vmul.f32 %v6995_v39, %v347_v54  ;;  %v7138_v1 = vrot.slane %v889_v42, %v6967_v23  ;;  %v7141_v2 = vrot.slane %v890_v43, %v6967_v23  ;;  %v5397_v3 = vrot.slane %v597_v44, 9  ;;  %1288 = vrot.lane.b32.xlu1 %v1264_v61, %s6807_s2 }
  0xec   :  { %v1318_v5 = vsel %vm1105_vm3, %v7079_v48, %v1317_v28  ;;  %v7147_v6 = vrot.slane %v891_v34, %v6967_v23  ;;  %v599_v7 = vcombine.high %v597_v44, %v597_v44  ;;  %v152_v8 = vmul.f32 %v6982_v29, %v127_v32 }
  0xed   :  { %v1319_v58 = vsel %vm1107_vm5, %v7084_v27, %v1318_v5  ;;  %v894_v13 = vmax.f32 %v598_v47, %v5396_v50  ;;  %v7153_v14 = vrot.slane %v893_v55, %v6967_v23  ;;  %v390_v17 = vadd.f32 %v378_v63, %v314_v53 }
  0xee   :  { %v423_v10 = vpop.permute.xlu1 %422  ;;  %v279_v11 = vpop.permute.xlu0 %278  ;;  %v1320_v22 = vsel %vm1109_vm4, %v7100_v0, %v1319_v58  ;;  %v7160_v18 = vrot.slane %v892_v60, %v6967_v23  ;;  %v1162_v32 = vsel %vm1103_vm2, %v7121_v40, %v1161_v57  ;;  %v895_v42 = vmax.f32 %v597_v44, %v5397_v3 }
  0xef   :  { %v1321_v33 = vsel %vm1111_vm6, %v7108_v9, %v1320_v22  ;;  %v454_v35 = vmul.f32 %v7000_v59, %v423_v10  ;;  %v1163_v41 = vsel %vm1105_vm3, %v7138_v1, %v1162_v32  ;;  %v1265_v43 = vsel %vm1101_vm1, %v7138_v1, %v7121_v40 }
  0xf0   :  { %v1322_v38 = vsel %vm1113_vm7, %v7121_v40, %v1321_v33  ;;  %v1164_v21 = vsel %vm1107_vm5, %v7141_v2, %v1163_v41  ;;  %v5398_v54 = vrot.slane %v599_v7, 9  ;;  %v303_v28 = vmul.f32 %v6987_v31, %v275_v52 }
  0xf1   :  { %v1373_v47 = vcombine.high %v1322_v38, %v1322_v38  ;;  %v1394_v45 = vrot.slane %v1322_v38, %v7011_v24  ;;  %v466_v34 = vadd.f32 %v454_v35, %v390_v17  ;;  %v1165_v50 = vsel %vm1109_vm4, %v7147_v6, %v1164_v21 }
  0xf2   :  { %v207_v51 = vpop.permute.xlu1 %206  ;;  %v131_v53 = vpop.permute.xlu0 %130  ;;  %v1266_v44 = vsel %vm1103_vm2, %v7141_v2, %v1265_v43  ;;  %v7181_v55 = vrot.slane %v894_v13, %v6967_v23  ;;  %v1166_v60 = vsel %vm1111_vm6, %v7160_v18, %v1165_v50  ;;  %v240_v63 = vadd.f32 %v228_v62, %v152_v8 }
  0xf3   :  { %v1401_v57 = vrot.slane %v1373_v47, %v7011_v24  ;;  %v485_v61 = vadd.f32 %v7008_v12, %v466_v34  ;;  %v1167_v52 = vsel %vm1113_vm7, %v7153_v14, %v1166_v60  ;;  %v7190_v3 = vrot.slane %v895_v42, %v6967_v23 }
  0xf4   :  { %v1267_v5 = vsel %vm1105_vm3, %v7147_v6, %v1266_v44  ;;  %v1600_v58 = vrot.slane %v1394_v45, %v7011_v24  ;;  %1186 = vrot.lane.b32.xlu0 %v1167_v52, %s6807_s2  ;;  %v315_v22 = vadd.f32 %v303_v28, %v239_v56  ;;  %v304_v33 = vmul.f32 %v6987_v31, %v279_v11 }
  0xf5   :  { %v1614_v10 = vrot.slane %v1401_v57, %v7011_v24  ;;  %v497_v13 = vmax.f32 %v485_v61, 0.0  ;;  %v1268_v17 = vsel %vm1107_vm5, %v7160_v18, %v1267_v5  ;;  %v896_v47 = vmax.f32 %v599_v7, %v5398_v54 }
  0xf6   :  { %v355_v62 = vpop.permute.xlu1 %354  ;;  %v351_v8 = vpop.permute.xlu0 %350  ;;  %v1269_v32 = vsel %vm1109_vm4, %v7153_v14, %v1268_v17  ;;  %v1323_v11 = vsel %vm1101_vm1, %v7141_v2, %v7138_v1  ;;  %v316_v50 = vadd.f32 %v304_v33, %v240_v63 }
  0xf7   :  { %v379_v35 = vmul.f32 %v6995_v39, %v351_v8  ;;  %v1617_v38 = vcombine.low %v1600_v58, %v1614_v10  ;;  %v608_v41 = vcombine.high %v497_v13, %v497_v13  ;;  %v7204_v42 = vrot.slane %v497_v13, %v7011_v24 }
  0xf8   :  { %v1270_v43 = vsel %vm1111_vm6, %v7181_v55, %v1269_v32  ;;  %v380_v56 = vmul.f32 %v6995_v39, %v355_v62  ;;  %v1324_v7 = vsel %vm1103_vm2, %v7147_v6, %v1323_v11  ;;  %v229_v58 = vmul.f32 %v6975_v26, %v207_v51 }
  0xf9   :  { %v1271_v45 = vsel %vm1113_vm7, %v7190_v3, %v1270_v43  ;;  %5617 = vmatmul.mubr.msk.f32.vlgmr.msra.gmra.mrb[0].mxu1 %vm1346_vm8, %v1617_v38  ;;  %v622_v21 = vrot.slane %v608_v41, %v7011_v24  ;;  %v623_v34 = vcombine.high %v7204_v42, %v7204_v42  ;;  %v391_v44 = vadd.f32 %v379_v35, %v315_v22 }
  0xfa   :  { %1290 = vrot.lane.b32.xlu1 %v1271_v45, %s6807_s2  ;;  %v427_v54 = vpop.permute.xlu1 %426  ;;  %v283_v28 = vpop.permute.xlu0 %282  ;;  %5619 = vmatprep.mubr.msk.f32.mxu1 %vm6804_vm0, %v8512_v15  ;;  %v1325_v57 = vsel %vm1105_vm3, %v7160_v18, %v1324_v7  ;;  %v153_v10 = vmul.f32 %v6982_v29, %v131_v53  ;;  %v7229_v13 = vrot.slane %v896_v47, %v6967_v23 }
  0xfb   :  { %v455_v60 = vmul.f32 %v7000_v59, %v427_v54  ;;  %v624_v61 = vcombine.high %v622_v21, %v622_v21  ;;  %v5402_v52 = vrot.slane %v623_v34, 9  ;;  %v5403_v5 = vrot.slane %v622_v21, 9 }
  0xfc   :  { %v1326_v63 = vsel %vm1107_vm5, %v7153_v14, %v1325_v57  ;;  %v392_v33 = vadd.f32 %v380_v56, %v316_v50  ;;  %v305_v53 = vmul.f32 %v6987_v31, %v283_v28  ;;  %v241_v11 = vadd.f32 %v229_v58, %v153_v10 }
  0xfd   :  { %v467_v17 = vadd.f32 %v455_v60, %v391_v44  ;;  %v5404_v62 = vrot.slane %v624_v61, 9  ;;  %v900_v8 = vmax.f32 %v623_v34, %v5402_v52  ;;  %v901_v22 = vmax.f32 %v622_v21, %v5403_v5 }
  0xfe   :  { %v135_v32 = vpop.permute.xlu1 %134  ;;  %v431_v35 = vpop.permute.xlu0 %430  ;;  %v1327_v38 = vsel %vm1109_vm4, %v7181_v55, %v1326_v63 }
  0xff   :  { %v486_v51 = vadd.f32 %v7008_v12, %v467_v17  ;;  %v456_v41 = vmul.f32 %v7000_v59, %v431_v35  ;;  %v902_v43 = vmax.f32 %v624_v61, %v5404_v62  ;;  %v7239_v47 = vrot.slane %v900_v8, %v6967_v23 }
 0x100   :  { %v7242_v45 = vrot.slane %v901_v22, %v6967_v23  ;;  %v1328_v56 = vsel %vm1111_vm6, %v7190_v3, %v1327_v38  ;;  %v317_v61 = vadd.f32 %v305_v53, %v241_v11  ;;  %v154_v38 = vmul.f32 %v6982_v29, %v135_v32 }
 0x101   :  { %v1329_v21 = vsel %vm1113_vm7, %v7229_v13, %v1328_v56  ;;  %v498_v34 = vmax.f32 %v486_v51, 0.0  ;;  %v468_v7 = vadd.f32 %v456_v41, %v392_v33  ;;  %v7252_v5 = vrot.slane %v902_v43, %v6967_v23 }
 0x102   :  { %v1408_v54 = vcombine.high %v1329_v21, %v1329_v21  ;;  %v1429_v28 = vrot.slane %v1329_v21, %v7011_v24  ;;  %v359_v50 = vpop.permute.xlu1 %358  ;;  %v211_v44 = vpop.permute.xlu0 %210  ;;  %v1169_v63 = vsel %vm1101_vm1, %v7242_v45, %v7239_v47 }
 0x103   :  { %v625_v57 = vcombine.high %v498_v34, %v498_v34  ;;  %v632_v60 = vrot.slane %v498_v34, %v7011_v24  ;;  %v487_v52 = vadd.f32 %v7008_v12, %v468_v7  ;;  %v381_v10 = vmul.f32 %v6995_v39, %v359_v50 }
 0x104   :  { %v1436_v58 = vrot.slane %v1408_v54, %v7011_v24  ;;  %v1635_v33 = vrot.slane %v1429_v28, %v7011_v24  ;;  %v230_v51 = vmul.f32 %v6975_v26, %v211_v44  ;;  %v1170_v50 = vsel %vm1103_vm2, %v7252_v5, %v1169_v63 }
 0x105   :  { %v639_v17 = vrot.slane %v625_v57, %v7011_v24  ;;  %v640_v62 = vcombine.high %v632_v60, %v632_v60  ;;  %v5405_v8 = vrot.slane %v632_v60, 9  ;;  %v499_v22 = vmax.f32 %v487_v52, 0.0 }
 0x106   :  { %v1649_v35 = vrot.slane %v1436_v58, %v7011_v24  ;;  %v191_v53 = vpop.permute.xlu1 %190  ;;  %v112_v41 = vpop.permute.xlu0 %111  ;;  %v393_v52 = vadd.f32 %v381_v10, %v317_v61 }
 0x107   :  { %v641_v43 = vcombine.high %v639_v17, %v639_v17  ;;  %v5406_v56 = vrot.slane %v640_v62, 9  ;;  %v5407_v11 = vrot.slane %v639_v17, 9  ;;  %v903_v21 = vmax.f32 %v632_v60, %v5405_v8 }
 0x108   :  { %v1652_v34 = vcombine.low %v1635_v33, %v1649_v35  ;;  %v642_v7 = vcombine.high %v499_v22, %v499_v22  ;;  %v649_v54 = vrot.slane %v499_v22, %v7011_v24  ;;  %v225_v32 = vmul.f32 %v6975_v26, %v191_v53 }
 0x109   :  { %v5408_v28 = vrot.slane %v641_v43, 9  ;;  %v904_v57 = vmax.f32 %v640_v62, %v5406_v56  ;;  %v905_v44 = vmax.f32 %v639_v17, %v5407_v11  ;;  %v7271_v22 = vrot.slane %v903_v21, %v6967_v23 }
 0x10a   :  { %5620 = vmatmul.mubr.msk.f32.gmra.mrb[2].mxu1 %vm1346_vm8, %v1652_v34  ;;  %v656_v58 = vrot.slane %v642_v7, %v7011_v24  ;;  %v657_v4 = vcombine.high %v649_v54, %v649_v54  ;;  %v5409_v30 = vrot.slane %v649_v54, 9  ;;  %v435_v60 = vpop.permute.xlu1 %434  ;;  %v287_v8 = vpop.permute.xlu0 %286  ;;  %v149_v63 = vmul.f32 %v6982_v29, %v112_v41 }
 0x10b   :  { %v906_v33 = vmax.f32 %v641_v43, %v5408_v28  ;;  %v457_v62 = vmul.f32 %v7000_v59, %v435_v60  ;;  %5622 = vmatprep.mubr.msk.f32.mxu1 %vm6804_vm0, %v8512_v15  ;;  %v7278_v53 = vrot.slane %v904_v57, %v6967_v23  ;;  %v242_v56 = vadd.f32 %v230_v51, %v154_v38  ;;  %v1553_v15 = vld [vmem:[#allocation2 + $0x50] sm:$0xff] }
 0x10c   :  { %v658_v61 = vcombine.high %v656_v58, %v656_v58  ;;  %v5410_v10 = vrot.slane %v657_v4, 9  ;;  %v5411_v17 = vrot.slane %v656_v58, 9  ;;  %v907_v35 = vmax.f32 %v649_v54, %v5409_v30 }
 0x10d   :  { %v469_v11 = vadd.f32 %v457_v62, %v393_v52  ;;  %v306_v43 = vmul.f32 %v6987_v31, %v287_v8  ;;  %v7282_v21 = vrot.slane %v905_v44, %v6967_v23  ;;  %v237_v20 = vadd.f32 %v225_v32, %v149_v63 }
 0x10e   :  { %v5412_v41 = vrot.slane %v658_v61, 9  ;;  %v908_v34 = vmax.f32 %v657_v4, %v5410_v10  ;;  %v909_v7 = vmax.f32 %v656_v58, %v5411_v17  ;;  %v363_v28 = vpop.permute.xlu1 %362  ;;  %v267_v60 = vpop.permute.xlu0 %266  ;;  %v7287_v54 = vrot.slane %v906_v33, %v6967_v23 }
 0x10f   :  { %v488_v25 = vadd.f32 %v7008_v12, %v469_v11  ;;  %v382_v30 = vmul.f32 %v6995_v39, %v363_v28  ;;  %v7290_v38 = vrot.slane %v907_v35, %v6967_v23  ;;  %v318_v51 = vadd.f32 %v306_v43, %v242_v56  ;;  %v1569_v56 = vld [vmem:[#allocation2 + $0xd0] sm:$0xff]  ;;  %v1570_v11 = vld [vmem:[#allocation2 + $0xd8] sm:$0xff] }
 0x110   :  { %v301_v57 = vmul.f32 %v6987_v31, %v267_v60  ;;  %v1171_v4 = vsel %vm1105_vm3, %v7271_v22, %v1170_v50  ;;  %v910_v52 = vmax.f32 %v658_v61, %v5412_v41  ;;  %v7296_v44 = vrot.slane %v908_v34, %v6967_v23 }
 0x111   :  { %v500_v32 = vmax.f32 %v488_v25, 0.0  ;;  %v1172_v58 = vsel %vm1107_vm5, %v7278_v53, %v1171_v4  ;;  %v7301_v8 = vrot.slane %v909_v7, %v6967_v23  ;;  %v394_v33 = vadd.f32 %v382_v30, %v318_v51 }
 0x112   :  { %v1173_v63 = vsel %vm1109_vm4, %v7282_v21, %v1172_v58  ;;  %v439_v62 = vpop.permute.xlu1 %438  ;;  %v343_v10 = vpop.permute.xlu0 %342  ;;  %v1273_v50 = vsel %vm1101_vm1, %v7271_v22, %v7252_v5  ;;  %v313_v43 = vadd.f32 %v301_v57, %v237_v20  ;;  %v1168_v7 = vsel %vm1101_vm1, %v7190_v3, %v7181_v55 }
 0x113   :  { %v659_v61 = vcombine.high %v500_v32, %v500_v32  ;;  %v666_v17 = vrot.slane %v500_v32, %v7011_v24  ;;  %v1174_v25 = vsel %vm1111_vm6, %v7287_v54, %v1173_v63  ;;  %v458_v35 = vmul.f32 %v7000_v59, %v439_v62 }
 0x114   :  { %v1175_v41 = vsel %vm1113_vm7, %v7290_v38, %v1174_v25  ;;  %v377_v34 = vmul.f32 %v6995_v39, %v343_v10  ;;  %v7321_v4 = vrot.slane %v910_v52, %v6967_v23  ;;  %v1176_v32 = vsel %vm1101_vm1, %v7301_v8, %v7296_v44 }
 0x115   :  { %v673_v28 = vrot.slane %v659_v61, %v7011_v24  ;;  %v674_v60 = vcombine.high %v666_v17, %v666_v17  ;;  %v5413_v30 = vrot.slane %v666_v17, 9  ;;  %1190 = vrot.lane.b32.xlu0 %v1175_v41, %s6807_s2  ;;  %v470_v51 = vadd.f32 %v458_v35, %v394_v33  ;;  %v1554_v41 = vld [vmem:[#allocation2 + $0x58] sm:$0xff] }
 0x116   :  { %v419_v20 = vpop.permute.xlu0 %418  ;;  %v139_v57 = vpop.permute.xlu1 %138  ;;  %v1274_v58 = vsel %vm1103_vm2, %v7278_v53, %v1273_v50  ;;  %v5703_v63 = vpack.c.bf16 %v1570_v11, %v1569_v56  ;;  %v389_v52 = vadd.f32 %v377_v34, %v313_v43  ;;  %v1177_v43 = vsel %vm1103_vm2, %v7321_v4, %v1176_v32 }
 0x117   :  { %v675_v62 = vcombine.high %v673_v28, %v673_v28  ;;  %v5414_v10 = vrot.slane %v674_v60, 9  ;;  %v5415_v61 = vrot.slane %v673_v28, 9  ;;  %v911_v25 = vmax.f32 %v666_v17, %v5413_v30 }
 0x118   :  { %v489_v33 = vadd.f32 %v7008_v12, %v470_v51  ;;  %v453_v35 = vmul.f32 %v7000_v59, %v419_v20  ;;  %v155_v19 = vmul.f32 %v6982_v29, %v139_v57  ;;  %5704 = vmatprep.subr.bf16.mxu0 %v5703_v63  ;;  %v5705_v34 = vpack.c.bf16 %v1554_v41, %v1553_v15 }
 0x119   :  { %v5416_v0 = vrot.slane %v675_v62, 9  ;;  %v912_v27 = vmax.f32 %v674_v60, %v5414_v10  ;;  %v913_v48 = vmax.f32 %v673_v28, %v5415_v61  ;;  %v7332_v50 = vrot.slane %v911_v25, %v6967_v23  ;;  %1188 = vrot.lane.b32.xlu0 %v1168_v7, %s6807_s2 }
 0x11a   :  { %v501_v56 = vmax.f32 %v489_v33, 0.0  ;;  %v465_v17 = vadd.f32 %v453_v35, %v389_v52  ;;  %v215_v11 = vpop.permute.xlu0 %214  ;;  %v291_v30 = vpop.permute.xlu1 %290  ;;  %v1275_v28 = vsel %vm1105_vm3, %v7282_v21, %v1274_v58  ;;  %5706 = vmatpush3.bf16.msra.mxu0 %v5705_v34 }
 0x11b   :  { %v914_v51 = vmax.f32 %v675_v62, %v5416_v0  ;;  %v7338_v29 = vrot.slane %v912_v27, %v6967_v23  ;;  %v231_v60 = vmul.f32 %v6975_v26, %v215_v11  ;;  %v307_v63 = vmul.f32 %v6987_v31, %v291_v30 }
 0x11c   :  { %v676_v20 = vcombine.high %v501_v56, %v501_v56  ;;  %v683_v7 = vrot.slane %v501_v56, %v7011_v24  ;;  %v484_v57 = vadd.f32 %v7008_v12, %v465_v17  ;;  %v7347_v32 = vrot.slane %v913_v48, %v6967_v23 }
 0x11d   :  { %v243_v15 = vadd.f32 %v231_v60, %v155_v19  ;;  %v7350_v27 = vrot.slane %v914_v51, %v6967_v23  ;;  %v1178_v26 = vsel %vm1105_vm3, %v7332_v50, %v1177_v43  ;;  %v1276_v30 = vsel %vm1107_vm5, %v7287_v54, %v1275_v28 }
 0x11e   :  { %v690_v0 = vrot.slane %v676_v20, %v7011_v24  ;;  %v691_v58 = vcombine.high %v683_v7, %v683_v7  ;;  %v5417_v62 = vrot.slane %v683_v7, 9  ;;  %v496_v10 = vmax.f32 %v484_v57, 0.0  ;;  %v367_v61 = vpop.permute.xlu0 %366  ;;  %v443_v25 = vpop.permute.xlu1 %442 }
 0x11f   :  { %v319_v41 = vadd.f32 %v307_v63, %v243_v15  ;;  %v383_v31 = vmul.f32 %v6995_v39, %v367_v61  ;;  %v459_v48 = vmul.f32 %v7000_v59, %v443_v25  ;;  %v1179_v19 = vsel %vm1107_vm5, %v7338_v29, %v1178_v26 }
 0x120   :  { %v5418_v33 = vrot.slane %v691_v58, 9  ;;  %v5419_v52 = vrot.slane %v690_v0, 9  ;;  %v915_v35 = vmax.f32 %v683_v7, %v5417_v62  ;;  %v606_v56 = vrot.slane %v496_v10, %v7011_v24 }
 0x121   :  { %v395_v17 = vadd.f32 %v383_v31, %v319_v41  ;;  %v1180_v11 = vsel %vm1109_vm4, %v7347_v32, %v1179_v19  ;;  %v1280_v39 = vsel %vm1101_vm1, %v7332_v50, %v7321_v4  ;;  %v1277_v26 = vsel %vm1109_vm4, %v7290_v38, %v1276_v30 }
 0x122   :  { %v916_v59 = vmax.f32 %v691_v58, %v5418_v33  ;;  %v7368_v43 = vrot.slane %v915_v35, %v6967_v23  ;;  %v607_v34 = vcombine.high %v606_v56, %v606_v56  ;;  %v1181_v51 = vsel %vm1111_vm6, %v7350_v27, %v1180_v11 }
 0x123   :  { %v471_v60 = vadd.f32 %v459_v48, %v395_v17  ;;  %v917_v20 = vmax.f32 %v690_v0, %v5419_v52  ;;  %v5399_v7 = vrot.slane %v606_v56, 9  ;;  %v1281_v57 = vsel %vm1103_vm2, %v7338_v29, %v1280_v39 }
 0x124   :  { %v5400_v63 = vrot.slane %v607_v34, 9  ;;  %v1182_v28 = vsel %vm1113_vm7, %v7368_v43, %v1181_v51  ;;  %v7377_v15 = vrot.slane %v916_v59, %v6967_v23  ;;  %v1282_v25 = vsel %vm1105_vm3, %v7347_v32, %v1281_v57  ;;  %v1571_v59 = vld [vmem:[#allocation2 + $0xe0] sm:$0xff] }
 0x125   :  { %v490_v58 = vadd.f32 %v7008_v12, %v471_v60  ;;  %1192 = vrot.lane.b32.xlu0 %v1182_v28, %s6807_s2  ;;  %v7384_v62 = vrot.slane %v917_v20, %v6967_v23  ;;  %v897_v10 = vmax.f32 %v606_v56, %v5399_v7  ;;  %v692_v41 = vcombine.high %v690_v0, %v690_v0  ;;  %v1555_v57 = vld [vmem:[#allocation2 + $0x60] sm:$0xff] }
 0x126   :  { %v898_v61 = vmax.f32 %v607_v34, %v5400_v63  ;;  %v1338_v31 = vsel %vm1101_vm1, %v7338_v29, %v7332_v50  ;;  %v5401_v48 = vrot.slane %v7204_v42, 9  ;;  %v1278_v33 = vsel %vm1111_vm6, %v7296_v44, %v1277_v26  ;;  %v1572_v34 = vld [vmem:[#allocation2 + $0xe8] sm:$0xff] }
 0x127   :  { %v502_v19 = vmax.f32 %v490_v58, 0.0  ;;  %v1253_v12 = vrot.slane %v897_v10, %v6967_v23  ;;  %v1183_v52 = vsel %vm1101_vm1, %v7384_v62, %v7377_v15  ;;  %v5420_v56 = vrot.slane %v692_v41, 9  ;;  %v1556_v63 = vld [vmem:[#allocation2 + $0x68] sm:$0xff]  ;;  %v1573_v10 = vld [vmem:[#allocation2 + $0xf0] sm:$0xff] }
 0x128   :  { %v1311_v35 = vrot.slane %v898_v61, %v6967_v23  ;;  %v1339_v0 = vsel %vm1103_vm2, %v7347_v32, %v1338_v31  ;;  %v1283_v30 = vsel %vm1107_vm5, %v7350_v27, %v1282_v25  ;;  %v899_v28 = vmax.f32 %v7204_v42, %v5401_v48  ;;  %v1574_v61 = vld [vmem:[#allocation2 + $0xf8] sm:$0xff] }
 0x129   :  { %v699_v17 = vrot.slane %v502_v19, %v7011_v24  ;;  %1194 = vrot.lane.b32.xlu0 %v1183_v52, %s6807_s2  ;;  %v1272_v11 = vsel %vm1101_vm1, %v1253_v12, %v7229_v13  ;;  %v1340_v39 = vsel %vm1105_vm3, %v7350_v27, %v1339_v0  ;;  %v1284_v60 = vsel %vm1109_vm4, %v7368_v43, %v1283_v30  ;;  %v1557_v52 = vld [vmem:[#allocation2 + $0x70] sm:$0xff] }
 0x12a   :  { %1292 = vrot.lane.b32.xlu1 %v1272_v11, %s6807_s2  ;;  %v7411_v51 = vsel %vm1101_vm1, %v1311_v35, %v1253_v12  ;;  %v918_v20 = vmax.f32 %v692_v41, %v5420_v56  ;;  %v1341_v7 = vsel %vm1107_vm5, %v7368_v43, %v1340_v39  ;;  %v5707_v41 = vpack.c.bf16 %v1572_v34, %v1571_v59  ;;  %v1558_v35 = vld [vmem:[#allocation2 + $0x78] sm:$0xff] }
 0x12b   :  { %v5421_v26 = vrot.slane %v699_v17, 9  ;;  %v1342_v58 = vsel %vm1109_vm4, %v7377_v15, %v1341_v7  ;;  %v1279_v19 = vsel %vm1113_vm7, %v7301_v8, %v1278_v33  ;;  %v1285_v12 = vsel %vm1111_vm6, %v7377_v15, %v1284_v60 }
 0x12c   :  { %v7421_v25 = vrot.slane %v918_v20, %v6967_v23  ;;  %v1343_v31 = vsel %vm1111_vm6, %v7384_v62, %v1342_v58  ;;  %v5709_v48 = vpack.c.bf16 %v1556_v63, %v1555_v57  ;;  %v700_v56 = vcombine.high %v699_v17, %v699_v17  ;;  %5708 = vmatprep.subr.bf16.mxu0 %v5707_v41 }
 0x12d   :  { %v919_v42 = vmax.f32 %v699_v17, %v5421_v26  ;;  %v5711_v11 = vpack.c.bf16 %v1574_v61, %v1573_v10  ;;  %v1032_v30 = vrot.slane %v899_v28, %v6967_v23  ;;  %v5713_v33 = vpack.c.bf16 %v1558_v35, %v1557_v52 }
 0x12e   :  { %1294 = vrot.lane.b32.xlu1 %v1279_v19, %s6807_s2  ;;  %v7432_v0 = vsel %vm1113_vm7, %v7421_v25, %v1343_v31  ;;  %5710 = vmatpush3.bf16.msra.mxu0 %v5709_v48  ;;  %v1219_v39 = vsel %vm1101_vm1, %v7121_v40, %v7108_v9  ;;  %v1286_v17 = vsel %vm1113_vm7, %v7384_v62, %v1285_v12  ;;  %v5422_v20 = vrot.slane %v700_v56, 9 }
 0x12f   :  { %5712 = vmatprep.subr.bf16.mxu0 %v5711_v11  ;;  %v1257_v59 = vrot.slane %v919_v42, %v6967_v23  ;;  %v1220_v34 = vsel %vm1103_vm2, %v7138_v1, %v1219_v39  ;;  %v1123_v60 = vsel %vm1101_vm1, %v7239_v47, %v1032_v30  ;;  %v7453_v63 = vsel %vm1101_vm1, %v7181_v55, %v7153_v14 }
 0x130   :  { %v1221_v7 = vsel %vm1105_vm3, %v7141_v2, %v1220_v34  ;;  %v1124_v57 = vsel %vm1103_vm2, %v7242_v45, %v1123_v60  ;;  %v1130_v26 = vsel %vm1101_vm1, %v7296_v44, %v7290_v38  ;;  %v920_v42 = vmax.f32 %v700_v56, %v5422_v20 }
 0x131   :  { %v1222_v28 = vsel %vm1107_vm5, %v7147_v6, %v1221_v7  ;;  %v1125_v47 = vsel %vm1105_vm3, %v7252_v5, %v1124_v57  ;;  %v1131_v61 = vsel %vm1103_vm2, %v7301_v8, %v1130_v26  ;;  %v1287_v31 = vsel %vm1101_vm1, %v1257_v59, %v7421_v25 }
 0x132   :  { %1296 = vrot.lane.b32.xlu1 %v1286_v17, %s6807_s2  ;;  %5714 = vmatpush3.bf16.msra.mxu0 %v5713_v33  ;;  %v1223_v58 = vsel %vm1109_vm4, %v7160_v18, %v1222_v28  ;;  %v1126_v10 = vsel %vm1107_vm5, %v7271_v22, %v1125_v47  ;;  %v1132_v12 = vsel %vm1105_vm3, %v7321_v4, %v1131_v61 }
 0x133   :  { %v1224_v41 = vsel %vm1111_vm6, %v7153_v14, %v1223_v58  ;;  %v1127_v19 = vsel %vm1109_vm4, %v7278_v53, %v1126_v10  ;;  %v1133_v35 = vsel %vm1107_vm5, %v7332_v50, %v1132_v12  ;;  %v7494_v56 = vsel %vm1101_vm1, %v7229_v13, %v7190_v3  ;;  %v8532_v58 = vld [vmem:[#allocation13_spill] sm:$0xff] }
 0x134   :  { %v7479_v48 = vsel %vm1113_vm7, %v7181_v55, %v1224_v41  ;;  %v1128_v52 = vsel %vm1111_vm6, %v7282_v21, %v1127_v19  ;;  %v1134_v11 = vsel %vm1109_vm4, %v7338_v29, %v1133_v35  ;;  %v7499_v55 = vsel %vm1101_vm1, %v7377_v15, %v7368_v43  ;;  %v8534_v41 = vld [vmem:[#allocation15_spill] sm:$0xff] }
 0x135   :  { %v7487_v14 = vsel %vm1113_vm7, %v7287_v54, %v1128_v52  ;;  %v1135_v30 = vsel %vm1111_vm6, %v7347_v32, %v1134_v11  ;;  %v1227_v33 = vsel %vm1101_vm1, %v7252_v5, %v7242_v45  ;;  %v1331_v39 = vsel %vm1101_vm1, %v7278_v53, %v7271_v22 }
 0x136   :  { %1298 = vrot.lane.b32.xlu1 %v1287_v31, %s6807_s2  ;;  %v1234_v3 = vsel %vm1101_vm1, %v7321_v4, %v7301_v8  ;;  %v7514_v13 = vsel %vm1113_vm7, %v7350_v27, %v1135_v30  ;;  %v1228_v17 = vsel %vm1103_vm2, %v7271_v22, %v1227_v33  ;;  %v1332_v34 = vsel %vm1103_vm2, %v7282_v21, %v1331_v39 }
 0x137   :  { %v1235_v45 = vsel %vm1103_vm2, %v7332_v50, %v1234_v3  ;;  %v1229_v5 = vsel %vm1105_vm3, %v7278_v53, %v1228_v17  ;;  %v1333_v60 = vsel %vm1105_vm3, %v7287_v54, %v1332_v34  ;;  %v7537_v50 = vsel %vm1101_vm1, %v7421_v25, %v7384_v62 }
 0x138   :  { %v1236_v20 = vsel %vm1105_vm3, %v7338_v29, %v1235_v45  ;;  %v1230_v7 = vsel %vm1107_vm5, %v7282_v21, %v1229_v5  ;;  %v1334_v22 = vsel %vm1107_vm5, %v7290_v38, %v1333_v60  ;;  %v1315_v28 = vrot.slane %v920_v42, %v6967_v23 }
 0x139   :  { %v1237_v57 = vsel %vm1107_vm5, %v7347_v32, %v1236_v20  ;;  %v1231_v53 = vsel %vm1109_vm4, %v7287_v54, %v1230_v7  ;;  %v1335_v29 = vsel %vm1109_vm4, %v7296_v44, %v1334_v22  ;;  %v1455_v47 = vrot.slane %v7411_v51, %v7011_v24 }
 0x13a   :  { %v1238_v21 = vsel %vm1109_vm4, %v7350_v27, %v1237_v57  ;;  %v1232_v32 = vsel %vm1111_vm6, %v7290_v38, %v1231_v53  ;;  %v1336_v62 = vsel %vm1111_vm6, %v7301_v8, %v1335_v29  ;;  %v7565_v51 = vsel %vm1101_vm1, %v1315_v28, %v1257_v59 }
 0x13b   :  { %v1239_v54 = vsel %vm1111_vm6, %v7368_v43, %v1238_v21  ;;  %v1233_v25 = vsel %vm1113_vm7, %v7296_v44, %v1232_v32  ;;  %v7558_v27 = vsel %vm1113_vm7, %v7321_v4, %v1336_v62  ;;  %v1213_v44 = vsel %vm1103_vm2, %v7064_v16, %v7054_v49  ;;  %v8533_v49 = vld [vmem:[#allocation14_spill] sm:$0xff] }
 0x13c   :  { %v7562_v26 = vsel %vm1113_vm7, %v7377_v15, %v1239_v54  ;;  %v7569_v38 = vrot.slane %v7558_v27, %v7011_v24  ;;  %v1214_v4 = vsel %vm1105_vm3, %v7069_v36, %v1213_v44  ;;  %v1108_v43 = vsel %vm1107_vm5, %v7064_v16, %v7048_v46 }
 0x13d   :  { %v1215_v15 = vsel %vm1107_vm5, %v7072_v37, %v1214_v4  ;;  %v1110_v59 = vsel %vm1109_vm4, %v7069_v36, %v1108_v43  ;;  %v1115_v19 = vsel %vm1101_vm1, %v8534_v41, %v8533_v49  ;;  %v1459_v43 = vcombine.high %v7558_v27, %v7558_v27 }
 0x13e   :  { %v7572_v8 = vcombine.low %v1455_v47, %v7569_v38  ;;  %v1216_v10 = vsel %vm1109_vm4, %v8532_v58, %v1215_v15  ;;  %v1112_v61 = vsel %vm1111_vm6, %v7072_v37, %v1110_v59  ;;  %v1116_v42 = vsel %vm1103_vm2, %v7108_v9, %v1115_v19 }
 0x13f   :  { %v1217_v31 = vsel %vm1111_vm6, %v8533_v49, %v1216_v10  ;;  %v1114_v16 = vsel %vm1113_vm7, %v8532_v58, %v1112_v61  ;;  %v1117_v30 = vsel %vm1105_vm3, %v7121_v40, %v1116_v42  ;;  %v1494_v49 = vcombine.high %v7432_v0, %v7432_v0 }
 0x140   :  { %v1218_v36 = vsel %vm1113_vm7, %v8534_v41, %v1217_v31  ;;  %v1118_v3 = vsel %vm1107_vm5, %v7138_v1, %v1117_v30  ;;  %v1515_v42 = vrot.slane %v7432_v0, %v7011_v24 }
 0x141   :  { %v1119_v34 = vsel %vm1109_vm4, %v7141_v2, %v1118_v3 }
 0x142   :  { %v1120_v40 = vsel %vm1111_vm6, %v7147_v6, %v1119_v34 }
 0x143   :  { %v1121_v20 = vsel %vm1113_vm7, %v7160_v18, %v1120_v40 }
 0x154   :  { %v1185_v46 = vpop.permute.xlu0 %1184 }
 0x155   :  { %v1347_v37 = vsel %vm1346_vm8, %v1114_v16, %v1185_v46 }
 0x15d   :  { %v1289_v12 = vpop.permute.xlu1 %1288 }
 0x15e   :  { %v1353_v52 = vsel %vm1346_vm8, %v1218_v36, %v1289_v12 }
 0x15f   :  { %v1371_v35 = vcombine.low %v1347_v37, %v1353_v52  ;;  %v1372_v11 = vcombine.high %v1347_v37, %v1353_v52  ;;  %v1522_v37 = vrot.slane %v1494_v49, %v7011_v24  ;;  %v2199_v49 = vld [vmem:[#allocation5 + $0x38] sm:$0xff] }
 0x161   :  { %v1380_v33 = vrot.slane %v1371_v35, %v7011_v24  ;;  %v1387_v39 = vrot.slane %v1372_v11, %v7011_v24 }
 0x163   :  { %v1593_v17 = vrot.slane %v1380_v33, %v7011_v24  ;;  %v1607_v9 = vrot.slane %v1387_v39, %v7011_v24  ;;  %v1670_v33 = vrot.slane %v7572_v8, %v7011_v24 }
 0x165   :  { %v1616_v45 = vcombine.high %v1593_v17, %v1607_v9  ;;  %v1615_v5 = vcombine.low %v1593_v17, %v1607_v9 }
 0x166   :  { %v1187_v60 = vpop.permute.xlu0 %1186 }
 0x167   :  { %1824 = vmatprep.mubr.f32.mxu0 %v1616_v45  ;;  %v1348_v1 = vsel %vm1346_vm8, %v1121_v20, %v1187_v60 }
 0x168   :  { %1825 = vmatmul.mubr.f32.vlgmr.msra.gmra.mrb[0].mxu0 %v1615_v5 }
 0x16c   :  { %v1291_v7 = vpop.permute.xlu1 %1290 }
 0x16d   :  { %v1354_v22 = vsel %vm1346_vm8, %v7479_v48, %v1291_v7 }
 0x16e   :  { %v1406_v57 = vcombine.low %v1348_v1, %v1354_v22  ;;  %v1407_v53 = vcombine.high %v1348_v1, %v1354_v22 }
 0x170   :  { %v1415_v2 = vrot.slane %v1406_v57, %v7011_v24  ;;  %v1422_v29 = vrot.slane %v1407_v53, %v7011_v24 }
 0x172   :  { %v1628_v21 = vrot.slane %v1415_v2, %v7011_v24  ;;  %v1642_v6 = vrot.slane %v1422_v29, %v7011_v24  ;;  %v8535_v29 = vmov 0.0  }
 0x174   :  { %v1651_v28 = vcombine.high %v1628_v21, %v1642_v6  ;;  %v1650_v47 = vcombine.low %v1628_v21, %v1642_v6 }
 0x176   :  { %1829 = vmatprep.mubr.f32.mxu0 %v1651_v28 }
 0x177   :  { %1830 = vmatmul.mubr.f32.gmra.mrb[2].mxu0 %v1650_v47 }
 0x187   :  { %v1191_v18 = vpop.permute.xlu0 %1190 }
 0x188   :  { %v1350_v59 = vsel %vm1346_vm8, %v7487_v14, %v1191_v18 }
 0x18b   :  { %v1189_v32 = vpop.permute.xlu0 %1188 }
 0x18c   :  { %v1349_v48 = vsel %vm1346_vm8, %v7453_v63, %v1189_v32 }
 0x197   :  { %v1193_v4 = vpop.permute.xlu0 %1192 }
 0x198   :  { %v1351_v19 = vsel %vm1346_vm8, %v7514_v13, %v1193_v4  ;;  %v1541_v13 = vrot.slane %v7565_v51, %v7011_v24 }
 0x19c   :  { %v1293_v62 = vpop.permute.xlu1 %1292 }
 0x19d   :  { %v1355_v54 = vsel %vm1346_vm8, %v7494_v56, %v1293_v62  ;;  %v1487_v56 = vrot.slane %v1459_v43, %v7011_v24 }
 0x19e   :  { %v1441_v44 = vcombine.low %v1349_v48, %v1355_v54 }
 0x1a0   :  { %v1295_v15 = vpop.permute.xlu1 %1294  ;;  %v1448_v63 = vrot.slane %v1441_v44, %v7011_v24 }
 0x1a1   :  { %v1356_v58 = vsel %vm1346_vm8, %v1233_v25, %v1295_v15  ;;  %v1195_v25 = vpop.permute.xlu0 %1194 }
 0x1a2   :  { %v1457_v10 = vcombine.low %v1350_v59, %v1356_v58  ;;  %v1458_v61 = vcombine.high %v1350_v59, %v1356_v58  ;;  %v1352_v39 = vsel %vm1346_vm8, %v7499_v55, %v1195_v25  ;;  %v2193_v59 = vld [vmem:[#allocation5 + $0x8] sm:$0xff] }
 0x1a3   :  { %v2197_v58 = vld [vmem:[#allocation5 + $0x28] sm:$0xff] }
 0x1a4   :  { %v1466_v31 = vrot.slane %v1457_v10, %v7011_v24  ;;  %v1473_v41 = vrot.slane %v1458_v61, %v7011_v24  ;;  %v1297_v27 = vpop.permute.xlu1 %1296  ;;  %v2195_v10 = vld [vmem:[#allocation5 + $0x18] sm:$0xff]  ;;  %v5727_v61 = vpack.c.bf16 %v2197_v58, %v2193_v59  ;;  %v2230_v59 = vld [vmem:[#allocation5 + $0x130] sm:$0xff]  ;;  %v2233_v58 = vld [vmem:[#allocation5 + $0x148] sm:$0xff] }
 0x1a5   :  { %v1357_v14 = vsel %vm1346_vm8, %v7562_v26, %v1297_v27  ;;  %v2194_v27 = vld [vmem:[#allocation5 + $0x10] sm:$0xff] }
 0x1a6   :  { %v1489_v46 = vcombine.high %v1466_v31, %v7569_v38  ;;  %v1490_v16 = vcombine.low %v1473_v41, %v1487_v56  ;;  %v1491_v12 = vcombine.high %v1473_v41, %v1487_v56  ;;  %v5423_v36 = vcombine.low %v1448_v63, %v1466_v31  ;;  %v2192_v63 = vld [vmem:[#allocation5] sm:$0xff]  ;;  %5728 = vmatprep.subr.bf16.mxu1 %v5727_v61 }
 0x1a7   :  { %v1492_v52 = vcombine.low %v1351_v19, %v1357_v14  ;;  %v1493_v35 = vcombine.high %v1351_v19, %v1357_v14  ;;  %v5759_v31 = vpack.c.bf16 %v2199_v49, %v2195_v10  ;;  %v2198_v19 = vld [vmem:[#allocation5 + $0x30] sm:$0xff]  ;;  %v2201_v14 = vld [vmem:[#allocation5 + $0x48] sm:$0xff] }
 0x1a8   :  { %v5426_v11 = vcombine.high %v7569_v38, %v1490_v16  ;;  %v1299_v30 = vpop.permute.xlu1 %1298  ;;  %v5425_v26 = vcombine.low %v1489_v46, %v1473_v41  ;;  %v1663_v38 = vrot.slane %v5423_v36, %v7011_v24  ;;  %v5761_v25 = vpack.c.bf16 %v2198_v19, %v2194_v27  ;;  %v2205_v46 = vld [vmem:[#allocation5 + $0x68] sm:$0xff]  ;;  %v2203_v16 = vld [vmem:[#allocation5 + $0x58] sm:$0xff]  ;;  %v2236_v27 = vld [vmem:[#allocation5 + $0x160] sm:$0xff] }
 0x1a9   :  { %v1501_v3 = vrot.slane %v1492_v52, %v7011_v24  ;;  %v1508_v0 = vrot.slane %v1493_v35, %v7011_v24  ;;  %v1358_v17 = vsel %vm1346_vm8, %v7537_v50, %v1299_v30  ;;  %5760 = vmatprep.subr.bf16.mxu0 %v5759_v31  ;;  %v5731_v36 = vpack.c.bf16 %v2205_v46, %v2201_v14  ;;  %v2204_v52 = vld [vmem:[#allocation5 + $0x60] sm:$0xff]  ;;  %v2202_v35 = vld [vmem:[#allocation5 + $0x50] sm:$0xff]  ;;  %v2237_v10 = vld [vmem:[#allocation5 + $0x168] sm:$0xff] }
 0x1aa   :  { %v1527_v9 = vcombine.low %v1352_v39, %v1358_v17  ;;  %v1677_v34 = vrot.slane %v5425_v26, %v7011_v24  ;;  %v1684_v51 = vrot.slane %v5426_v11, %v7011_v24  ;;  %5762 = vmatpush1.bf16.msra.mxu0 %v5761_v25  ;;  %v2206_v30 = vld [vmem:[#allocation5 + $0x70] sm:$0xff]  ;;  %v2213_v26 = vld [vmem:[#allocation5 + $0xa8] sm:$0xff]  ;;  %v2208_v17 = vld [vmem:[#allocation5 + $0x80] sm:$0xff]  ;;  %v5747_v49 = vpack.c.bf16 %v2237_v10, %v2233_v58 }
 0x1ab   :  { %v1523_v45 = vcombine.low %v1501_v3, %v1515_v42  ;;  %v1524_v5 = vcombine.high %v1501_v3, %v1515_v42  ;;  %v1525_v8 = vcombine.low %v1508_v0, %v1522_v37  ;;  %v1526_v40 = vcombine.high %v1508_v0, %v1522_v37  ;;  %v2232_v31 = vld [vmem:[#allocation5 + $0x140] sm:$0xff]  ;;  %v2234_v19 = vld [vmem:[#allocation5 + $0x150] sm:$0xff]  ;;  %v2241_v25 = vld [vmem:[#allocation5 + $0x188] sm:$0xff] }
 0x1ac   :  { %v1534_v55 = vrot.slane %v1527_v9, %v7011_v24  ;;  %v1686_v60 = vcombine.high %v1663_v38, %v1677_v34  ;;  %v1687_v20 = vcombine.low %v1670_v33, %v1684_v51  ;;  %v1685_v7 = vcombine.low %v1663_v38, %v1677_v34  ;;  %v2212_v38 = vld [vmem:[#allocation5 + $0xa0] sm:$0xff]  ;;  %v2210_v34 = vld [vmem:[#allocation5 + $0x90] sm:$0xff]  ;;  %v2245_v46 = vld [vmem:[#allocation5 + $0x1a8] sm:$0xff] }
 0x1ad   :  { %v5428_v1 = vcombine.high %v1487_v56, %v1523_v45  ;;  %v5430_v22 = vcombine.high %v1515_v42, %v1525_v8  ;;  %v5427_v57 = vcombine.low %v1491_v12, %v1501_v3  ;;  %v5429_v50 = vcombine.low %v1524_v5, %v1508_v0  ;;  %v2196_v56 = vld [vmem:[#allocation5 + $0x20] sm:$0xff]  ;;  %v2207_v12 = vld [vmem:[#allocation5 + $0x78] sm:$0xff]  ;;  %v2214_v51 = vld [vmem:[#allocation5 + $0xb0] sm:$0xff] }
 0x1ae   :  { %v1542_v53 = vcombine.low %v1534_v55, %v1541_v13  ;;  %v5431_v2 = vcombine.low %v1526_v40, %v1534_v55  ;;  %1834 = vmatprep.mubr.f32.mxu0 %v1686_v60  ;;  %5623 = vmatmul.mubr.msk.f32.gmra.mrb[4].mxu1 %vm1346_vm8, %v1687_v20  ;;  %v5729_v41 = vpack.c.bf16 %v2196_v56, %v2192_v63  ;;  %v2209_v13 = vld [vmem:[#allocation5 + $0x88] sm:$0xff]  ;;  %v2211_v3 = vld [vmem:[#allocation5 + $0x98] sm:$0xff]  ;;  %v2238_v14 = vld [vmem:[#allocation5 + $0x170] sm:$0xff] }
 0x1af   :  { %1835 = vmatmul.mubr.f32.gmra.mrb[4].mxu0 %v1685_v7  ;;  %5625 = vmatprep.mubr.msk.f32.mxu1 %vm6804_vm0, %v8535_v29  ;;  %v1698_v21 = vrot.slane %v5427_v57, %v7011_v24  ;;  %v1712_v6 = vrot.slane %v5429_v50, %v7011_v24  ;;  %v1705_v28 = vrot.slane %v5428_v1, %v7011_v24  ;;  %v2215_v0 = vld [vmem:[#allocation5 + $0xb8] sm:$0xff]  ;;  %v2217_v8 = vld [vmem:[#allocation5 + $0xc8] sm:$0xff]  ;;  %v2216_v1 = vld [vmem:[#allocation5 + $0xc0] sm:$0xff] }
 0x1b0   :  { %v5432_v47 = vcombine.high %v1522_v37, %v1542_v53  ;;  %v1719_v18 = vrot.slane %v5430_v22, %v7011_v24  ;;  %v1731_v32 = vrot.slane %v5431_v2, %v7011_v24  ;;  %5730 = vmatpush1.bf16.msra.mxu1 %v5729_v41  ;;  %v5763_v42 = vpack.c.bf16 %v2207_v12, %v2203_v16  ;;  %v2200_v37 = vld [vmem:[#allocation5 + $0x40] sm:$0xff]  ;;  %v2221_v40 = vld [vmem:[#allocation5 + $0xe8] sm:$0xff]  ;;  %v2219_v55 = vld [vmem:[#allocation5 + $0xd8] sm:$0xff] }
 0x1b1   :  { %v1721_v62 = vcombine.high %v1698_v21, %v1712_v6  ;;  %v1720_v48 = vcombine.low %v1698_v21, %v1712_v6  ;;  %v5733_v11 = vpack.c.bf16 %v2204_v52, %v2200_v37  ;;  %5732 = vmatprep.subr.bf16.mxu1 %v5731_v36  ;;  %v5765_v33 = vpack.c.bf16 %v2206_v30, %v2202_v35  ;;  %v2223_v7 = vld [vmem:[#allocation5 + $0xf8] sm:$0xff]  ;;  %v2220_v22 = vld [vmem:[#allocation5 + $0xe0] sm:$0xff]  ;;  %v2218_v2 = vld [vmem:[#allocation5 + $0xd0] sm:$0xff] }
 0x1b2   :  { %v1722_v54 = vcombine.low %v1705_v28, %v1719_v18  ;;  %v1739_v44 = vcombine.high %v1731_v32, %v1731_v32  ;;  %v1738_v4 = vrot.slane %v5432_v47, %v7011_v24  ;;  %5764 = vmatprep.subr.bf16.mxu0 %v5763_v42  ;;  %v5735_v39 = vpack.c.bf16 %v2213_v26, %v2209_v13  ;;  %v2222_v21 = vld [vmem:[#allocation5 + $0xf0] sm:$0xff]  ;;  %v2225_v6 = vld [vmem:[#allocation5 + $0x108] sm:$0xff]  ;;  %v2227_v18 = vld [vmem:[#allocation5 + $0x118] sm:$0xff] }
 0x1b3   :  { %1839 = vmatprep.mubr.f32.mxu0 %v1721_v62  ;;  %v5767_v9 = vpack.c.bf16 %v2215_v0, %v2211_v3  ;;  %v5737_v45 = vpack.c.bf16 %v2212_v38, %v2208_v17  ;;  %5766 = vmatpush1.bf16.msra.mxu0 %v5765_v33  ;;  %v5769_v5 = vpack.c.bf16 %v2214_v51, %v2210_v34  ;;  %v2229_v47 = vld [vmem:[#allocation5 + $0x128] sm:$0xff]  ;;  %v2235_v63 = vld [vmem:[#allocation5 + $0x158] sm:$0xff]  ;;  %v2240_v52 = vld [vmem:[#allocation5 + $0x180] sm:$0xff] }
 0x1b4   :  { %5626 = vmatmul.mubr.msk.f32.gmra.mrb[6].mxu1 %vm1346_vm8, %v1722_v54  ;;  %1840 = vmatmul.mubr.f32.gmra.mrb[6].mxu0 %v1720_v48  ;;  %v5739_v20 = vpack.c.bf16 %v2221_v40, %v2217_v8  ;;  %v5771_v50 = vpack.c.bf16 %v2223_v7, %v2219_v55  ;;  %v5741_v53 = vpack.c.bf16 %v2220_v22, %v2216_v1  ;;  %v2224_v54 = vld [vmem:[#allocation5 + $0x100] sm:$0xff]  ;;  %v2239_v56 = vld [vmem:[#allocation5 + $0x178] sm:$0xff]  ;;  %v2246_v13 = vld [vmem:[#allocation5 + $0x1b0] sm:$0xff] }
 0x1b5   :  { %1844 = vmatprep.mubr.f32.mxu0 %v1739_v44  ;;  %5628 = vmatprep.mubr.msk.f32.mxu1 %vm6804_vm0, %v8535_v29  ;;  %v5773_v28 = vpack.c.bf16 %v2222_v21, %v2218_v2  ;;  %v5743_v62 = vpack.c.bf16 %v2229_v47, %v2225_v6  ;;  %v2228_v44 = vld [vmem:[#allocation5 + $0x120] sm:$0xff]  ;;  %v5779_v41 = vpack.c.bf16 %v2239_v56, %v2235_v63  ;;  %v2243_v16 = vld [vmem:[#allocation5 + $0x198] sm:$0xff]  ;;  %v2249_v26 = vld [vmem:[#allocation5 + $0x1c8] sm:$0xff] }
 0x1b6   :  { %5734 = vmatpush1.bf16.msra.mxu1 %v5733_v11  ;;  %5768 = vmatprep.subr.bf16.mxu0 %v5767_v9  ;;  %v5749_v12 = vpack.c.bf16 %v2236_v27, %v2232_v31  ;;  %v2247_v36 = vld [vmem:[#allocation5 + $0x1b8] sm:$0xff]  ;;  %v5781_v42 = vpack.c.bf16 %v2238_v14, %v2234_v19  ;;  %v5751_v37 = vpack.c.bf16 %v2245_v46, %v2241_v25  ;;  %v2244_v35 = vld [vmem:[#allocation5 + $0x1a0] sm:$0xff]  ;;  %v2242_v11 = vld [vmem:[#allocation5 + $0x190] sm:$0xff] }
 0x1b7   :  { %5736 = vmatprep.subr.bf16.mxu1 %v5735_v39  ;;  %5770 = vmatpush1.bf16.msra.mxu0 %v5769_v5  ;;  %v5783_v30 = vpack.c.bf16 %v2247_v36, %v2243_v16  ;;  %v2253_v33 = vld [vmem:[#allocation5 + $0x1e8] sm:$0xff]  ;;  %v2251_v39 = vld [vmem:[#allocation5 + $0x1d8] sm:$0xff]  ;;  %v5753_v0 = vpack.c.bf16 %v2244_v35, %v2240_v52  ;;  %v5785_v17 = vpack.c.bf16 %v2246_v13, %v2242_v11  ;;  %v2248_v38 = vld [vmem:[#allocation5 + $0x1c0] sm:$0xff] }
 0x1b8   :  { %5629 = vmatmul.mubr.msk.f32.gmra.mrb[8].mxu1 %vm1346_vm8, %v1738_v4  ;;  %1845 = vmatmul.mubr.f32.gmra.mrb[8].mxu0 %v1731_v32  ;;  %v2231_v32 = vld [vmem:[#allocation5 + $0x138] sm:$0xff]  ;;  %v2226_v4 = vld [vmem:[#allocation5 + $0x110] sm:$0xff]  ;;  %v5755_v9 = vpack.c.bf16 %v2253_v33, %v2249_v26  ;;  %v2252_v34 = vld [vmem:[#allocation5 + $0x1e0] sm:$0xff] }
 0x1b9   :  { %2450 = vmatprep.mubr.f32.mxu1 %v8535_v29  ;;  %2533 = vmatprep.mubr.f32.mxu0 %v8535_v29  ;;  %v5775_v48 = vpack.c.bf16 %v2231_v32, %v2227_v18  ;;  %v5777_v61 = vpack.c.bf16 %v2230_v59, %v2226_v4  ;;  %v2255_v3 = vld [vmem:[#allocation5 + $0x1f8] sm:$0xff]  ;;  %v2254_v5 = vld [vmem:[#allocation5 + $0x1f0] sm:$0xff]  ;;  %v5757_v8 = vpack.c.bf16 %v2252_v34, %v2248_v38  ;;  %v2751_v55 = vld [vmem:[#allocation7 + $0x8] sm:$0xff] }
 0x1ba   :  { %5738 = vmatpush1.bf16.msra.mxu1 %v5737_v45  ;;  %5772 = vmatprep.subr.bf16.mxu0 %v5771_v50  ;;  %v5787_v51 = vpack.c.bf16 %v2255_v3, %v2251_v39  ;;  %v2250_v45 = vld [vmem:[#allocation5 + $0x1d0] sm:$0xff]  ;;  %v2753_v7 = vld [vmem:[#allocation7 + $0x18] sm:$0xff]  ;;  %v5438_v50 = vld [vmem:[%s8498_s4] ss:$0 sm:$0xff]  ;;  %s5366_s4 = sshll.u32 %s6809_s28, 4  ;;  %s5367_s4 = int_to_ptr.vmem [resolvable:$true] %s5366_s4 }
 0x1bb   :  { %5740 = vmatprep.subr.bf16.mxu1 %v5739_v20  ;;  %5774 = vmatpush1.bf16.msra.mxu0 %v5773_v28  ;;  %v5789_v40 = vpack.c.bf16 %v2254_v5, %v2250_v45  ;;  %v2755_v20 = vld [vmem:[#allocation7 + $0x28] sm:$0xff]  ;;  %v2757_v22 = vld [vmem:[#allocation7 + $0x38] sm:$0xff]  ;;  %v2045_v2 = vcombine.high %v5438_v50, %v5438_v50  ;;  %v7691_v28 = vrot.slane %v5438_v50, %v7011_v24  ;;  %p6773_p11 = scmp.lt.s32.totalorder %s5367_s4, %s5367_s4 }
 0x1bc   :  { %5776 = vmatprep.subr.bf16.mxu0 %v5775_v48  ;;  %v7681_v1 = vpack.c.bf16 %v2755_v20, %v2751_v55 }
 0x1bd   :  { %v7695_v18 = vrot.slane %v2045_v2, %v7011_v24  ;;  %v7700_v48 = vcombine.high %v7691_v28, %v7691_v28 }
 0x1be   :  { %5742 = vmatpush1.bf16.msra.mxu1 %v5741_v53 }
 0x1bf   :  { %5744 = vmatprep.subr.bf16.mxu1 %v5743_v62  ;;  %5778 = vmatpush1.bf16.msra.mxu0 %v5777_v61  ;;  %v7705_v4 = vcombine.high %v7695_v18, %v7695_v18 }
 0x1c0   :  { %5780 = vmatprep.subr.bf16.mxu0 %v5779_v41 }
 0x1c3   :  { %5782 = vmatpush1.bf16.msra.mxu0 %v5781_v42 }
 0x1c4   :  { %5784 = vmatprep.subr.bf16.mxu0 %v5783_v30 }
 0x1c7   :  { %5786 = vmatpush1.bf16.msra.mxu0 %v5785_v17 }
 0x1c8   :  { %5788 = vmatprep.subr.bf16.mxu0 %v5787_v51 }
 0x1cb   :  { %5790 = vmatpush1.bf16.msra.mxu0 %v5789_v40 }
 0x1cc   :  { %v7677_v43 = vpop.f32.mrb[0].mxu1 }
 0x1cd   :  { %v5618_v15 = vpop.f32.mrb[1].mxu1 }
 0x1ce   :  { %v5745_v15 = vpack.c.bf16 %v2228_v44, %v2224_v54 }
 0x1d0   :  { %5746 = vmatpush1.bf16.msra.mxu1 %v5745_v15 }
 0x1d1   :  { %5748 = vmatprep.subr.bf16.mxu1 %v5747_v49 }
 0x1d4   :  { %5750 = vmatpush1.bf16.msra.mxu1 %v5749_v12 }
 0x1d5   :  { %5752 = vmatprep.subr.bf16.mxu1 %v5751_v37 }
 0x1d8   :  { %5754 = vmatpush1.bf16.msra.mxu1 %v5753_v0 }
 0x1d9   :  { %5756 = vmatprep.subr.bf16.mxu1 %v5755_v9 }
 0x1dc   :  { %5758 = vmatpush1.bf16.msra.mxu1 %v5757_v8 }
 0x1dd   :  { %v7679_v60 = vpop.f32.mrb[2].mxu1  ;;  %5792 = vmatprep.subr.bf16.mxu1 %v7681_v1 }
 0x1de   :  { %v5621_v57 = vpop.f32.mrb[3].mxu1 }
 0x1df   :  { %v7683_v57 = vpack.c.bf16 %v2757_v22, %v2753_v7 }
 0x1e1   :  { %8536 = vst [vmem:[#allocation13_spill] sm:$0xff] %v7683_v57  ;;  %5824 = vmatprep.subr.bf16.mxu0 %v7683_v57 }
 0x23b   :  { %v5547_v53 = vpop.f32.mrb[0].mxu0 }
 0x23c   :  { %v5548_v21 = vpop.f32.mrb[1].mxu0 }
 0x23d   :  { %v5549_v6 = vadd.f32 %v5548_v21, %v5547_v53  ;;  %v2750_v21 = vld [vmem:[#allocation7] sm:$0xff] }
 0x23f   :  { %v1917_v47 = vadd.f32 %v5549_v6, %v7677_v43  ;;  %v2754_v6 = vld [vmem:[#allocation7 + $0x20] sm:$0xff] }
 0x241   :  { %v1945_v32 = vcombine.high %v1917_v47, %v1917_v47  ;;  %v1952_v62 = vrot.slane %v1917_v47, %v7011_v24 }
 0x243   :  { %v1959_v54 = vrot.slane %v1945_v32, %v7011_v24  ;;  %v1960_v44 = vcombine.high %v1952_v62, %v1952_v62  ;;  %v2066_v15 = vadd.f32 %v7691_v28, %v1952_v62  ;;  %v2752_v32 = vld [vmem:[#allocation7 + $0x10] sm:$0xff] }
 0x244   :  { %v2756_v62 = vld [vmem:[#allocation7 + $0x30] sm:$0xff] }
 0x245   :  { %v1961_v43 = vcombine.high %v1959_v54, %v1959_v54  ;;  %v2067_v59 = vadd.f32 %v7700_v48, %v1960_v44  ;;  %v2068_v58 = vadd.f32 %v7695_v18, %v1959_v54  ;;  %v2084_v10 = vmax.f32 %v2066_v15, 0.0  ;;  %v2759_v54 = vld [vmem:[#allocation7 + $0x48] sm:$0xff] }
 0x247   :  { %v2069_v61 = vadd.f32 %v7705_v4, %v1961_v43  ;;  %v2085_v49 = vmax.f32 %v2067_v59, 0.0  ;;  %v2086_v63 = vmax.f32 %v2068_v58, 0.0  ;;  %v5439_v56 = vrot.slane %v2084_v10, 9  ;;  %v2763_v58 = vld [vmem:[#allocation7 + $0x68] sm:$0xff] }
 0x249   :  { %v2087_v41 = vmax.f32 %v2069_v61, 0.0  ;;  %v5440_v27 = vrot.slane %v2085_v49, 9  ;;  %v5441_v19 = vrot.slane %v2086_v63, 9  ;;  %v2174_v46 = vmax.f32 %v2084_v10, %v5439_v56  ;;  %v2761_v10 = vld [vmem:[#allocation7 + $0x58] sm:$0xff] }
 0x24a   :  { %v5550_v31 = vpop.f32.mrb[2].mxu0  ;;  %v2765_v61 = vld [vmem:[#allocation7 + $0x78] sm:$0xff]  ;;  %v7731_v56 = vpack.c.bf16 %v2754_v6, %v2750_v21  ;;  %v2782_v21 = vld [vmem:[#allocation7 + $0x100] sm:$0xff] }
 0x24b   :  { %v5551_v14 = vpop.f32.mrb[3].mxu0  ;;  %v2175_v16 = vmax.f32 %v2085_v49, %v5440_v27  ;;  %v5442_v36 = vrot.slane %v2087_v41, 9  ;;  %v2176_v42 = vmax.f32 %v2086_v63, %v5441_v19  ;;  %v2299_v11 = vrot.slane %v2174_v46, %v6967_v23  ;;  %v2762_v27 = vld [vmem:[#allocation7 + $0x60] sm:$0xff]  ;;  %v2760_v46 = vld [vmem:[#allocation7 + $0x50] sm:$0xff] }
 0x24c   :  { %v5552_v25 = vadd.f32 %v5551_v14, %v5550_v31  ;;  %v7733_v31 = vpack.c.bf16 %v2756_v62, %v2752_v32  ;;  %v7736_v14 = vpack.c.bf16 %v2763_v58, %v2759_v54  ;;  %v2786_v6 = vld [vmem:[#allocation7 + $0x120] sm:$0xff]  ;;  %v2784_v62 = vld [vmem:[#allocation7 + $0x110] sm:$0xff] }
 0x24d   :  { %v2303_v37 = vrot.slane %v2175_v16, %v6967_v23  ;;  %v2177_v33 = vmax.f32 %v2087_v41, %v5442_v36  ;;  %v2307_v39 = vrot.slane %v2176_v42, %v6967_v23  ;;  %v2758_v41 = vld [vmem:[#allocation7 + $0x40] sm:$0xff]  ;;  %v2764_v16 = vld [vmem:[#allocation7 + $0x70] sm:$0xff]  ;;  %v2771_v42 = vld [vmem:[#allocation7 + $0xa8] sm:$0xff]  ;;  %v7781_v58 = vpack.c.bf16 %v2786_v6, %v2782_v21 }
 0x24e   :  { %v1922_v12 = vadd.f32 %v5552_v25, %v7679_v60  ;;  %v7738_v25 = vpack.c.bf16 %v2765_v61, %v2761_v10  ;;  %v2788_v54 = vld [vmem:[#allocation7 + $0x130] sm:$0xff]  ;;  %v2790_v61 = vld [vmem:[#allocation7 + $0x140] sm:$0xff] }
 0x24f   :  { %v2368_v3 = vsel %vm1101_vm1, %v2303_v37, %v2299_v11  ;;  %v2311_v5 = vrot.slane %v2177_v33, %v6967_v23  ;;  %v2769_v37 = vld [vmem:[#allocation7 + $0x98] sm:$0xff]  ;;  %v7745_v11 = vpack.c.bf16 %v2764_v16, %v2760_v46  ;;  %v7783_v10 = vpack.c.bf16 %v2788_v54, %v2784_v62  ;;  %v2799_v46 = vld [vmem:[#allocation7 + $0x188] sm:$0xff]  ;;  %v2812_v21 = vld [vmem:[#allocation7 + $0x1f0] sm:$0xff] }
 0x250   :  { %v1962_v52 = vcombine.high %v1922_v12, %v1922_v12  ;;  %v1969_v35 = vrot.slane %v1922_v12, %v7011_v24  ;;  %v2369_v8 = vsel %vm1103_vm2, %v2307_v39, %v2368_v3  ;;  %v2767_v12 = vld [vmem:[#allocation7 + $0x88] sm:$0xff]  ;;  %v2768_v39 = vld [vmem:[#allocation7 + $0x90] sm:$0xff] }
 0x251   :  { %v2370_v47 = vsel %vm1105_vm3, %v2311_v5, %v2369_v8  ;;  %v2772_v3 = vld [vmem:[#allocation7 + $0xb0] sm:$0xff]  ;;  %v2803_v16 = vld [vmem:[#allocation7 + $0x1a8] sm:$0xff] }
 0x252   :  { %v1976_v30 = vrot.slane %v1962_v52, %v7011_v24  ;;  %v1977_v13 = vcombine.high %v1969_v35, %v1969_v35  ;;  %v2070_v26 = vadd.f32 %v7691_v28, %v1969_v35  ;;  %v2773_v52 = vld [vmem:[#allocation7 + $0xb8] sm:$0xff]  ;;  %v7743_v35 = vpack.c.bf16 %v2762_v27, %v2758_v41  ;;  %v2792_v27 = vld [vmem:[#allocation7 + $0x150] sm:$0xff] }
 0x253   :  { %v7751_v33 = vpack.c.bf16 %v2773_v52, %v2769_v37  ;;  %v2798_v52 = vld [vmem:[#allocation7 + $0x180] sm:$0xff] }
 0x254   :  { %v1978_v60 = vcombine.high %v1976_v30, %v1976_v30  ;;  %v2071_v0 = vadd.f32 %v7700_v48, %v1977_v13  ;;  %v2072_v17 = vadd.f32 %v7695_v18, %v1976_v30  ;;  %v2088_v9 = vmax.f32 %v2070_v26, 0.0  ;;  %v2766_v30 = vld [vmem:[#allocation7 + $0x80] sm:$0xff] }
 0x255   :  { %v2770_v13 = vld [vmem:[#allocation7 + $0xa0] sm:$0xff]  ;;  %v7749_v26 = vpack.c.bf16 %v2771_v42, %v2767_v12  ;;  %v2801_v12 = vld [vmem:[#allocation7 + $0x198] sm:$0xff] }
 0x256   :  { %v2073_v38 = vadd.f32 %v7705_v4, %v1978_v60  ;;  %v2089_v34 = vmax.f32 %v2071_v0, 0.0  ;;  %v2090_v51 = vmax.f32 %v2072_v17, 0.0  ;;  %v5443_v45 = vrot.slane %v2088_v9, 9  ;;  %v2775_v60 = vld [vmem:[#allocation7 + $0xc8] sm:$0xff]  ;;  %v2777_v17 = vld [vmem:[#allocation7 + $0xd8] sm:$0xff] }
 0x257   :  { %v2779_v0 = vld [vmem:[#allocation7 + $0xe8] sm:$0xff] }
 0x258   :  { %v2091_v40 = vmax.f32 %v2073_v38, 0.0  ;;  %v5444_v55 = vrot.slane %v2089_v34, 9  ;;  %v5445_v20 = vrot.slane %v2090_v51, 9  ;;  %v2178_v7 = vmax.f32 %v2088_v9, %v5443_v45  ;;  %v2781_v9 = vld [vmem:[#allocation7 + $0xf8] sm:$0xff]  ;;  %v2778_v45 = vld [vmem:[#allocation7 + $0xe0] sm:$0xff] }
 0x259   :  { %v7757_v38 = vpack.c.bf16 %v2770_v13, %v2766_v30  ;;  %v7763_v5 = vpack.c.bf16 %v2779_v0, %v2775_v60  ;;  %v7765_v8 = vpack.c.bf16 %v2781_v9, %v2777_v17  ;;  %v2802_v30 = vld [vmem:[#allocation7 + $0x1a0] sm:$0xff]  ;;  %v7799_v13 = vpack.c.bf16 %v2803_v16, %v2799_v46  ;;  %v2804_v60 = vld [vmem:[#allocation7 + $0x1b0] sm:$0xff]  ;;  %v2807_v0 = vld [vmem:[#allocation7 + $0x1c8] sm:$0xff] }
 0x25a   :  { %v5446_v22 = vrot.slane %v2091_v40, 9  ;;  %v2179_v50 = vmax.f32 %v2089_v34, %v5444_v55  ;;  %v2180_v53 = vmax.f32 %v2090_v51, %v5445_v20  ;;  %v2315_v2 = vrot.slane %v2178_v7, %v6967_v23  ;;  %v2774_v51 = vld [vmem:[#allocation7 + $0xc0] sm:$0xff]  ;;  %v2780_v55 = vld [vmem:[#allocation7 + $0xf0] sm:$0xff]  ;;  %v2783_v20 = vld [vmem:[#allocation7 + $0x108] sm:$0xff] }
 0x25b   :  { %v7759_v34 = vpack.c.bf16 %v2772_v3, %v2768_v39  ;;  %v2787_v7 = vld [vmem:[#allocation7 + $0x128] sm:$0xff]  ;;  %v2800_v3 = vld [vmem:[#allocation7 + $0x190] sm:$0xff]  ;;  %v2809_v9 = vld [vmem:[#allocation7 + $0x1d8] sm:$0xff] }
 0x25c   :  { %v2319_v44 = vrot.slane %v2179_v50, %v6967_v23  ;;  %v2181_v15 = vmax.f32 %v2091_v40, %v5446_v22  ;;  %v2323_v43 = vrot.slane %v2180_v53, %v6967_v23  ;;  %v2371_v59 = vsel %vm1107_vm5, %v2315_v2, %v2370_v47  ;;  %v2776_v40 = vld [vmem:[#allocation7 + $0xd0] sm:$0xff]  ;;  %v2785_v22 = vld [vmem:[#allocation7 + $0x118] sm:$0xff]  ;;  %v2811_v17 = vld [vmem:[#allocation7 + $0x1e8] sm:$0xff] }
 0x25d   :  { %v2789_v50 = vld [vmem:[#allocation7 + $0x138] sm:$0xff]  ;;  %v7769_v53 = vpack.c.bf16 %v2778_v45, %v2774_v51  ;;  %v7771_v2 = vpack.c.bf16 %v2780_v55, %v2776_v40  ;;  %v7775_v47 = vpack.c.bf16 %v2787_v7, %v2783_v20  ;;  %v7805_v45 = vpack.c.bf16 %v2802_v30, %v2798_v52  ;;  %v2806_v55 = vld [vmem:[#allocation7 + $0x1c0] sm:$0xff] }
 0x25e   :  { %v2327_v49 = vrot.slane %v2181_v15, %v6967_v23  ;;  %v2372_v63 = vsel %vm1109_vm4, %v2319_v44, %v2371_v59  ;;  %v7777_v32 = vpack.c.bf16 %v2789_v50, %v2785_v22  ;;  %v2791_v44 = vld [vmem:[#allocation7 + $0x148] sm:$0xff]  ;;  %v2797_v59 = vld [vmem:[#allocation7 + $0x178] sm:$0xff]  ;;  %v7807_v40 = vpack.c.bf16 %v2804_v60, %v2800_v3  ;;  %v2810_v22 = vld [vmem:[#allocation7 + $0x1e0] sm:$0xff] }
 0x25f   :  { %v2373_v19 = vsel %vm1111_vm6, %v2323_v43, %v2372_v63  ;;  %v2795_v15 = vld [vmem:[#allocation7 + $0x168] sm:$0xff]  ;;  %v2793_v43 = vld [vmem:[#allocation7 + $0x158] sm:$0xff]  ;;  %v7811_v20 = vpack.c.bf16 %v2811_v17, %v2807_v0  ;;  %v2808_v50 = vld [vmem:[#allocation7 + $0x1d0] sm:$0xff]  ;;  %v7817_v6 = vpack.c.bf16 %v2810_v22, %v2806_v55 }
 0x260   :  { %v2374_v36 = vsel %vm1113_vm7, %v2327_v49, %v2373_v19  ;;  %v2794_v49 = vld [vmem:[#allocation7 + $0x160] sm:$0xff]  ;;  %v7787_v63 = vpack.c.bf16 %v2795_v15, %v2791_v44  ;;  %v7789_v41 = vpack.c.bf16 %v2797_v59, %v2793_v43  ;;  %v2796_v19 = vld [vmem:[#allocation7 + $0x170] sm:$0xff]  ;;  %v2813_v51 = vld [vmem:[#allocation7 + $0x1f8] sm:$0xff]  ;;  %v7819_v62 = vpack.c.bf16 %v2812_v21, %v2808_v50 }
 0x261   :  { %2451 = vmatmul.mubr.f32.vlgmr.msra.gmra.mrb[10].mxu1 %v2374_v36  ;;  %2534 = vmatmul.mubr.f32.vlgmr.msra.gmra.mrb[10].mxu0 %v2374_v36  ;;  %v2805_v36 = vld [vmem:[#allocation7 + $0x1b8] sm:$0xff]  ;;  %v7793_v42 = vpack.c.bf16 %v2794_v49, %v2790_v61  ;;  %v7795_v37 = vpack.c.bf16 %v2796_v19, %v2792_v27  ;;  %v7813_v7 = vpack.c.bf16 %v2813_v51, %v2809_v9 }
 0x262   :  { %5794 = vmatpush1.bf16.msra.mxu1 %v7731_v56  ;;  %5826 = vmatpush1.bf16.msra.mxu0 %v7733_v31  ;;  %v7801_v39 = vpack.c.bf16 %v2805_v36, %v2801_v12 }
 0x263   :  { %5796 = vmatprep.subr.bf16.mxu1 %v7736_v14  ;;  %5828 = vmatprep.subr.bf16.mxu0 %v7738_v25 }
 0x264   :  { %2456 = vmatprep.mubr.f32.mxu1 %v8535_v29  ;;  %2539 = vmatprep.mubr.f32.mxu0 %v8535_v29 }
 0x266   :  { %5798 = vmatpush1.bf16.msra.mxu1 %v7743_v35  ;;  %5830 = vmatpush1.bf16.msra.mxu0 %v7745_v11 }
 0x267   :  { %5800 = vmatprep.subr.bf16.mxu1 %v7749_v26  ;;  %5832 = vmatprep.subr.bf16.mxu0 %v7751_v33 }
 0x26a   :  { %5802 = vmatpush1.bf16.msra.mxu1 %v7757_v38  ;;  %5834 = vmatpush1.bf16.msra.mxu0 %v7759_v34 }
 0x26b   :  { %5804 = vmatprep.subr.bf16.mxu1 %v7763_v5  ;;  %5836 = vmatprep.subr.bf16.mxu0 %v7765_v8 }
 0x26e   :  { %5806 = vmatpush1.bf16.msra.mxu1 %v7769_v53  ;;  %5838 = vmatpush1.bf16.msra.mxu0 %v7771_v2 }
 0x26f   :  { %5808 = vmatprep.subr.bf16.mxu1 %v7775_v47  ;;  %5840 = vmatprep.subr.bf16.mxu0 %v7777_v32 }
 0x272   :  { %5810 = vmatpush1.bf16.msra.mxu1 %v7781_v58  ;;  %5842 = vmatpush1.bf16.msra.mxu0 %v7783_v10 }
 0x273   :  { %5812 = vmatprep.subr.bf16.mxu1 %v7787_v63  ;;  %5844 = vmatprep.subr.bf16.mxu0 %v7789_v41 }
 0x276   :  { %5814 = vmatpush1.bf16.msra.mxu1 %v7793_v42  ;;  %5846 = vmatpush1.bf16.msra.mxu0 %v7795_v37 }
 0x277   :  { %5816 = vmatprep.subr.bf16.mxu1 %v7799_v13  ;;  %5848 = vmatprep.subr.bf16.mxu0 %v7801_v39 }
 0x27a   :  { %5818 = vmatpush1.bf16.msra.mxu1 %v7805_v45  ;;  %5850 = vmatpush1.bf16.msra.mxu0 %v7807_v40 }
 0x27b   :  { %5820 = vmatprep.subr.bf16.mxu1 %v7811_v20  ;;  %5852 = vmatprep.subr.bf16.mxu0 %v7813_v7 }
 0x27e   :  { %5822 = vmatpush1.bf16.msra.mxu1 %v7817_v6  ;;  %5854 = vmatpush1.bf16.msra.mxu0 %v7819_v62 }
 0x27f   :  { %5856 = vmatprep.subr.bf16.mxu1 %v7681_v1  ;;  %5888 = vmatprep.subr.bf16.mxu0 %v7683_v57 }
 0x281   :  { %v1926_v54 = vpop.f32.mrb[4].mxu1 }
 0x282   :  { %v5553_v44 = vpop.f32.mrb[4].mxu0  ;;  %v5624_v15 = vpop.f32.mrb[5].mxu1 }
 0x283   :  { %v5554_v43 = vpop.f32.mrb[5].mxu0 }
 0x284   :  { %v5555_v59 = vadd.f32 %v5554_v43, %v5553_v44 }
 0x286   :  { %v1927_v61 = vadd.f32 %v5555_v59, %v1926_v54 }
 0x287   :  { %v1931_v49 = vpop.f32.mrb[6].mxu1  ;;  %v5556_v27 = vpop.f32.mrb[6].mxu0 }
 0x288   :  { %v1979_v19 = vcombine.high %v1927_v61, %v1927_v61  ;;  %v1986_v46 = vrot.slane %v1927_v61, %v7011_v24  ;;  %v5627_v16 = vpop.f32.mrb[7].mxu1  ;;  %v5557_v12 = vpop.f32.mrb[7].mxu0 }
 0x289   :  { %v5558_v36 = vadd.f32 %v5557_v12, %v5556_v27 }
 0x28a   :  { %v1993_v52 = vrot.slane %v1979_v19, %v7011_v24  ;;  %v1994_v30 = vcombine.high %v1986_v46, %v1986_v46  ;;  %v2074_v3 = vadd.f32 %v7691_v28, %v1986_v46 }
 0x28b   :  { %v1932_v60 = vadd.f32 %v5558_v36, %v1931_v49  ;;  %v1936_v0 = vpop.f32.mrb[8].mxu1  ;;  %v5559_v17 = vpop.f32.mrb[8].mxu0 }
 0x28c   :  { %v1995_v9 = vcombine.high %v1993_v52, %v1993_v52  ;;  %v2075_v51 = vadd.f32 %v7691_v28, %v1994_v30  ;;  %v2076_v55 = vadd.f32 %v7700_v48, %v1993_v52  ;;  %v2092_v22 = vmax.f32 %v2074_v3, 0.0  ;;  %v5630_v50 = vpop.f32.mrb[9].mxu1  ;;  %v5560_v21 = vpop.f32.mrb[9].mxu0 }
 0x28d   :  { %v1996_v54 = vcombine.high %v1932_v60, %v1932_v60  ;;  %v2003_v44 = vrot.slane %v1932_v60, %v7011_v24  ;;  %v5561_v15 = vadd.f32 %v5560_v21, %v5559_v17 }
 0x28e   :  { %v2077_v43 = vadd.f32 %v7695_v18, %v1995_v9  ;;  %v2093_v59 = vmax.f32 %v2075_v51, 0.0  ;;  %v2094_v61 = vmax.f32 %v2076_v55, 0.0  ;;  %v5447_v27 = vrot.slane %v2092_v22, 9 }
 0x28f   :  { %v2010_v49 = vrot.slane %v1996_v54, %v7011_v24  ;;  %v2011_v19 = vcombine.high %v2003_v44, %v2003_v44  ;;  %v2078_v46 = vadd.f32 %v7705_v4, %v2003_v44  ;;  %v1937_v16 = vadd.f32 %v5561_v15, %v1936_v0 }
 0x290   :  { %v2095_v12 = vmax.f32 %v2077_v43, 0.0  ;;  %v5448_v36 = vrot.slane %v2093_v59, 9  ;;  %v5449_v52 = vrot.slane %v2094_v61, 9  ;;  %v2182_v30 = vmax.f32 %v2092_v22, %v5447_v27 }
 0x291   :  { %v2012_v3 = vcombine.high %v2010_v49, %v2010_v49  ;;  %v2079_v50 = vadd.f32 %v7691_v28, %v2011_v19  ;;  %v2080_v60 = vadd.f32 %v7700_v48, %v2010_v49  ;;  %v2096_v17 = vmax.f32 %v2078_v46, 0.0 }
 0x292   :  { %v5450_v9 = vrot.slane %v2095_v12, 9  ;;  %v2183_v51 = vmax.f32 %v2093_v59, %v5448_v36  ;;  %v2184_v55 = vmax.f32 %v2094_v61, %v5449_v52  ;;  %v2331_v21 = vrot.slane %v2182_v30, %v6967_v23 }
 0x293   :  { %v2081_v54 = vadd.f32 %v7695_v18, %v2012_v3  ;;  %v2097_v57 = vmax.f32 %v2079_v50, 0.0  ;;  %v2098_v44 = vmax.f32 %v2080_v60, 0.0  ;;  %v5451_v0 = vrot.slane %v2096_v17, 9 }
 0x294   :  { %v2185_v15 = vmax.f32 %v2095_v12, %v5450_v9  ;;  %v2335_v43 = vrot.slane %v2183_v51, %v6967_v23  ;;  %v2339_v22 = vrot.slane %v2184_v55, %v6967_v23  ;;  %v2019_v27 = vrot.slane %v1937_v16, %v7011_v24 }
 0x295   :  { %v5452_v19 = vrot.slane %v2097_v57, 9  ;;  %v5453_v48 = vrot.slane %v2098_v44, 9  ;;  %v2186_v49 = vmax.f32 %v2096_v17, %v5451_v0  ;;  %v2099_v46 = vmax.f32 %v2081_v54, 0.0 }
 0x296   :  { %v2343_v59 = vrot.slane %v2185_v15, %v6967_v23  ;;  %v2020_v61 = vcombine.high %v2019_v27, %v2019_v27  ;;  %v2082_v36 = vadd.f32 %v7705_v4, %v2019_v27  ;;  %v2375_v18 = vsel %vm1101_vm1, %v2335_v43, %v2331_v21 }
 0x297   :  { %v2187_v52 = vmax.f32 %v2097_v57, %v5452_v19  ;;  %v2347_v12 = vrot.slane %v2186_v49, %v6967_v23  ;;  %v5454_v30 = vrot.slane %v2099_v46, 9  ;;  %v2188_v3 = vmax.f32 %v2098_v44, %v5453_v48  ;;  %v8537_v48 = vld [vmem:[#allocation13_spill] sm:$0xff] }
 0x298   :  { %v2083_v50 = vadd.f32 %v7691_v28, %v2020_v61  ;;  %v2100_v60 = vmax.f32 %v2082_v36, 0.0  ;;  %v2376_v24 = vsel %vm1103_vm2, %v2339_v22, %v2375_v18  ;;  %v6808_v49 = vmov 1966171168   ;;  %v8538_v36 = vld [vmem:[#allocation12_spill] sm:$0xff] }
 0x299   :  { %v2189_v16 = vmax.f32 %v2099_v46, %v5454_v30  ;;  %v2351_v17 = vrot.slane %v2187_v52, %v6967_v23  ;;  %v2355_v9 = vrot.slane %v2188_v3, %v6967_v23  ;;  %v2377_v51 = vsel %vm1105_vm3, %v2343_v59, %v2376_v24  ;;  %v2256_v59 = vld [vmem:[%s8501_s7] sm:$0xf] }
 0x29a   :  { %v2101_v4 = vmax.f32 %v2083_v50, 0.0  ;;  %v5455_v55 = vrot.slane %v2100_v60, 9  ;;  %v2378_v57 = vsel %vm1107_vm5, %v2347_v12, %v2377_v51  ;;  %v2569_v46 = vunpack.c.l.s4 %v6808_v49 }
 0x29b   :  { %v2359_v21 = vrot.slane %v2189_v16, %v6967_v23  ;;  %v2379_v54 = vsel %vm1109_vm4, %v2351_v17, %v2378_v57  ;;  %v2261_v61 = vrot.slane %v2256_v59, %v6967_v23  ;;  %v8539_v18 = vsub.s32 2, %v8538_v36 }
 0x29c   :  { %v2380_v28 = vsel %vm1111_vm6, %v2355_v9, %v2379_v54  ;;  %v5456_v44 = vrot.slane %v2101_v4, 9  ;;  %v2190_v0 = vmax.f32 %v2100_v60, %v5455_v55  ;;  %v2570_v12 = vunpack.c.0.s8 %v2569_v46 }
 0x29d   :  { %v2381_v15 = vsel %vm1113_vm7, %v2359_v21, %v2380_v28  ;;  %v2269_v52 = vrot.slane %v2256_v59, %v8539_v18  ;;  %v8540_v30 = vsub.s32 1, %v8538_v36  ;;  %v8541_v50 = vsub.s32 3, %v8538_v36 }
 0x29e   :  { %2457 = vmatmul.mubr.f32.gmra.mrb[12].mxu1 %v2381_v15  ;;  %2540 = vmatmul.mubr.f32.gmra.mrb[12].mxu0 %v2381_v15  ;;  %v2191_v43 = vmax.f32 %v2101_v4, %v5456_v44  ;;  %v2363_v22 = vrot.slane %v2190_v0, %v6967_v23  ;;  %v7911_v55 = vsub.s32 %v2570_v12, %v8538_v36 }
 0x29f   :  { %2462 = vmatprep.mubr.f32.mxu1 %v8535_v29  ;;  %2545 = vmatprep.mubr.f32.mxu0 %v8535_v29  ;;  %v2265_v3 = vrot.slane %v2256_v59, %v8540_v30  ;;  %v2273_v60 = vrot.slane %v2256_v59, %v8541_v50 }
 0x2a0   :  { %v2367_v27 = vrot.slane %v2191_v43, %v6967_v23 }
 0x2a2   :  { %v2382_v19 = vsel %vm1101_vm1, %v2367_v27, %v2363_v22 }
 0x2a3   :  { %2463 = vmatmul.mubr.f32.gmra.mrb[14].mxu1 %v2382_v19  ;;  %2546 = vmatmul.mubr.f32.gmra.mrb[14].mxu0 %v2382_v19 }
 0x2a4   :  { %2878 = vmatprep.mubr.f32.mxu1 %v8535_v29  ;;  %2949 = vmatprep.mubr.f32.mxu0 %v8535_v29 }
 0x2a7   :  { %2879 = vmatmul.mubr.f32.vlgmr.msra.gmra.mrb[16].mxu1 %v8535_v29  ;;  %2950 = vmatmul.mubr.f32.vlgmr.msra.gmra.mrb[16].mxu0 %v8535_v29 }
 0x2a8   :  { %5858 = vmatpush1.bf16.msra.mxu1 %v7731_v56  ;;  %5890 = vmatpush1.bf16.msra.mxu0 %v7733_v31 }
 0x2a9   :  { %5860 = vmatprep.subr.bf16.mxu1 %v7736_v14  ;;  %5892 = vmatprep.subr.bf16.mxu0 %v7738_v25 }
 0x2aa   :  { %3140 = vmatprep.mubr.f32.mxu1 %v8535_v29  ;;  %3211 = vmatprep.mubr.f32.mxu0 %v8535_v29 }
 0x2ac   :  { %5862 = vmatpush1.bf16.msra.mxu1 %v7743_v35  ;;  %5894 = vmatpush1.bf16.msra.mxu0 %v7745_v11 }
 0x2ad   :  { %5864 = vmatprep.subr.bf16.mxu1 %v7749_v26  ;;  %5896 = vmatprep.subr.bf16.mxu0 %v7751_v33 }
 0x2b0   :  { %5866 = vmatpush1.bf16.msra.mxu1 %v7757_v38  ;;  %5898 = vmatpush1.bf16.msra.mxu0 %v7759_v34 }
 0x2b1   :  { %5868 = vmatprep.subr.bf16.mxu1 %v7763_v5  ;;  %5900 = vmatprep.subr.bf16.mxu0 %v7765_v8 }
 0x2b4   :  { %5870 = vmatpush1.bf16.msra.mxu1 %v7769_v53  ;;  %5902 = vmatpush1.bf16.msra.mxu0 %v7771_v2 }
 0x2b5   :  { %5872 = vmatprep.subr.bf16.mxu1 %v7775_v47  ;;  %5904 = vmatprep.subr.bf16.mxu0 %v7777_v32 }
 0x2b8   :  { %5874 = vmatpush1.bf16.msra.mxu1 %v7781_v58  ;;  %5906 = vmatpush1.bf16.msra.mxu0 %v7783_v10 }
 0x2b9   :  { %5876 = vmatprep.subr.bf16.mxu1 %v7787_v63  ;;  %5908 = vmatprep.subr.bf16.mxu0 %v7789_v41 }
 0x2bc   :  { %5878 = vmatpush1.bf16.msra.mxu1 %v7793_v42  ;;  %5910 = vmatpush1.bf16.msra.mxu0 %v7795_v37 }
 0x2bd   :  { %5880 = vmatprep.subr.bf16.mxu1 %v7799_v13  ;;  %5912 = vmatprep.subr.bf16.mxu0 %v7801_v39 }
 0x2c0   :  { %5882 = vmatpush1.bf16.msra.mxu1 %v7805_v45  ;;  %5914 = vmatpush1.bf16.msra.mxu0 %v7807_v40 }
 0x2c1   :  { %5884 = vmatprep.subr.bf16.mxu1 %v7811_v20  ;;  %5916 = vmatprep.subr.bf16.mxu0 %v7813_v7 }
 0x2c4   :  { %5886 = vmatpush1.bf16.msra.mxu1 %v7817_v6  ;;  %5918 = vmatpush1.bf16.msra.mxu0 %v7819_v62 }
 0x2c5   :  { %5920 = vmatprep.subr.bf16.mxu1 %v7681_v1  ;;  %5952 = vmatprep.subr.bf16.mxu0 %v8537_v48 }
 0x334   :  { %v2452_v24 = vpop.f32.mrb[10].mxu1  ;;  %v2535_v16 = vpop.f32.mrb[10].mxu0 }
 0x335   :  { %v2453_v17 = vadd.f32 %v2452_v24, %v2261_v61  ;;  %v2536_v9 = vadd.f32 %v2535_v16, %v2269_v52  ;;  %v2454_v51 = vpop.f32.mrb[11].mxu1  ;;  %v2537_v4 = vpop.f32.mrb[11].mxu0 }
 0x336   :  { %v2455_v23 = vadd.f32 %v2454_v51, %v2265_v3  ;;  %v2538_v57 = vadd.f32 %v2537_v4, %v2273_v60 }
 0x338   :  { %v2564_v21 = vcombine.low %v2453_v17, %v2455_v23  ;;  %v2565_v54 = vcombine.high %v2453_v17, %v2455_v23  ;;  %v2566_v28 = vcombine.low %v2536_v9, %v2538_v57  ;;  %v2567_v44 = vcombine.high %v2536_v9, %v2538_v57 }
 0x33a   :  { %v7914_v0 = vrot.slane %v2564_v21, %v7911_v55  ;;  %v7917_v15 = vrot.slane %v2565_v54, %v7911_v55  ;;  %v7920_v43 = vrot.slane %v2566_v28, %v7911_v55  ;;  %v7923_v22 = vrot.slane %v2567_v44, %v7911_v55 }
 0x33c   :  { %v2596_v27 = vcombine.low %v7914_v0, %v7920_v43 }
 0x371   :  { %v2458_v59 = vpop.f32.mrb[12].mxu1  ;;  %v2541_v36 = vpop.f32.mrb[12].mxu0 }
 0x372   :  { %v2459_v18 = vadd.f32 %v2458_v59, %v2261_v61  ;;  %v2542_v12 = vadd.f32 %v2541_v36, %v2269_v52  ;;  %v2460_v30 = vpop.f32.mrb[13].mxu1  ;;  %v2543_v50 = vpop.f32.mrb[13].mxu0 }
 0x373   :  { %v2461_v24 = vadd.f32 %v2460_v30, %v2265_v3  ;;  %v2544_v16 = vadd.f32 %v2543_v50, %v2273_v60 }
 0x375   :  { %v2632_v17 = vcombine.low %v2459_v18, %v2461_v24  ;;  %v2633_v9 = vcombine.high %v2459_v18, %v2461_v24  ;;  %v2634_v51 = vcombine.low %v2542_v12, %v2544_v16  ;;  %v2635_v4 = vcombine.high %v2542_v12, %v2544_v16 }
 0x376   :  { %v2464_v23 = vpop.f32.mrb[14].mxu1  ;;  %v2547_v57 = vpop.f32.mrb[14].mxu0 }
 0x377   :  { %v7934_v21 = vrot.slane %v2632_v17, %v7911_v55  ;;  %v7937_v54 = vrot.slane %v2633_v9, %v7911_v55  ;;  %v7940_v28 = vrot.slane %v2634_v51, %v7911_v55  ;;  %v7943_v44 = vrot.slane %v2635_v4, %v7911_v55  ;;  %v2466_v59 = vpop.f32.mrb[15].mxu1  ;;  %v2549_v36 = vpop.f32.mrb[15].mxu0 }
 0x378   :  { %v2465_v30 = vadd.f32 %v2464_v23, %v2261_v61  ;;  %v2548_v18 = vadd.f32 %v2547_v57, %v2269_v52  ;;  %v2467_v50 = vadd.f32 %v2466_v59, %v2265_v3  ;;  %v2550_v12 = vadd.f32 %v2549_v36, %v2273_v60 }
 0x379   :  { %v2665_v16 = vcombine.high %v7934_v21, %v7940_v28 }
 0x37a   :  { %v2700_v51 = vcombine.low %v2465_v30, %v2467_v50  ;;  %v2701_v4 = vcombine.low %v2548_v18, %v2550_v12  ;;  %v2880_v46 = vpop.f32.mrb[16].mxu1  ;;  %v2951_v49 = vpop.f32.mrb[16].mxu0 }
 0x37b   :  { %v2882_v61 = vpop.f32.mrb[17].mxu1  ;;  %v2953_v52 = vpop.f32.mrb[17].mxu0 }
 0x37c   :  { %v7954_v3 = vrot.slane %v2700_v51, %v7911_v55  ;;  %v7957_v60 = vrot.slane %v2701_v4, %v7911_v55  ;;  %v2960_v23 = vcombine.low %v2880_v46, %v2882_v61  ;;  %v2961_v57 = vcombine.low %v2951_v49, %v2953_v52 }
 0x37d   :  { %v7966_v51 = vrot.slane %v2596_v27, %v7911_v55  ;;  %v7969_v4 = vrot.slane %v2665_v16, %v7911_v55 }
 0x37e   :  { %8542 = vst [vmem:[#allocation14_spill] sm:$0xff] %v7954_v3  ;;  %8543 = vst [vmem:[#allocation15_spill] sm:$0xff] %v7957_v60  ;;  %v2968_v30 = vrot.slane %v2960_v23, %v7911_v55  ;;  %v2975_v18 = vrot.slane %v2961_v57, %v7911_v55 }
 0x380   :  { %v2976_v50 = vcombine.low %v2968_v30, %v2975_v18  ;;  %v2977_v12 = vcombine.high %v2968_v30, %v2975_v18 }
 0x382   :  { %v2984_v49 = vrot.slane %v2976_v50, %v7911_v55  ;;  %v2991_v46 = vrot.slane %v2977_v12, %v7911_v55 }
 0x384   :  { %v2994_v61 = vadd.f32 %v2984_v49, %v7966_v51  ;;  %v2995_v52 = vadd.f32 %v2991_v46, %v7969_v4 }
 0x386   :  { %v5457_v36 = vmul.f32 -1.442695, %v2994_v61  ;;  %v5458_v23 = vmul.f32 -1.442695, %v2995_v52  ;;  %v3010_v59 = vrot.slane %v2994_v61, 1  ;;  %v3011_v57 = vrot.slane %v2995_v52, 1 }
 0x387   :  { %v3032_v27 = vrot.slane %v2994_v61, 3  ;;  %v3033_v16 = vrot.slane %v2995_v52, 3  ;;  %v3026_v9 = vrot.slane %v2994_v61, 2  ;;  %v3027_v50 = vrot.slane %v2995_v52, 2 }
 0x388   :  { %6414 = vpow2.f32 %v5457_v36  ;;  %v5459_v30 = vmul.f32 -1.442695, %v3010_v59  ;;  %v5460_v18 = vmul.f32 -1.442695, %v3011_v57 }
 0x389   :  { %6416 = vpow2.f32 %v5458_v23  ;;  %v5461_v17 = vmul.f32 -1.442695, %v3032_v27  ;;  %v5462_v12 = vmul.f32 -1.442695, %v3033_v16 }
 0x38a   :  { %6418 = vpow2.f32 %v5459_v30 }
 0x38b   :  { %6420 = vpow2.f32 %v5460_v18 }
 0x38c   :  { %6422 = vtanh.f32 %v3026_v9 }
 0x38d   :  { %6424 = vtanh.f32 %v3027_v50 }
 0x38e   :  { %6426 = vpow2.f32 %v5461_v17 }
 0x38f   :  { %6428 = vpow2.f32 %v5462_v12 }
 0x392   :  { %v6415_v49 = vpop.eup %6414 }
 0x393   :  { %v6417_v46 = vpop.eup %6416  ;;  %v3002_v19 = vadd.f32 1.0, %v6415_v49 }
 0x394   :  { %v6419_v24 = vpop.eup %6418  ;;  %v3003_v60 = vadd.f32 1.0, %v6417_v46 }
 0x395   :  { %v6421_v59 = vpop.eup %6420  ;;  %6430 = vrcp.f32 %v3002_v19  ;;  %v3020_v36 = vadd.f32 1.0, %v6419_v24 }
 0x396   :  { %6432 = vrcp.f32 %v3003_v60  ;;  %v3021_v23 = vadd.f32 1.0, %v6421_v59  ;;  %v6423_v61 = vpop.eup %6422 }
 0x397   :  { %6434 = vrcp.f32 %v3020_v36  ;;  %v6425_v52 = vpop.eup %6424 }
 0x398   :  { %6436 = vrcp.f32 %v3021_v23  ;;  %v6427_v57 = vpop.eup %6426 }
 0x399   :  { %v6429_v30 = vpop.eup %6428  ;;  %v3042_v27 = vadd.f32 1.0, %v6427_v57 }
 0x39a   :  { %v3043_v50 = vadd.f32 1.0, %v6429_v30 }
 0x39b   :  { %6438 = vrcp.f32 %v3042_v27 }
 0x39c   :  { %6440 = vrcp.f32 %v3043_v50 }
 0x39f   :  { %v6431_v9 = vpop.eup %6430 }
 0x3a0   :  { %v6433_v18 = vpop.eup %6432  ;;  %v3050_v46 = vmul.f32 %v6431_v9, %v6423_v61 }
 0x3a1   :  { %v6435_v16 = vpop.eup %6434  ;;  %v3051_v3 = vmul.f32 %v6433_v18, %v6425_v52 }
 0x3a2   :  { %v6437_v17 = vpop.eup %6436  ;;  %v3048_v49 = vmul.f32 0.0, %v6435_v16 }
 0x3a3   :  { %v3049_v12 = vmul.f32 0.0, %v6437_v17 }
 0x3a4   :  { %v7975_v19 = vadd.f32 %v3050_v46, %v3048_v49  ;;  %v8544_v49 = vcombine.low %v7934_v21, %v7940_v28 }
 0x3a5   :  { %v7977_v24 = vadd.f32 %v3051_v3, %v3049_v12  ;;  %v6439_v60 = vpop.eup %6438 }
 0x3a6   :  { %6442 = vtanh.f32 %v7975_v19  ;;  %v6441_v59 = vpop.eup %6440  ;;  %v8021_v46 = vrot.slane %v8544_v49, %v7911_v55 }
 0x3a7   :  { %6444 = vtanh.f32 %v7977_v24 }
 0x3b0   :  { %v6443_v36 = vpop.eup %6442 }
 0x3b1   :  { %v6445_v23 = vpop.eup %6444  ;;  %v3056_v57 = vmul.f32 %v6443_v36, %v6439_v60 }
 0x3b2   :  { %v3057_v30 = vmul.f32 %v6445_v23, %v6441_v59  ;;  %v8545_v23 = vcombine.high %v7914_v0, %v7920_v43 }
 0x3b4   :  { %v3060_v16 = vcombine.low %v3056_v57, %v3057_v30  ;;  %v8029_v57 = vrot.slane %v8545_v23, %v7911_v55  ;;  %v2696_v30 = vcombine.high %v8021_v46, %v8021_v46 }
 0x3b6   :  { %v3067_v61 = vrot.slane %v3060_v16, %v7911_v55 }
 0x3b8   :  { %v3074_v52 = vrot.slane %v3067_v61, %v7911_v55 }
 0x3ba   :  { %3141 = vmatmul.mubr.f32.vlgmr.msra.gmra.mrb[18].mxu1 %v3074_v52  ;;  %3212 = vmatmul.mubr.f32.vlgmr.msra.gmra.mrb[18].mxu0 %v3074_v52 }
 0x3bb   :  { %5922 = vmatpush1.bf16.msra.mxu1 %v7731_v56  ;;  %5954 = vmatpush1.bf16.msra.mxu0 %v7733_v31 }
 0x3bc   :  { %5924 = vmatprep.subr.bf16.mxu1 %v7736_v14  ;;  %5956 = vmatprep.subr.bf16.mxu0 %v7738_v25 }
 0x3bd   :  { %3402 = vmatprep.mubr.f32.mxu1 %v8535_v29  ;;  %3473 = vmatprep.mubr.f32.mxu0 %v8535_v29 }
 0x3bf   :  { %5926 = vmatpush1.bf16.msra.mxu1 %v7743_v35  ;;  %5958 = vmatpush1.bf16.msra.mxu0 %v7745_v11 }
 0x3c0   :  { %5928 = vmatprep.subr.bf16.mxu1 %v7749_v26  ;;  %5960 = vmatprep.subr.bf16.mxu0 %v7751_v33 }
 0x3c3   :  { %5930 = vmatpush1.bf16.msra.mxu1 %v7757_v38  ;;  %5962 = vmatpush1.bf16.msra.mxu0 %v7759_v34 }
 0x3c4   :  { %5932 = vmatprep.subr.bf16.mxu1 %v7763_v5  ;;  %5964 = vmatprep.subr.bf16.mxu0 %v7765_v8 }
 0x3c7   :  { %5934 = vmatpush1.bf16.msra.mxu1 %v7769_v53  ;;  %5966 = vmatpush1.bf16.msra.mxu0 %v7771_v2 }
 0x3c8   :  { %5936 = vmatprep.subr.bf16.mxu1 %v7775_v47  ;;  %5968 = vmatprep.subr.bf16.mxu0 %v7777_v32 }
 0x3cb   :  { %5938 = vmatpush1.bf16.msra.mxu1 %v7781_v58  ;;  %5970 = vmatpush1.bf16.msra.mxu0 %v7783_v10 }
 0x3cc   :  { %5940 = vmatprep.subr.bf16.mxu1 %v7787_v63  ;;  %5972 = vmatprep.subr.bf16.mxu0 %v7789_v41 }
 0x3cf   :  { %5942 = vmatpush1.bf16.msra.mxu1 %v7793_v42  ;;  %5974 = vmatpush1.bf16.msra.mxu0 %v7795_v37 }
 0x3d0   :  { %5944 = vmatprep.subr.bf16.mxu1 %v7799_v13  ;;  %5976 = vmatprep.subr.bf16.mxu0 %v7801_v39 }
 0x3d3   :  { %5946 = vmatpush1.bf16.msra.mxu1 %v7805_v45  ;;  %5978 = vmatpush1.bf16.msra.mxu0 %v7807_v40 }
 0x3d4   :  { %5948 = vmatprep.subr.bf16.mxu1 %v7811_v20  ;;  %5980 = vmatprep.subr.bf16.mxu0 %v7813_v7 }
 0x3d7   :  { %5950 = vmatpush1.bf16.msra.mxu1 %v7817_v6  ;;  %5982 = vmatpush1.bf16.msra.mxu0 %v7819_v62 }
 0x3d8   :  { %5984 = vmatprep.subr.bf16.mxu1 %v7681_v1  ;;  %6016 = vmatprep.subr.bf16.mxu0 %v8537_v48 }
 0x48d   :  { %v3142_v3 = vpop.f32.mrb[18].mxu1  ;;  %v3213_v9 = vpop.f32.mrb[18].mxu0 }
 0x48e   :  { %v3144_v18 = vpop.f32.mrb[19].mxu1  ;;  %v3215_v27 = vpop.f32.mrb[19].mxu0 }
 0x48f   :  { %v3222_v50 = vcombine.low %v3142_v3, %v3144_v18  ;;  %v3223_v17 = vcombine.low %v3213_v9, %v3215_v27 }
 0x491   :  { %v3230_v12 = vrot.slane %v3222_v50, %v7911_v55  ;;  %v3237_v60 = vrot.slane %v3223_v17, %v7911_v55 }
 0x493   :  { %v3238_v59 = vcombine.low %v3230_v12, %v3237_v60  ;;  %v3239_v36 = vcombine.high %v3230_v12, %v3237_v60 }
 0x495   :  { %v3246_v16 = vrot.slane %v3238_v59, %v7911_v55  ;;  %v3253_v21 = vrot.slane %v3239_v36, %v7911_v55 }
 0x497   :  { %v3256_v28 = vadd.f32 %v3246_v16, %v8029_v57  ;;  %v3257_v61 = vadd.f32 %v3253_v21, %v2696_v30 }
 0x499   :  { %v5463_v52 = vmul.f32 -1.442695, %v3256_v28  ;;  %v5464_v3 = vmul.f32 -1.442695, %v3257_v61  ;;  %v3272_v9 = vrot.slane %v3256_v28, 1  ;;  %v3273_v18 = vrot.slane %v3257_v61, 1 }
 0x49a   :  { %v3294_v0 = vrot.slane %v3256_v28, 3  ;;  %v3295_v43 = vrot.slane %v3257_v61, 3  ;;  %v3288_v17 = vrot.slane %v3256_v28, 2  ;;  %v3289_v49 = vrot.slane %v3257_v61, 2 }
 0x49b   :  { %6446 = vpow2.f32 %v5463_v52  ;;  %v5465_v27 = vmul.f32 -1.442695, %v3272_v9  ;;  %v5466_v50 = vmul.f32 -1.442695, %v3273_v18 }
 0x49c   :  { %6448 = vpow2.f32 %v5464_v3  ;;  %v5467_v12 = vmul.f32 -1.442695, %v3294_v0  ;;  %v5468_v60 = vmul.f32 -1.442695, %v3295_v43 }
 0x49d   :  { %6450 = vpow2.f32 %v5465_v27 }
 0x49e   :  { %6452 = vpow2.f32 %v5466_v50 }
 0x49f   :  { %6454 = vtanh.f32 %v3288_v17 }
 0x4a0   :  { %6456 = vtanh.f32 %v3289_v49 }
 0x4a1   :  { %6458 = vpow2.f32 %v5467_v12 }
 0x4a2   :  { %6460 = vpow2.f32 %v5468_v60 }
 0x4a5   :  { %v6447_v59 = vpop.eup %6446 }
 0x4a6   :  { %v6449_v36 = vpop.eup %6448  ;;  %v3264_v23 = vadd.f32 1.0, %v6447_v59 }
 0x4a7   :  { %v6451_v30 = vpop.eup %6450  ;;  %v3265_v16 = vadd.f32 1.0, %v6449_v36 }
 0x4a8   :  { %v6453_v21 = vpop.eup %6452  ;;  %6462 = vrcp.f32 %v3264_v23  ;;  %v3282_v52 = vadd.f32 1.0, %v6451_v30 }
 0x4a9   :  { %6464 = vrcp.f32 %v3265_v16  ;;  %v3283_v3 = vadd.f32 1.0, %v6453_v21  ;;  %v6455_v28 = vpop.eup %6454 }
 0x4aa   :  { %6466 = vrcp.f32 %v3282_v52  ;;  %v6457_v61 = vpop.eup %6456 }
 0x4ab   :  { %6468 = vrcp.f32 %v3283_v3  ;;  %v6459_v9 = vpop.eup %6458 }
 0x4ac   :  { %v6461_v18 = vpop.eup %6460  ;;  %v3304_v0 = vadd.f32 1.0, %v6459_v9 }
 0x4ad   :  { %v3305_v17 = vadd.f32 1.0, %v6461_v18 }
 0x4ae   :  { %6470 = vrcp.f32 %v3304_v0 }
 0x4af   :  { %6472 = vrcp.f32 %v3305_v17 }
 0x4b2   :  { %v6463_v27 = vpop.eup %6462 }
 0x4b3   :  { %v6465_v50 = vpop.eup %6464  ;;  %v3312_v12 = vmul.f32 %v6463_v27, %v6455_v28 }
 0x4b4   :  { %v6467_v43 = vpop.eup %6466  ;;  %v3313_v59 = vmul.f32 %v6465_v50, %v6457_v61 }
 0x4b5   :  { %v6469_v49 = vpop.eup %6468  ;;  %v3310_v60 = vmul.f32 %v6467_v43, %v7975_v19 }
 0x4b6   :  { %v3311_v36 = vmul.f32 %v6469_v49, %v7977_v24 }
 0x4b7   :  { %v8038_v23 = vadd.f32 %v3312_v12, %v3310_v60 }
 0x4b8   :  { %v8040_v30 = vadd.f32 %v3313_v59, %v3311_v36  ;;  %v6471_v16 = vpop.eup %6470  ;;  %v2628_v36 = vcombine.high %v7966_v51, %v7966_v51 }
 0x4b9   :  { %6474 = vtanh.f32 %v8038_v23  ;;  %v6473_v21 = vpop.eup %6472 }
 0x4ba   :  { %6476 = vtanh.f32 %v8040_v30 }
 0x4c3   :  { %v6475_v52 = vpop.eup %6474 }
 0x4c4   :  { %v6477_v3 = vpop.eup %6476  ;;  %v3318_v28 = vmul.f32 %v6475_v52, %v6471_v16  ;;  %v2698_v16 = vcombine.high %v7969_v4, %v7969_v4 }
 0x4c5   :  { %v3319_v9 = vmul.f32 %v6477_v3, %v6473_v21 }
 0x4c7   :  { %v3322_v19 = vcombine.low %v3318_v28, %v3319_v9 }
 0x4c9   :  { %v3329_v61 = vrot.slane %v3322_v19, %v7911_v55 }
 0x4cb   :  { %v3336_v24 = vrot.slane %v3329_v61, %v7911_v55 }
 0x4cd   :  { %3403 = vmatmul.mubr.f32.vlgmr.msra.gmra.mrb[20].mxu1 %v3336_v24  ;;  %3474 = vmatmul.mubr.f32.vlgmr.msra.gmra.mrb[20].mxu0 %v3336_v24 }
 0x4ce   :  { %5986 = vmatpush1.bf16.msra.mxu1 %v7731_v56  ;;  %6018 = vmatpush1.bf16.msra.mxu0 %v7733_v31 }
 0x4cf   :  { %5988 = vmatprep.subr.bf16.mxu1 %v7736_v14  ;;  %6020 = vmatprep.subr.bf16.mxu0 %v7738_v25 }
 0x4d0   :  { %3664 = vmatprep.mubr.f32.mxu1 %v8535_v29  ;;  %3735 = vmatprep.mubr.f32.mxu0 %v8535_v29 }
 0x4d2   :  { %5990 = vmatpush1.bf16.msra.mxu1 %v7743_v35  ;;  %6022 = vmatpush1.bf16.msra.mxu0 %v7745_v11 }
 0x4d3   :  { %5992 = vmatprep.subr.bf16.mxu1 %v7749_v26  ;;  %6024 = vmatprep.subr.bf16.mxu0 %v7751_v33 }
 0x4d6   :  { %5994 = vmatpush1.bf16.msra.mxu1 %v7757_v38  ;;  %6026 = vmatpush1.bf16.msra.mxu0 %v7759_v34 }
 0x4d7   :  { %5996 = vmatprep.subr.bf16.mxu1 %v7763_v5  ;;  %6028 = vmatprep.subr.bf16.mxu0 %v7765_v8 }
 0x4da   :  { %5998 = vmatpush1.bf16.msra.mxu1 %v7769_v53  ;;  %6030 = vmatpush1.bf16.msra.mxu0 %v7771_v2 }
 0x4db   :  { %6000 = vmatprep.subr.bf16.mxu1 %v7775_v47  ;;  %6032 = vmatprep.subr.bf16.mxu0 %v7777_v32 }
 0x4de   :  { %6002 = vmatpush1.bf16.msra.mxu1 %v7781_v58  ;;  %6034 = vmatpush1.bf16.msra.mxu0 %v7783_v10 }
 0x4df   :  { %6004 = vmatprep.subr.bf16.mxu1 %v7787_v63  ;;  %6036 = vmatprep.subr.bf16.mxu0 %v7789_v41 }
 0x4e2   :  { %6006 = vmatpush1.bf16.msra.mxu1 %v7793_v42  ;;  %6038 = vmatpush1.bf16.msra.mxu0 %v7795_v37 }
 0x4e3   :  { %6008 = vmatprep.subr.bf16.mxu1 %v7799_v13  ;;  %6040 = vmatprep.subr.bf16.mxu0 %v7801_v39 }
 0x4e6   :  { %6010 = vmatpush1.bf16.msra.mxu1 %v7805_v45  ;;  %6042 = vmatpush1.bf16.msra.mxu0 %v7807_v40 }
 0x4e7   :  { %6012 = vmatprep.subr.bf16.mxu1 %v7811_v20  ;;  %6044 = vmatprep.subr.bf16.mxu0 %v7813_v7 }
 0x4ea   :  { %6014 = vmatpush1.bf16.msra.mxu1 %v7817_v6  ;;  %6046 = vmatpush1.bf16.msra.mxu0 %v7819_v62 }
 0x4eb   :  { %6048 = vmatprep.subr.bf16.mxu1 %v7681_v1  ;;  %6080 = vmatprep.subr.bf16.mxu0 %v8537_v48 }
 0x5a0   :  { %v3404_v18 = vpop.f32.mrb[20].mxu1  ;;  %v3475_v27 = vpop.f32.mrb[20].mxu0 }
 0x5a1   :  { %v3406_v50 = vpop.f32.mrb[21].mxu1  ;;  %v3477_v0 = vpop.f32.mrb[21].mxu0 }
 0x5a2   :  { %v3484_v43 = vcombine.low %v3404_v18, %v3406_v50  ;;  %v3485_v17 = vcombine.low %v3475_v27, %v3477_v0 }
 0x5a4   :  { %v3492_v49 = vrot.slane %v3484_v43, %v7911_v55  ;;  %v3499_v12 = vrot.slane %v3485_v17, %v7911_v55 }
 0x5a6   :  { %v3500_v60 = vcombine.low %v3492_v49, %v3499_v12  ;;  %v3501_v59 = vcombine.high %v3492_v49, %v3499_v12 }
 0x5a8   :  { %v3508_v21 = vrot.slane %v3500_v60, %v7911_v55  ;;  %v3515_v52 = vrot.slane %v3501_v59, %v7911_v55 }
 0x5aa   :  { %v3518_v3 = vadd.f32 %v3508_v21, %v2628_v36  ;;  %v3519_v28 = vadd.f32 %v3515_v52, %v2698_v16 }
 0x5ac   :  { %v5469_v9 = vmul.f32 -1.442695, %v3518_v3  ;;  %v5470_v19 = vmul.f32 -1.442695, %v3519_v28  ;;  %v3534_v61 = vrot.slane %v3518_v3, 1  ;;  %v3535_v24 = vrot.slane %v3519_v28, 1 }
 0x5ad   :  { %v3556_v51 = vrot.slane %v3518_v3, 3  ;;  %v3557_v50 = vrot.slane %v3519_v28, 3  ;;  %v3550_v0 = vrot.slane %v3518_v3, 2  ;;  %v3551_v4 = vrot.slane %v3519_v28, 2 }
 0x5ae   :  { %6478 = vpow2.f32 %v5469_v9  ;;  %v5471_v18 = vmul.f32 -1.442695, %v3534_v61  ;;  %v5472_v27 = vmul.f32 -1.442695, %v3535_v24 }
 0x5af   :  { %6480 = vpow2.f32 %v5470_v19  ;;  %v5473_v43 = vmul.f32 -1.442695, %v3556_v51  ;;  %v5474_v17 = vmul.f32 -1.442695, %v3557_v50 }
 0x5b0   :  { %6482 = vpow2.f32 %v5471_v18 }
 0x5b1   :  { %6484 = vpow2.f32 %v5472_v27 }
 0x5b2   :  { %6486 = vtanh.f32 %v3550_v0 }
 0x5b3   :  { %6488 = vtanh.f32 %v3551_v4 }
 0x5b4   :  { %6490 = vpow2.f32 %v5473_v43 }
 0x5b5   :  { %6492 = vpow2.f32 %v5474_v17 }
 0x5b8   :  { %v6479_v49 = vpop.eup %6478 }
 0x5b9   :  { %v6481_v12 = vpop.eup %6480  ;;  %v3526_v60 = vadd.f32 1.0, %v6479_v49 }
 0x5ba   :  { %v6483_v59 = vpop.eup %6482  ;;  %v3527_v36 = vadd.f32 1.0, %v6481_v12 }
 0x5bb   :  { %v6485_v16 = vpop.eup %6484  ;;  %6494 = vrcp.f32 %v3526_v60  ;;  %v3544_v21 = vadd.f32 1.0, %v6483_v59 }
 0x5bc   :  { %6496 = vrcp.f32 %v3527_v36  ;;  %v3545_v52 = vadd.f32 1.0, %v6485_v16  ;;  %v6487_v3 = vpop.eup %6486 }
 0x5bd   :  { %6498 = vrcp.f32 %v3544_v21  ;;  %v6489_v28 = vpop.eup %6488 }
 0x5be   :  { %6500 = vrcp.f32 %v3545_v52  ;;  %v6491_v9 = vpop.eup %6490 }
 0x5bf   :  { %v6493_v19 = vpop.eup %6492  ;;  %v3566_v18 = vadd.f32 1.0, %v6491_v9 }
 0x5c0   :  { %v3567_v51 = vadd.f32 1.0, %v6493_v19 }
 0x5c1   :  { %6502 = vrcp.f32 %v3566_v18 }
 0x5c2   :  { %6504 = vrcp.f32 %v3567_v51 }
 0x5c5   :  { %v6495_v61 = vpop.eup %6494 }
 0x5c6   :  { %v6497_v24 = vpop.eup %6496  ;;  %v3574_v0 = vmul.f32 %v6495_v61, %v6487_v3 }
 0x5c7   :  { %v6499_v27 = vpop.eup %6498  ;;  %v3575_v43 = vmul.f32 %v6497_v24, %v6489_v28 }
 0x5c8   :  { %v6501_v50 = vpop.eup %6500  ;;  %v3572_v4 = vmul.f32 %v6499_v27, %v8038_v23 }
 0x5c9   :  { %v3573_v17 = vmul.f32 %v6501_v50, %v8040_v30 }
 0x5ca   :  { %v8090_v49 = vadd.f32 %v3574_v0, %v3572_v4  ;;  %v8546_v4 = vcombine.low %v7937_v54, %v7943_v44 }
 0x5cb   :  { %v8092_v12 = vadd.f32 %v3575_v43, %v3573_v17  ;;  %v6503_v60 = vpop.eup %6502  ;;  %v2630_v17 = vcombine.high %v8029_v57, %v8029_v57 }
 0x5cc   :  { %6506 = vtanh.f32 %v8090_v49  ;;  %v6505_v59 = vpop.eup %6504  ;;  %v8138_v43 = vrot.slane %v8546_v4, %v7911_v55 }
 0x5cd   :  { %6508 = vtanh.f32 %v8092_v12 }
 0x5d6   :  { %v6507_v36 = vpop.eup %6506 }
 0x5d7   :  { %v6509_v16 = vpop.eup %6508  ;;  %v3580_v21 = vmul.f32 %v6507_v36, %v6503_v60 }
 0x5d8   :  { %v3581_v52 = vmul.f32 %v6509_v16, %v6505_v59 }
 0x5da   :  { %v3584_v23 = vcombine.low %v3580_v21, %v3581_v52 }
 0x5dc   :  { %v3591_v3 = vrot.slane %v3584_v23, %v7911_v55 }
 0x5de   :  { %v3598_v30 = vrot.slane %v3591_v3, %v7911_v55 }
 0x5e0   :  { %3665 = vmatmul.mubr.f32.vlgmr.msra.gmra.mrb[22].mxu1 %v3598_v30  ;;  %3736 = vmatmul.mubr.f32.vlgmr.msra.gmra.mrb[22].mxu0 %v3598_v30 }
 0x5e1   :  { %6050 = vmatpush1.bf16.msra.mxu1 %v7731_v56  ;;  %6082 = vmatpush1.bf16.msra.mxu0 %v7733_v31 }
 0x5e2   :  { %6052 = vmatprep.subr.bf16.mxu1 %v7736_v14  ;;  %6084 = vmatprep.subr.bf16.mxu0 %v7738_v25 }
 0x5e3   :  { %3926 = vmatprep.mubr.f32.mxu1 %v8535_v29  ;;  %3997 = vmatprep.mubr.f32.mxu0 %v8535_v29 }
 0x5e5   :  { %6054 = vmatpush1.bf16.msra.mxu1 %v7743_v35  ;;  %6086 = vmatpush1.bf16.msra.mxu0 %v7745_v11 }
 0x5e6   :  { %6056 = vmatprep.subr.bf16.mxu1 %v7749_v26  ;;  %6088 = vmatprep.subr.bf16.mxu0 %v7751_v33 }
 0x5e9   :  { %6058 = vmatpush1.bf16.msra.mxu1 %v7757_v38  ;;  %6090 = vmatpush1.bf16.msra.mxu0 %v7759_v34 }
 0x5ea   :  { %6060 = vmatprep.subr.bf16.mxu1 %v7763_v5  ;;  %6092 = vmatprep.subr.bf16.mxu0 %v7765_v8 }
 0x5ed   :  { %6062 = vmatpush1.bf16.msra.mxu1 %v7769_v53  ;;  %6094 = vmatpush1.bf16.msra.mxu0 %v7771_v2 }
 0x5ee   :  { %6064 = vmatprep.subr.bf16.mxu1 %v7775_v47  ;;  %6096 = vmatprep.subr.bf16.mxu0 %v7777_v32 }
 0x5f1   :  { %6066 = vmatpush1.bf16.msra.mxu1 %v7781_v58  ;;  %6098 = vmatpush1.bf16.msra.mxu0 %v7783_v10 }
 0x5f2   :  { %6068 = vmatprep.subr.bf16.mxu1 %v7787_v63  ;;  %6100 = vmatprep.subr.bf16.mxu0 %v7789_v41 }
 0x5f5   :  { %6070 = vmatpush1.bf16.msra.mxu1 %v7793_v42  ;;  %6102 = vmatpush1.bf16.msra.mxu0 %v7795_v37 }
 0x5f6   :  { %6072 = vmatprep.subr.bf16.mxu1 %v7799_v13  ;;  %6104 = vmatprep.subr.bf16.mxu0 %v7801_v39 }
 0x5f9   :  { %6074 = vmatpush1.bf16.msra.mxu1 %v7805_v45  ;;  %6106 = vmatpush1.bf16.msra.mxu0 %v7807_v40 }
 0x5fa   :  { %6076 = vmatprep.subr.bf16.mxu1 %v7811_v20  ;;  %6108 = vmatprep.subr.bf16.mxu0 %v7813_v7 }
 0x5fd   :  { %6078 = vmatpush1.bf16.msra.mxu1 %v7817_v6  ;;  %6110 = vmatpush1.bf16.msra.mxu0 %v7819_v62 }
 0x5fe   :  { %6112 = vmatprep.subr.bf16.mxu1 %v7681_v1  ;;  %6144 = vmatprep.subr.bf16.mxu0 %v8537_v48 }
 0x6b3   :  { %v3666_v28 = vpop.f32.mrb[22].mxu1  ;;  %v3737_v9 = vpop.f32.mrb[22].mxu0 }
 0x6b4   :  { %v3668_v19 = vpop.f32.mrb[23].mxu1  ;;  %v3739_v61 = vpop.f32.mrb[23].mxu0 }
 0x6b5   :  { %v3746_v24 = vcombine.low %v3666_v28, %v3668_v19  ;;  %v3747_v18 = vcombine.low %v3737_v9, %v3739_v61 }
 0x6b7   :  { %v3754_v27 = vrot.slane %v3746_v24, %v7911_v55  ;;  %v3761_v51 = vrot.slane %v3747_v18, %v7911_v55 }
 0x6b9   :  { %v3762_v50 = vcombine.low %v3754_v27, %v3761_v51  ;;  %v3763_v0 = vcombine.high %v3754_v27, %v3761_v51 }
 0x6bb   :  { %v3770_v60 = vrot.slane %v3762_v50, %v7911_v55  ;;  %v3777_v59 = vrot.slane %v3763_v0, %v7911_v55 }
 0x6bd   :  { %v3780_v36 = vadd.f32 %v3770_v60, %v2630_v17  ;;  %v3781_v16 = vadd.f32 %v3777_v59, %v8138_v43 }
 0x6bf   :  { %v5475_v21 = vmul.f32 -1.442695, %v3780_v36  ;;  %v5476_v52 = vmul.f32 -1.442695, %v3781_v16  ;;  %v3796_v23 = vrot.slane %v3780_v36, 1  ;;  %v3797_v3 = vrot.slane %v3781_v16, 1 }
 0x6c0   :  { %v3818_v9 = vrot.slane %v3780_v36, 3  ;;  %v3819_v19 = vrot.slane %v3781_v16, 3  ;;  %v3812_v57 = vrot.slane %v3780_v36, 2  ;;  %v3813_v61 = vrot.slane %v3781_v16, 2 }
 0x6c1   :  { %6510 = vpow2.f32 %v5475_v21  ;;  %v5477_v30 = vmul.f32 -1.442695, %v3796_v23  ;;  %v5478_v28 = vmul.f32 -1.442695, %v3797_v3 }
 0x6c2   :  { %6512 = vpow2.f32 %v5476_v52  ;;  %v5479_v24 = vmul.f32 -1.442695, %v3818_v9  ;;  %v5480_v18 = vmul.f32 -1.442695, %v3819_v19 }
 0x6c3   :  { %6514 = vpow2.f32 %v5477_v30 }
 0x6c4   :  { %6516 = vpow2.f32 %v5478_v28 }
 0x6c5   :  { %6518 = vtanh.f32 %v3812_v57 }
 0x6c6   :  { %6520 = vtanh.f32 %v3813_v61 }
 0x6c7   :  { %6522 = vpow2.f32 %v5479_v24 }
 0x6c8   :  { %6524 = vpow2.f32 %v5480_v18 }
 0x6cb   :  { %v6511_v27 = vpop.eup %6510 }
 0x6cc   :  { %v6513_v51 = vpop.eup %6512  ;;  %v3788_v50 = vadd.f32 1.0, %v6511_v27 }
 0x6cd   :  { %v6515_v0 = vpop.eup %6514  ;;  %v3789_v4 = vadd.f32 1.0, %v6513_v51 }
 0x6ce   :  { %v6517_v17 = vpop.eup %6516  ;;  %6526 = vrcp.f32 %v3788_v50  ;;  %v3806_v60 = vadd.f32 1.0, %v6515_v0 }
 0x6cf   :  { %6528 = vrcp.f32 %v3789_v4  ;;  %v3807_v59 = vadd.f32 1.0, %v6517_v17  ;;  %v6519_v36 = vpop.eup %6518 }
 0x6d0   :  { %6530 = vrcp.f32 %v3806_v60  ;;  %v6521_v16 = vpop.eup %6520 }
 0x6d1   :  { %6532 = vrcp.f32 %v3807_v59  ;;  %v6523_v21 = vpop.eup %6522 }
 0x6d2   :  { %v6525_v52 = vpop.eup %6524  ;;  %v3828_v30 = vadd.f32 1.0, %v6523_v21 }
 0x6d3   :  { %v3829_v9 = vadd.f32 1.0, %v6525_v52 }
 0x6d4   :  { %6534 = vrcp.f32 %v3828_v30 }
 0x6d5   :  { %6536 = vrcp.f32 %v3829_v9 }
 0x6d8   :  { %v6527_v23 = vpop.eup %6526 }
 0x6d9   :  { %v6529_v3 = vpop.eup %6528  ;;  %v3836_v57 = vmul.f32 %v6527_v23, %v6519_v36 }
 0x6da   :  { %v6531_v28 = vpop.eup %6530  ;;  %v3837_v24 = vmul.f32 %v6529_v3, %v6521_v16 }
 0x6db   :  { %v6533_v19 = vpop.eup %6532  ;;  %v3834_v61 = vmul.f32 %v6531_v28, %v8090_v49 }
 0x6dc   :  { %v3835_v18 = vmul.f32 %v6533_v19, %v8092_v12 }
 0x6dd   :  { %v8147_v27 = vadd.f32 %v3836_v57, %v3834_v61  ;;  %v8547_v61 = vcombine.low %v7917_v15, %v7923_v22 }
 0x6de   :  { %v8149_v51 = vadd.f32 %v3837_v24, %v3835_v18  ;;  %v6535_v50 = vpop.eup %6534  ;;  %v8548_v18 = vcombine.high %v7937_v54, %v7943_v44 }
 0x6df   :  { %6538 = vtanh.f32 %v8147_v27  ;;  %v6537_v0 = vpop.eup %6536  ;;  %v8195_v24 = vrot.slane %v8547_v61, %v7911_v55 }
 0x6e0   :  { %6540 = vtanh.f32 %v8149_v51 }
 0x6e9   :  { %v6539_v4 = vpop.eup %6538 }
 0x6ea   :  { %v6541_v17 = vpop.eup %6540  ;;  %v3842_v60 = vmul.f32 %v6539_v4, %v6535_v50  ;;  %v8201_v50 = vrot.slane %v8548_v18, %v7911_v55 }
 0x6eb   :  { %v3843_v59 = vmul.f32 %v6541_v17, %v6537_v0 }
 0x6ed   :  { %v3846_v49 = vcombine.low %v3842_v60, %v3843_v59 }
 0x6ef   :  { %v3853_v36 = vrot.slane %v3846_v49, %v7911_v55 }
 0x6f1   :  { %v3860_v12 = vrot.slane %v3853_v36, %v7911_v55 }
 0x6f3   :  { %3927 = vmatmul.mubr.f32.vlgmr.msra.gmra.mrb[24].mxu1 %v3860_v12  ;;  %3998 = vmatmul.mubr.f32.vlgmr.msra.gmra.mrb[24].mxu0 %v3860_v12 }
 0x6f4   :  { %6114 = vmatpush1.bf16.msra.mxu1 %v7731_v56  ;;  %6146 = vmatpush1.bf16.msra.mxu0 %v7733_v31 }
 0x6f5   :  { %6116 = vmatprep.subr.bf16.mxu1 %v7736_v14  ;;  %6148 = vmatprep.subr.bf16.mxu0 %v7738_v25 }
 0x6f6   :  { %4188 = vmatprep.mubr.f32.mxu1 %v8535_v29  ;;  %4259 = vmatprep.mubr.f32.mxu0 %v8535_v29 }
 0x6f8   :  { %6118 = vmatpush1.bf16.msra.mxu1 %v7743_v35  ;;  %6150 = vmatpush1.bf16.msra.mxu0 %v7745_v11 }
 0x6f9   :  { %6120 = vmatprep.subr.bf16.mxu1 %v7749_v26  ;;  %6152 = vmatprep.subr.bf16.mxu0 %v7751_v33 }
 0x6fc   :  { %6122 = vmatpush1.bf16.msra.mxu1 %v7757_v38  ;;  %6154 = vmatpush1.bf16.msra.mxu0 %v7759_v34 }
 0x6fd   :  { %6124 = vmatprep.subr.bf16.mxu1 %v7763_v5  ;;  %6156 = vmatprep.subr.bf16.mxu0 %v7765_v8 }
 0x700   :  { %6126 = vmatpush1.bf16.msra.mxu1 %v7769_v53  ;;  %6158 = vmatpush1.bf16.msra.mxu0 %v7771_v2 }
 0x701   :  { %6128 = vmatprep.subr.bf16.mxu1 %v7775_v47  ;;  %6160 = vmatprep.subr.bf16.mxu0 %v7777_v32 }
 0x704   :  { %6130 = vmatpush1.bf16.msra.mxu1 %v7781_v58  ;;  %6162 = vmatpush1.bf16.msra.mxu0 %v7783_v10 }
 0x705   :  { %6132 = vmatprep.subr.bf16.mxu1 %v7787_v63  ;;  %6164 = vmatprep.subr.bf16.mxu0 %v7789_v41 }
 0x708   :  { %6134 = vmatpush1.bf16.msra.mxu1 %v7793_v42  ;;  %6166 = vmatpush1.bf16.msra.mxu0 %v7795_v37 }
 0x709   :  { %6136 = vmatprep.subr.bf16.mxu1 %v7799_v13  ;;  %6168 = vmatprep.subr.bf16.mxu0 %v7801_v39 }
 0x70c   :  { %6138 = vmatpush1.bf16.msra.mxu1 %v7805_v45  ;;  %6170 = vmatpush1.bf16.msra.mxu0 %v7807_v40 }
 0x70d   :  { %6140 = vmatprep.subr.bf16.mxu1 %v7811_v20  ;;  %6172 = vmatprep.subr.bf16.mxu0 %v7813_v7 }
 0x710   :  { %6142 = vmatpush1.bf16.msra.mxu1 %v7817_v6  ;;  %6174 = vmatpush1.bf16.msra.mxu0 %v7819_v62 }
 0x711   :  { %6176 = vmatprep.subr.bf16.mxu1 %v7681_v1  ;;  %6208 = vmatprep.subr.bf16.mxu0 %v8537_v48 }
 0x7c6   :  { %v3928_v16 = vpop.f32.mrb[24].mxu1  ;;  %v3999_v21 = vpop.f32.mrb[24].mxu0 }
 0x7c7   :  { %v3930_v52 = vpop.f32.mrb[25].mxu1  ;;  %v4001_v23 = vpop.f32.mrb[25].mxu0 }
 0x7c8   :  { %v4008_v3 = vcombine.low %v3928_v16, %v3930_v52  ;;  %v4009_v30 = vcombine.low %v3999_v21, %v4001_v23 }
 0x7ca   :  { %v4016_v28 = vrot.slane %v4008_v3, %v7911_v55  ;;  %v4023_v9 = vrot.slane %v4009_v30, %v7911_v55 }
 0x7cc   :  { %v4024_v19 = vcombine.low %v4016_v28, %v4023_v9  ;;  %v4025_v57 = vcombine.high %v4016_v28, %v4023_v9 }
 0x7ce   :  { %v4032_v0 = vrot.slane %v4024_v19, %v7911_v55  ;;  %v4039_v4 = vrot.slane %v4025_v57, %v7911_v55 }
 0x7d0   :  { %v4042_v17 = vadd.f32 %v4032_v0, %v8195_v24  ;;  %v4043_v60 = vadd.f32 %v4039_v4, %v8201_v50 }
 0x7d2   :  { %v5481_v59 = vmul.f32 -1.442695, %v4042_v17  ;;  %v5482_v49 = vmul.f32 -1.442695, %v4043_v60  ;;  %v4058_v36 = vrot.slane %v4042_v17, 1  ;;  %v4059_v12 = vrot.slane %v4043_v60, 1 }
 0x7d3   :  { %v4080_v54 = vrot.slane %v4042_v17, 3  ;;  %v4081_v44 = vrot.slane %v4043_v60, 3  ;;  %v4074_v52 = vrot.slane %v4042_v17, 2  ;;  %v4075_v23 = vrot.slane %v4043_v60, 2 }
 0x7d4   :  { %6542 = vpow2.f32 %v5481_v59  ;;  %v5483_v16 = vmul.f32 -1.442695, %v4058_v36  ;;  %v5484_v21 = vmul.f32 -1.442695, %v4059_v12 }
 0x7d5   :  { %6544 = vpow2.f32 %v5482_v49  ;;  %v5485_v3 = vmul.f32 -1.442695, %v4080_v54  ;;  %v5486_v30 = vmul.f32 -1.442695, %v4081_v44 }
 0x7d6   :  { %6546 = vpow2.f32 %v5483_v16 }
 0x7d7   :  { %6548 = vpow2.f32 %v5484_v21 }
 0x7d8   :  { %6550 = vtanh.f32 %v4074_v52 }
 0x7d9   :  { %6552 = vtanh.f32 %v4075_v23 }
 0x7da   :  { %6554 = vpow2.f32 %v5485_v3 }
 0x7db   :  { %6556 = vpow2.f32 %v5486_v30 }
 0x7de   :  { %v6543_v28 = vpop.eup %6542 }
 0x7df   :  { %v6545_v9 = vpop.eup %6544  ;;  %v4050_v19 = vadd.f32 1.0, %v6543_v28 }
 0x7e0   :  { %v6547_v57 = vpop.eup %6546  ;;  %v4051_v61 = vadd.f32 1.0, %v6545_v9 }
 0x7e1   :  { %v6549_v18 = vpop.eup %6548  ;;  %6558 = vrcp.f32 %v4050_v19  ;;  %v4068_v0 = vadd.f32 1.0, %v6547_v57 }
 0x7e2   :  { %6560 = vrcp.f32 %v4051_v61  ;;  %v4069_v4 = vadd.f32 1.0, %v6549_v18  ;;  %v6551_v17 = vpop.eup %6550 }
 0x7e3   :  { %6562 = vrcp.f32 %v4068_v0  ;;  %v6553_v60 = vpop.eup %6552 }
 0x7e4   :  { %6564 = vrcp.f32 %v4069_v4  ;;  %v6555_v59 = vpop.eup %6554 }
 0x7e5   :  { %v6557_v49 = vpop.eup %6556  ;;  %v4090_v16 = vadd.f32 1.0, %v6555_v59 }
 0x7e6   :  { %v4091_v54 = vadd.f32 1.0, %v6557_v49 }
 0x7e7   :  { %6566 = vrcp.f32 %v4090_v16 }
 0x7e8   :  { %6568 = vrcp.f32 %v4091_v54 }
 0x7eb   :  { %v6559_v36 = vpop.eup %6558 }
 0x7ec   :  { %v6561_v12 = vpop.eup %6560  ;;  %v4098_v52 = vmul.f32 %v6559_v36, %v6551_v17 }
 0x7ed   :  { %v6563_v21 = vpop.eup %6562  ;;  %v4099_v3 = vmul.f32 %v6561_v12, %v6553_v60 }
 0x7ee   :  { %v6565_v44 = vpop.eup %6564  ;;  %v4096_v23 = vmul.f32 %v6563_v21, %v8147_v27 }
 0x7ef   :  { %v4097_v30 = vmul.f32 %v6565_v44, %v8149_v51 }
 0x7f0   :  { %v8209_v28 = vadd.f32 %v4098_v52, %v4096_v23  ;;  %v8549_v23 = vcombine.high %v7917_v15, %v7923_v22 }
 0x7f1   :  { %v8211_v9 = vadd.f32 %v4099_v3, %v4097_v30  ;;  %v6567_v19 = vpop.eup %6566  ;;  %v2697_v30 = vcombine.high %v8138_v43, %v8138_v43 }
 0x7f2   :  { %6570 = vtanh.f32 %v8209_v28  ;;  %v6569_v57 = vpop.eup %6568  ;;  %v8257_v3 = vrot.slane %v8549_v23, %v7911_v55 }
 0x7f3   :  { %6572 = vtanh.f32 %v8211_v9 }
 0x7fc   :  { %v6571_v61 = vpop.eup %6570 }
 0x7fd   :  { %v6573_v18 = vpop.eup %6572  ;;  %v4104_v0 = vmul.f32 %v6571_v61, %v6567_v19 }
 0x7fe   :  { %v4105_v4 = vmul.f32 %v6573_v18, %v6569_v57 }
 0x800   :  { %v4108_v27 = vcombine.low %v4104_v0, %v4105_v4 }
 0x802   :  { %v4115_v17 = vrot.slane %v4108_v27, %v7911_v55 }
 0x804   :  { %v4122_v51 = vrot.slane %v4115_v17, %v7911_v55 }
 0x806   :  { %4189 = vmatmul.mubr.f32.vlgmr.msra.gmra.mrb[26].mxu1 %v4122_v51  ;;  %4260 = vmatmul.mubr.f32.vlgmr.msra.gmra.mrb[26].mxu0 %v4122_v51 }
 0x807   :  { %6178 = vmatpush1.bf16.msra.mxu1 %v7731_v56  ;;  %6210 = vmatpush1.bf16.msra.mxu0 %v7733_v31 }
 0x808   :  { %6180 = vmatprep.subr.bf16.mxu1 %v7736_v14  ;;  %6212 = vmatprep.subr.bf16.mxu0 %v7738_v25 }
 0x809   :  { %4450 = vmatprep.mubr.f32.mxu1 %v8535_v29  ;;  %4521 = vmatprep.mubr.f32.mxu0 %v8535_v29 }
 0x80b   :  { %6182 = vmatpush1.bf16.msra.mxu1 %v7743_v35  ;;  %6214 = vmatpush1.bf16.msra.mxu0 %v7745_v11 }
 0x80c   :  { %6184 = vmatprep.subr.bf16.mxu1 %v7749_v26  ;;  %6216 = vmatprep.subr.bf16.mxu0 %v7751_v33 }
 0x80f   :  { %6186 = vmatpush1.bf16.msra.mxu1 %v7757_v38  ;;  %6218 = vmatpush1.bf16.msra.mxu0 %v7759_v34 }
 0x810   :  { %6188 = vmatprep.subr.bf16.mxu1 %v7763_v5  ;;  %6220 = vmatprep.subr.bf16.mxu0 %v7765_v8 }
 0x813   :  { %6190 = vmatpush1.bf16.msra.mxu1 %v7769_v53  ;;  %6222 = vmatpush1.bf16.msra.mxu0 %v7771_v2 }
 0x814   :  { %6192 = vmatprep.subr.bf16.mxu1 %v7775_v47  ;;  %6224 = vmatprep.subr.bf16.mxu0 %v7777_v32 }
 0x817   :  { %6194 = vmatpush1.bf16.msra.mxu1 %v7781_v58  ;;  %6226 = vmatpush1.bf16.msra.mxu0 %v7783_v10 }
 0x818   :  { %6196 = vmatprep.subr.bf16.mxu1 %v7787_v63  ;;  %6228 = vmatprep.subr.bf16.mxu0 %v7789_v41 }
 0x81b   :  { %6198 = vmatpush1.bf16.msra.mxu1 %v7793_v42  ;;  %6230 = vmatpush1.bf16.msra.mxu0 %v7795_v37 }
 0x81c   :  { %6200 = vmatprep.subr.bf16.mxu1 %v7799_v13  ;;  %6232 = vmatprep.subr.bf16.mxu0 %v7801_v39 }
 0x81f   :  { %6202 = vmatpush1.bf16.msra.mxu1 %v7805_v45  ;;  %6234 = vmatpush1.bf16.msra.mxu0 %v7807_v40 }
 0x820   :  { %6204 = vmatprep.subr.bf16.mxu1 %v7811_v20  ;;  %6236 = vmatprep.subr.bf16.mxu0 %v7813_v7 }
 0x823   :  { %6206 = vmatpush1.bf16.msra.mxu1 %v7817_v6  ;;  %6238 = vmatpush1.bf16.msra.mxu0 %v7819_v62 }
 0x824   :  { %6240 = vmatprep.subr.bf16.mxu1 %v7681_v1  ;;  %6272 = vmatprep.subr.bf16.mxu0 %v8537_v48 }
 0x8d9   :  { %v4190_v60 = vpop.f32.mrb[26].mxu1  ;;  %v4261_v59 = vpop.f32.mrb[26].mxu0 }
 0x8da   :  { %v4192_v49 = vpop.f32.mrb[27].mxu1  ;;  %v4263_v36 = vpop.f32.mrb[27].mxu0 }
 0x8db   :  { %v4270_v12 = vcombine.low %v4190_v60, %v4192_v49  ;;  %v4271_v16 = vcombine.low %v4261_v59, %v4263_v36 }
 0x8dd   :  { %v4278_v21 = vrot.slane %v4270_v12, %v7911_v55  ;;  %v4285_v54 = vrot.slane %v4271_v16, %v7911_v55 }
 0x8df   :  { %v4286_v44 = vcombine.low %v4278_v21, %v4285_v54  ;;  %v4287_v52 = vcombine.high %v4278_v21, %v4285_v54 }
 0x8e1   :  { %v4294_v19 = vrot.slane %v4286_v44, %v7911_v55  ;;  %v4301_v57 = vrot.slane %v4287_v52, %v7911_v55 }
 0x8e3   :  { %v4304_v61 = vadd.f32 %v4294_v19, %v8257_v3  ;;  %v4305_v18 = vadd.f32 %v4301_v57, %v2697_v30 }
 0x8e5   :  { %v5487_v0 = vmul.f32 -1.442695, %v4304_v61  ;;  %v5488_v4 = vmul.f32 -1.442695, %v4305_v18  ;;  %v4320_v27 = vrot.slane %v4304_v61, 1  ;;  %v4321_v17 = vrot.slane %v4305_v18, 1 }
 0x8e6   :  { %v4342_v15 = vrot.slane %v4304_v61, 3  ;;  %v4343_v22 = vrot.slane %v4305_v18, 3  ;;  %v4336_v43 = vrot.slane %v4304_v61, 2  ;;  %v4337_v59 = vrot.slane %v4305_v18, 2 }
 0x8e7   :  { %6574 = vpow2.f32 %v5487_v0  ;;  %v5489_v51 = vmul.f32 -1.442695, %v4320_v27  ;;  %v5490_v60 = vmul.f32 -1.442695, %v4321_v17 }
 0x8e8   :  { %6576 = vpow2.f32 %v5488_v4  ;;  %v5491_v49 = vmul.f32 -1.442695, %v4342_v15  ;;  %v5492_v36 = vmul.f32 -1.442695, %v4343_v22 }
 0x8e9   :  { %6578 = vpow2.f32 %v5489_v51 }
 0x8ea   :  { %6580 = vpow2.f32 %v5490_v60 }
 0x8eb   :  { %6582 = vtanh.f32 %v4336_v43 }
 0x8ec   :  { %6584 = vtanh.f32 %v4337_v59 }
 0x8ed   :  { %6586 = vpow2.f32 %v5491_v49 }
 0x8ee   :  { %6588 = vpow2.f32 %v5492_v36 }
 0x8f1   :  { %v6575_v12 = vpop.eup %6574 }
 0x8f2   :  { %v6577_v16 = vpop.eup %6576  ;;  %v4312_v21 = vadd.f32 1.0, %v6575_v12 }
 0x8f3   :  { %v6579_v54 = vpop.eup %6578  ;;  %v4313_v44 = vadd.f32 1.0, %v6577_v16 }
 0x8f4   :  { %v6581_v52 = vpop.eup %6580  ;;  %6590 = vrcp.f32 %v4312_v21  ;;  %v4330_v23 = vadd.f32 1.0, %v6579_v54 }
 0x8f5   :  { %6592 = vrcp.f32 %v4313_v44  ;;  %v4331_v30 = vadd.f32 1.0, %v6581_v52  ;;  %v6583_v19 = vpop.eup %6582 }
 0x8f6   :  { %6594 = vrcp.f32 %v4330_v23  ;;  %v6585_v57 = vpop.eup %6584 }
 0x8f7   :  { %6596 = vrcp.f32 %v4331_v30  ;;  %v6587_v61 = vpop.eup %6586 }
 0x8f8   :  { %v6589_v18 = vpop.eup %6588  ;;  %v4352_v27 = vadd.f32 1.0, %v6587_v61 }
 0x8f9   :  { %v4353_v51 = vadd.f32 1.0, %v6589_v18 }
 0x8fa   :  { %6598 = vrcp.f32 %v4352_v27 }
 0x8fb   :  { %6600 = vrcp.f32 %v4353_v51 }
 0x8fe   :  { %v6591_v0 = vpop.eup %6590 }
 0x8ff   :  { %v6593_v4 = vpop.eup %6592  ;;  %v4360_v15 = vmul.f32 %v6591_v0, %v6583_v19 }
 0x900   :  { %v6595_v17 = vpop.eup %6594  ;;  %v4361_v43 = vmul.f32 %v6593_v4, %v6585_v57 }
 0x901   :  { %v6597_v60 = vpop.eup %6596  ;;  %v4358_v22 = vmul.f32 %v6595_v17, %v8209_v28 }
 0x902   :  { %v4359_v59 = vmul.f32 %v6597_v60, %v8211_v9  ;;  %v2629_v60 = vcombine.high %v8195_v24, %v8195_v24 }
 0x903   :  { %v8266_v49 = vadd.f32 %v4360_v15, %v4358_v22 }
 0x904   :  { %v8268_v36 = vadd.f32 %v4361_v43, %v4359_v59  ;;  %v6599_v12 = vpop.eup %6598 }
 0x905   :  { %6602 = vtanh.f32 %v8266_v49  ;;  %v6601_v16 = vpop.eup %6600 }
 0x906   :  { %6604 = vtanh.f32 %v8268_v36 }
 0x90f   :  { %v6603_v21 = vpop.eup %6602 }
 0x910   :  { %v6605_v54 = vpop.eup %6604  ;;  %v4366_v44 = vmul.f32 %v6603_v21, %v6599_v12 }
 0x911   :  { %v4367_v52 = vmul.f32 %v6605_v54, %v6601_v16 }
 0x913   :  { %v4370_v28 = vcombine.low %v4366_v44, %v4367_v52 }
 0x915   :  { %v4377_v23 = vrot.slane %v4370_v28, %v7911_v55 }
 0x917   :  { %v4384_v9 = vrot.slane %v4377_v23, %v7911_v55 }
 0x919   :  { %4451 = vmatmul.mubr.f32.vlgmr.msra.gmra.mrb[28].mxu1 %v4384_v9  ;;  %4522 = vmatmul.mubr.f32.vlgmr.msra.gmra.mrb[28].mxu0 %v4384_v9 }
 0x91a   :  { %6242 = vmatpush1.bf16.msra.mxu1 %v7731_v56  ;;  %6274 = vmatpush1.bf16.msra.mxu0 %v7733_v31 }
 0x91b   :  { %6244 = vmatprep.subr.bf16.mxu1 %v7736_v14  ;;  %6276 = vmatprep.subr.bf16.mxu0 %v7738_v25 }
 0x91c   :  { %4712 = vmatprep.mubr.f32.mxu1 %v8535_v29  ;;  %4783 = vmatprep.mubr.f32.mxu0 %v8535_v29 }
 0x91e   :  { %6246 = vmatpush1.bf16.msra.mxu1 %v7743_v35  ;;  %6278 = vmatpush1.bf16.msra.mxu0 %v7745_v11 }
 0x91f   :  { %6248 = vmatprep.subr.bf16.mxu1 %v7749_v26  ;;  %6280 = vmatprep.subr.bf16.mxu0 %v7751_v33 }
 0x922   :  { %6250 = vmatpush1.bf16.msra.mxu1 %v7757_v38  ;;  %6282 = vmatpush1.bf16.msra.mxu0 %v7759_v34 }
 0x923   :  { %6252 = vmatprep.subr.bf16.mxu1 %v7763_v5  ;;  %6284 = vmatprep.subr.bf16.mxu0 %v7765_v8 }
 0x926   :  { %6254 = vmatpush1.bf16.msra.mxu1 %v7769_v53  ;;  %6286 = vmatpush1.bf16.msra.mxu0 %v7771_v2 }
 0x927   :  { %6256 = vmatprep.subr.bf16.mxu1 %v7775_v47  ;;  %6288 = vmatprep.subr.bf16.mxu0 %v7777_v32 }
 0x92a   :  { %6258 = vmatpush1.bf16.msra.mxu1 %v7781_v58  ;;  %6290 = vmatpush1.bf16.msra.mxu0 %v7783_v10 }
 0x92b   :  { %6260 = vmatprep.subr.bf16.mxu1 %v7787_v63  ;;  %6292 = vmatprep.subr.bf16.mxu0 %v7789_v41 }
 0x92e   :  { %6262 = vmatpush1.bf16.msra.mxu1 %v7793_v42  ;;  %6294 = vmatpush1.bf16.msra.mxu0 %v7795_v37 }
 0x92f   :  { %6264 = vmatprep.subr.bf16.mxu1 %v7799_v13  ;;  %6296 = vmatprep.subr.bf16.mxu0 %v7801_v39 }
 0x932   :  { %6266 = vmatpush1.bf16.msra.mxu1 %v7805_v45  ;;  %6298 = vmatpush1.bf16.msra.mxu0 %v7807_v40 }
 0x933   :  { %6268 = vmatprep.subr.bf16.mxu1 %v7811_v20  ;;  %6300 = vmatprep.subr.bf16.mxu0 %v7813_v7 }
 0x936   :  { %6270 = vmatpush1.bf16.msra.mxu1 %v7817_v6  ;;  %6302 = vmatpush1.bf16.msra.mxu0 %v7819_v62 }
 0x937   :  { %6304 = vmatprep.subr.bf16.mxu1 %v7681_v1  ;;  %6336 = vmatprep.subr.bf16.mxu0 %v8537_v48  ;;  %v2699_v1 = vcombine.high %v8201_v50, %v8201_v50 }
 0x9ec   :  { %v4452_v30 = vpop.f32.mrb[28].mxu1  ;;  %v4523_v19 = vpop.f32.mrb[28].mxu0 }
 0x9ed   :  { %v4454_v57 = vpop.f32.mrb[29].mxu1  ;;  %v4525_v61 = vpop.f32.mrb[29].mxu0 }
 0x9ee   :  { %v4532_v18 = vcombine.low %v4452_v30, %v4454_v57  ;;  %v4533_v0 = vcombine.low %v4523_v19, %v4525_v61 }
 0x9f0   :  { %v4540_v4 = vrot.slane %v4532_v18, %v7911_v55  ;;  %v4547_v27 = vrot.slane %v4533_v0, %v7911_v55 }
 0x9f2   :  { %v4548_v17 = vcombine.low %v4540_v4, %v4547_v27  ;;  %v4549_v51 = vcombine.high %v4540_v4, %v4547_v27 }
 0x9f4   :  { %v4556_v48 = vrot.slane %v4548_v17, %v7911_v55  ;;  %v4563_v15 = vrot.slane %v4549_v51, %v7911_v55 }
 0x9f6   :  { %v4566_v22 = vadd.f32 %v4556_v48, %v2629_v60  ;;  %v4567_v43 = vadd.f32 %v4563_v15, %v2699_v1 }
 0x9f8   :  { %v5493_v59 = vmul.f32 -1.442695, %v4566_v22  ;;  %v5494_v12 = vmul.f32 -1.442695, %v4567_v43  ;;  %v4582_v16 = vrot.slane %v4566_v22, 1  ;;  %v4583_v21 = vrot.slane %v4567_v43, 1 }
 0x9f9   :  { %v4604_v24 = vrot.slane %v4566_v22, 3  ;;  %v4605_v52 = vrot.slane %v4567_v43, 3  ;;  %v4598_v28 = vrot.slane %v4566_v22, 2  ;;  %v4599_v50 = vrot.slane %v4567_v43, 2 }
 0x9fa   :  { %6606 = vpow2.f32 %v5493_v59  ;;  %v5495_v54 = vmul.f32 -1.442695, %v4582_v16  ;;  %v5496_v44 = vmul.f32 -1.442695, %v4583_v21 }
 0x9fb   :  { %6608 = vpow2.f32 %v5494_v12  ;;  %v5497_v23 = vmul.f32 -1.442695, %v4604_v24  ;;  %v5498_v9 = vmul.f32 -1.442695, %v4605_v52 }
 0x9fc   :  { %6610 = vpow2.f32 %v5495_v54 }
 0x9fd   :  { %6612 = vpow2.f32 %v5496_v44 }
 0x9fe   :  { %6614 = vtanh.f32 %v4598_v28 }
 0x9ff   :  { %6616 = vtanh.f32 %v4599_v50 }
 0xa00   :  { %6618 = vpow2.f32 %v5497_v23 }
 0xa01   :  { %6620 = vpow2.f32 %v5498_v9 }
 0xa04   :  { %v6607_v30 = vpop.eup %6606 }
 0xa05   :  { %v6609_v19 = vpop.eup %6608  ;;  %v4574_v57 = vadd.f32 1.0, %v6607_v30 }
 0xa06   :  { %v6611_v61 = vpop.eup %6610  ;;  %v4575_v18 = vadd.f32 1.0, %v6609_v19 }
 0xa07   :  { %v6613_v0 = vpop.eup %6612  ;;  %6622 = vrcp.f32 %v4574_v57  ;;  %v4592_v4 = vadd.f32 1.0, %v6611_v61 }
 0xa08   :  { %6624 = vrcp.f32 %v4575_v18  ;;  %v4593_v27 = vadd.f32 1.0, %v6613_v0  ;;  %v6615_v17 = vpop.eup %6614 }
 0xa09   :  { %6626 = vrcp.f32 %v4592_v4  ;;  %v6617_v51 = vpop.eup %6616 }
 0xa0a   :  { %6628 = vrcp.f32 %v4593_v27  ;;  %v6619_v60 = vpop.eup %6618 }
 0xa0b   :  { %v6621_v1 = vpop.eup %6620  ;;  %v4614_v22 = vadd.f32 1.0, %v6619_v60 }
 0xa0c   :  { %v4615_v59 = vadd.f32 1.0, %v6621_v1 }
 0xa0d   :  { %6630 = vrcp.f32 %v4614_v22 }
 0xa0e   :  { %6632 = vrcp.f32 %v4615_v59 }
 0xa11   :  { %v6623_v48 = vpop.eup %6622 }
 0xa12   :  { %v6625_v15 = vpop.eup %6624  ;;  %v4622_v16 = vmul.f32 %v6623_v48, %v6615_v17 }
 0xa13   :  { %v6627_v43 = vpop.eup %6626  ;;  %v4623_v54 = vmul.f32 %v6625_v15, %v6617_v51 }
 0xa14   :  { %v6629_v12 = vpop.eup %6628  ;;  %v4620_v21 = vmul.f32 %v6627_v43, %v8266_v49 }
 0xa15   :  { %v4621_v44 = vmul.f32 %v6629_v12, %v8268_v36 }
 0xa16   :  { %v8318_v24 = vadd.f32 %v4622_v16, %v4620_v21 }
 0xa17   :  { %v8320_v52 = vadd.f32 %v4623_v54, %v4621_v44  ;;  %v6631_v28 = vpop.eup %6630 }
 0xa18   :  { %6634 = vtanh.f32 %v8318_v24  ;;  %v6633_v50 = vpop.eup %6632 }
 0xa19   :  { %6636 = vtanh.f32 %v8320_v52 }
 0xa22   :  { %v6635_v23 = vpop.eup %6634 }
 0xa23   :  { %v6637_v9 = vpop.eup %6636  ;;  %v4628_v30 = vmul.f32 %v6635_v23, %v6631_v28 }
 0xa24   :  { %v4629_v19 = vmul.f32 %v6637_v9, %v6633_v50 }
 0xa26   :  { %v4632_v49 = vcombine.low %v4628_v30, %v4629_v19 }
 0xa28   :  { %v4639_v57 = vrot.slane %v4632_v49, %v7911_v55 }
 0xa2a   :  { %v4646_v36 = vrot.slane %v4639_v57, %v7911_v55 }
 0xa2c   :  { %4713 = vmatmul.mubr.f32.vlgmr.msra.gmra.mrb[30].mxu1 %v4646_v36  ;;  %4784 = vmatmul.mubr.f32.vlgmr.msra.gmra.mrb[30].mxu0 %v4646_v36 }
 0xa2d   :  { %6306 = vmatpush1.bf16.msra.mxu1 %v7731_v56  ;;  %6338 = vmatpush1.bf16.msra.mxu0 %v7733_v31  ;;  %v8550_v56 = vmov 0.0|0.0  }
 0xa2e   :  { %6308 = vmatprep.subr.bf16.mxu1 %v7736_v14  ;;  %6340 = vmatprep.subr.bf16.mxu0 %v7738_v25 }
 0xa2f   :  { %4974 = vmatprep.mubr.f32.mxu1 %v8535_v29  ;;  %5045 = vmatprep.mubr.f32.mxu0 %v8535_v29 }
 0xa31   :  { %6310 = vmatpush1.bf16.msra.mxu1 %v7743_v35  ;;  %6342 = vmatpush1.bf16.msra.mxu0 %v7745_v11 }
 0xa32   :  { %6312 = vmatprep.subr.bf16.mxu1 %v7749_v26  ;;  %6344 = vmatprep.subr.bf16.mxu0 %v7751_v33 }
 0xa35   :  { %6314 = vmatpush1.bf16.msra.mxu1 %v7757_v38  ;;  %6346 = vmatpush1.bf16.msra.mxu0 %v7759_v34 }
 0xa36   :  { %6316 = vmatprep.subr.bf16.mxu1 %v7763_v5  ;;  %6348 = vmatprep.subr.bf16.mxu0 %v7765_v8  ;;  %v8551_v8 = vld [vmem:[#allocation14_spill] sm:$0xff] }
 0xa39   :  { %6318 = vmatpush1.bf16.msra.mxu1 %v7769_v53  ;;  %6350 = vmatpush1.bf16.msra.mxu0 %v7771_v2  ;;  %v8552_v53 = vld [vmem:[#allocation15_spill] sm:$0xff] }
 0xa3a   :  { %6320 = vmatprep.subr.bf16.mxu1 %v7775_v47  ;;  %6352 = vmatprep.subr.bf16.mxu0 %v7777_v32  ;;  %v8553_v2 = vcombine.low %v8551_v8, %v8552_v53  ;;  %v2631_v32 = vcombine.high %v8257_v3, %v8257_v3 }
 0xa3c   :  { %v2724_v47 = vrot.slane %v8553_v2, %v7911_v55  ;;  %v5158_v2 = vld [vmem:[%s8502_s8 + $0x20] sm:$0xff] }
 0xa3d   :  { %6322 = vmatpush1.bf16.msra.mxu1 %v7781_v58  ;;  %6354 = vmatpush1.bf16.msra.mxu0 %v7783_v10 }
 0xa3e   :  { %6324 = vmatprep.subr.bf16.mxu1 %v7787_v63  ;;  %6356 = vmatprep.subr.bf16.mxu0 %v7789_v41 }
 0xa41   :  { %6326 = vmatpush1.bf16.msra.mxu1 %v7793_v42  ;;  %6358 = vmatpush1.bf16.msra.mxu0 %v7795_v37 }
 0xa42   :  { %6328 = vmatprep.subr.bf16.mxu1 %v7799_v13  ;;  %6360 = vmatprep.subr.bf16.mxu0 %v7801_v39 }
 0xa45   :  { %6330 = vmatpush1.bf16.msra.mxu1 %v7805_v45  ;;  %6362 = vmatpush1.bf16.msra.mxu0 %v7807_v40 }
 0xa46   :  { %6332 = vmatprep.subr.bf16.mxu1 %v7811_v20  ;;  %6364 = vmatprep.subr.bf16.mxu0 %v7813_v7 }
 0xa49   :  { %6334 = vmatpush1.bf16.msra.mxu1 %v7817_v6  ;;  %6366 = vmatpush1.bf16.msra.mxu0 %v7819_v62 }
 0xa4a   :  { %6367 = vmatprep.subr.bf16.mxu1 %v8550_v56  ;;  %6391 = vmatprep.subr.bf16.mxu0 %v8550_v56 }
 0xaff   :  { %v4714_v31 = vpop.f32.mrb[30].mxu1  ;;  %v4785_v14 = vpop.f32.mrb[30].mxu0 }
 0xb00   :  { %v4716_v25 = vpop.f32.mrb[31].mxu1  ;;  %v4787_v35 = vpop.f32.mrb[31].mxu0 }
 0xb01   :  { %v4794_v11 = vcombine.low %v4714_v31, %v4716_v25  ;;  %v4795_v26 = vcombine.low %v4785_v14, %v4787_v35 }
 0xb03   :  { %v4802_v33 = vrot.slane %v4794_v11, %v7911_v55  ;;  %v4809_v38 = vrot.slane %v4795_v26, %v7911_v55  ;;  %v5154_v11 = vld [vmem:[%s8502_s8] sm:$0xff]  ;;  %v5155_v26 = vld [vmem:[%s8502_s8 + $0x8] sm:$0xff] }
 0xb05   :  { %v4810_v34 = vcombine.low %v4802_v33, %v4809_v38  ;;  %v4811_v5 = vcombine.high %v4802_v33, %v4809_v38  ;;  %v5156_v33 = vld [vmem:[%s8502_s8 + $0x10] sm:$0xff]  ;;  %v6368_v38 = vpack.c.bf16 %v5155_v26, %v5154_v11 }
 0xb07   :  { %v4818_v58 = vrot.slane %v4810_v34, %v7911_v55  ;;  %v4825_v10 = vrot.slane %v4811_v5, %v7911_v55  ;;  %v5157_v34 = vld [vmem:[%s8502_s8 + $0x18] sm:$0xff] }
 0xb08   :  { %v6371_v5 = vpack.c.bf16 %v5157_v34, %v5156_v33 }
 0xb09   :  { %v4828_v63 = vadd.f32 %v4818_v58, %v2631_v32  ;;  %v4829_v41 = vadd.f32 %v4825_v10, %v2724_v47  ;;  %v5159_v47 = vld [vmem:[%s8502_s8 + $0x28] sm:$0xff]  ;;  %v5160_v58 = vld [vmem:[%s8502_s8 + $0x30] sm:$0xff]  ;;  %v5161_v10 = vld [vmem:[%s8502_s8 + $0x38] sm:$0xff] }
 0xb0a   :  { %v6374_v32 = vpack.c.bf16 %v5159_v47, %v5158_v2 }
 0xb0b   :  { %v5499_v42 = vmul.f32 -1.442695, %v4828_v63  ;;  %v5500_v37 = vmul.f32 -1.442695, %v4829_v41  ;;  %v4844_v13 = vrot.slane %v4828_v63, 1  ;;  %v4845_v39 = vrot.slane %v4829_v41, 1 }
 0xb0c   :  { %v4866_v20 = vrot.slane %v4828_v63, 3  ;;  %v4867_v7 = vrot.slane %v4829_v41, 3  ;;  %v4860_v6 = vrot.slane %v4828_v63, 2  ;;  %v4861_v62 = vrot.slane %v4829_v41, 2  ;;  %v5162_v41 = vld [vmem:[%s8502_s8 + $0x40] sm:$0xff] }
 0xb0d   :  { %6638 = vpow2.f32 %v5499_v42  ;;  %v5501_v45 = vmul.f32 -1.442695, %v4844_v13  ;;  %v5502_v40 = vmul.f32 -1.442695, %v4845_v39  ;;  %v6377_v63 = vpack.c.bf16 %v5161_v10, %v5160_v58  ;;  %v5163_v42 = vld [vmem:[%s8502_s8 + $0x48] sm:$0xff]  ;;  %v5164_v13 = vld [vmem:[%s8502_s8 + $0x50] sm:$0xff] }
 0xb0e   :  { %6640 = vpow2.f32 %v5500_v37  ;;  %v5503_v3 = vmul.f32 -1.442695, %v4866_v20  ;;  %v5504_v61 = vmul.f32 -1.442695, %v4867_v7  ;;  %v6380_v37 = vpack.c.bf16 %v5163_v42, %v5162_v41  ;;  %v5165_v39 = vld [vmem:[%s8502_s8 + $0x58] sm:$0xff]  ;;  %v5167_v20 = vld [vmem:[%s8502_s8 + $0x68] sm:$0xff] }
 0xb0f   :  { %6642 = vpow2.f32 %v5501_v45  ;;  %v6383_v45 = vpack.c.bf16 %v5165_v39, %v5164_v13 }
 0xb10   :  { %6644 = vpow2.f32 %v5502_v40  ;;  %v5166_v40 = vld [vmem:[%s8502_s8 + $0x60] sm:$0xff] }
 0xb11   :  { %6646 = vtanh.f32 %v4860_v6  ;;  %v6386_v7 = vpack.c.bf16 %v5167_v20, %v5166_v40  ;;  %v5168_v6 = vld [vmem:[%s8502_s8 + $0x70] sm:$0xff] }
 0xb12   :  { %6648 = vtanh.f32 %v4861_v62  ;;  %v5169_v62 = vld [vmem:[%s8502_s8 + $0x78] sm:$0xff] }
 0xb13   :  { %6650 = vpow2.f32 %v5503_v3  ;;  %v6389_v3 = vpack.c.bf16 %v5169_v62, %v5168_v6 }
 0xb14   :  { %6652 = vpow2.f32 %v5504_v61  ;;  %v5266_v61 = vld [vmem:[%s8504_s10] sm:$0xff] }
 0xb17   :  { %v6639_v18 = vpop.eup %6638 }
 0xb18   :  { %v6641_v0 = vpop.eup %6640  ;;  %v4836_v4 = vadd.f32 1.0, %v6639_v18  ;;  %v5267_v18 = vld [vmem:[%s8504_s10 + $0x8] sm:$0xff] }
 0xb19   :  { %v6643_v27 = vpop.eup %6642  ;;  %v4837_v17 = vadd.f32 1.0, %v6641_v0  ;;  %v5268_v0 = vld [vmem:[%s8504_s10 + $0x10] sm:$0xff] }
 0xb1a   :  { %v6645_v51 = vpop.eup %6644  ;;  %6654 = vrcp.f32 %v4836_v4  ;;  %v4854_v60 = vadd.f32 1.0, %v6643_v27  ;;  %v6392_v4 = vpack.c.bf16 %v5267_v18, %v5266_v61  ;;  %v5269_v27 = vld [vmem:[%s8504_s10 + $0x18] sm:$0xff] }
 0xb1b   :  { %6656 = vrcp.f32 %v4837_v17  ;;  %v4855_v1 = vadd.f32 1.0, %v6645_v51  ;;  %v6647_v48 = vpop.eup %6646  ;;  %v6395_v17 = vpack.c.bf16 %v5269_v27, %v5268_v0 }
 0xb1c   :  { %6658 = vrcp.f32 %v4854_v60  ;;  %v6649_v15 = vpop.eup %6648 }
 0xb1d   :  { %6660 = vrcp.f32 %v4855_v1  ;;  %v6651_v22 = vpop.eup %6650 }
 0xb1e   :  { %v6653_v43 = vpop.eup %6652  ;;  %v4876_v16 = vadd.f32 1.0, %v6651_v22 }
 0xb1f   :  { %v4877_v54 = vadd.f32 1.0, %v6653_v43 }
 0xb20   :  { %6662 = vrcp.f32 %v4876_v16 }
 0xb21   :  { %6664 = vrcp.f32 %v4877_v54 }
 0xb24   :  { %v6655_v59 = vpop.eup %6654 }
 0xb25   :  { %v6657_v12 = vpop.eup %6656  ;;  %v4884_v28 = vmul.f32 %v6655_v59, %v6647_v48 }
 0xb26   :  { %v6659_v21 = vpop.eup %6658  ;;  %v4885_v23 = vmul.f32 %v6657_v12, %v6649_v15 }
 0xb27   :  { %v6661_v44 = vpop.eup %6660  ;;  %v4882_v50 = vmul.f32 %v6659_v21, %v8318_v24  ;;  %v8554_v21 = vcombine.high %v8551_v8, %v8552_v53 }
 0xb28   :  { %v4883_v9 = vmul.f32 %v6661_v44, %v8320_v52 }
 0xb29   :  { %v8372_v30 = vadd.f32 %v4884_v28, %v4882_v50  ;;  %v2731_v54 = vrot.slane %v8554_v21, %v7911_v55 }
 0xb2a   :  { %v8374_v19 = vadd.f32 %v4885_v23, %v4883_v9  ;;  %v6663_v49 = vpop.eup %6662 }
 0xb2b   :  { %6666 = vtanh.f32 %v8372_v30  ;;  %v6665_v57 = vpop.eup %6664 }
 0xb2c   :  { %6668 = vtanh.f32 %v8374_v19 }
 0xb35   :  { %v6667_v36 = vpop.eup %6666 }
 0xb36   :  { %v6669_v31 = vpop.eup %6668  ;;  %v4890_v14 = vmul.f32 %v6667_v36, %v6663_v49 }
 0xb37   :  { %v4891_v25 = vmul.f32 %v6669_v31, %v6665_v57 }
 0xb39   :  { %v4894_v24 = vcombine.low %v4890_v14, %v4891_v25 }
 0xb3b   :  { %v4901_v35 = vrot.slane %v4894_v24, %v7911_v55 }
 0xb3d   :  { %v4908_v52 = vrot.slane %v4901_v35, %v7911_v55 }
 0xb3f   :  { %4975 = vmatmul.mubr.f32.vlgmr.msra.gmra.mrb[32].mxu1 %v4908_v52  ;;  %5046 = vmatmul.mubr.f32.vlgmr.msra.gmra.mrb[32].mxu0 %v4908_v52 }
 0xb40   :  { %5663 = vmatprep.mubr.msk.f32.mxu1 %vm6804_vm0, %v8535_v29  ;;  %5680 = vmatprep.mubr.msk.f32.mxu0 %vm6804_vm0, %v8535_v29 }
 0xb41   :  { %6369 = vmatpush3.bf16.msra.mxu1 %v6368_v38  ;;  %6393 = vmatpush3.bf16.msra.mxu0 %v6392_v4 }
 0xb42   :  { %6370 = vmatprep.subr.bf16.mxu1 %v8550_v56  ;;  %6394 = vmatprep.subr.bf16.mxu0 %v8550_v56 }
 0xb45   :  { %6372 = vmatpush3.bf16.msra.mxu1 %v6371_v5  ;;  %6396 = vmatpush3.bf16.msra.mxu0 %v6395_v17 }
 0xb46   :  { %6373 = vmatprep.subr.bf16.mxu1 %v8550_v56  ;;  %6397 = vmatprep.subr.bf16.mxu0 %v8550_v56 }
 0xb49   :  { %6375 = vmatpush3.bf16.msra.mxu1 %v6374_v32 }
 0xb4a   :  { %6376 = vmatprep.subr.bf16.mxu1 %v8550_v56 }
 0xb4d   :  { %6378 = vmatpush3.bf16.msra.mxu1 %v6377_v63 }
 0xb4e   :  { %6379 = vmatprep.subr.bf16.mxu1 %v8550_v56 }
 0xb51   :  { %6381 = vmatpush3.bf16.msra.mxu1 %v6380_v37 }
 0xb52   :  { %6382 = vmatprep.subr.bf16.mxu1 %v8550_v56 }
 0xb55   :  { %6384 = vmatpush3.bf16.msra.mxu1 %v6383_v45 }
 0xb56   :  { %6385 = vmatprep.subr.bf16.mxu1 %v8550_v56 }
 0xb59   :  { %6387 = vmatpush3.bf16.msra.mxu1 %v6386_v7 }
 0xb5a   :  { %6388 = vmatprep.subr.bf16.mxu1 %v8550_v56 }
 0xb5d   :  { %6390 = vmatpush3.bf16.msra.mxu1 %v6389_v3 }
 0xc12   :  { %v4976_v51 = vpop.f32.mrb[32].mxu1  ;;  %v5047_v60 = vpop.f32.mrb[32].mxu0 }
 0xc13   :  { %v4978_v1 = vpop.f32.mrb[33].mxu1  ;;  %v5049_v48 = vpop.f32.mrb[33].mxu0 }
 0xc14   :  { %v5056_v15 = vcombine.low %v4976_v51, %v4978_v1  ;;  %v5057_v22 = vcombine.low %v5047_v60, %v5049_v48  ;;  %v5271_v51 = vld [vmem:[%s8504_s10 + $0x28] sm:$0xff]  ;;  %v5272_v1 = vld [vmem:[%s8504_s10 + $0x30] sm:$0x3] }
 0xc16   :  { %v5064_v43 = vrot.slane %v5056_v15, %v7911_v55  ;;  %v5071_v59 = vrot.slane %v5057_v22, %v7911_v55 }
 0xc18   :  { %v5072_v12 = vcombine.low %v5064_v43, %v5071_v59  ;;  %v5073_v16 = vcombine.high %v5064_v43, %v5071_v59 }
 0xc1a   :  { %v5080_v44 = vrot.slane %v5072_v12, %v7911_v55  ;;  %v5087_v56 = vrot.slane %v5073_v16, %v7911_v55 }
 0xc1c   :  { %v5090_v28 = vadd.f32 %v5080_v44, %v8021_v46  ;;  %v5091_v50 = vadd.f32 %v5087_v56, %v2731_v54 }
 0xc1e   :  { %v5505_v23 = vmul.f32 -1.442695, %v5090_v28  ;;  %v5506_v9 = vmul.f32 -1.442695, %v5091_v50  ;;  %v5106_v49 = vrot.slane %v5090_v28, 1  ;;  %v5107_v57 = vrot.slane %v5091_v50, 1 }
 0xc1f   :  { %v5128_v14 = vrot.slane %v5090_v28, 3  ;;  %v5129_v8 = vrot.slane %v5091_v50, 3  ;;  %v5122_v53 = vrot.slane %v5090_v28, 2  ;;  %v5123_v25 = vrot.slane %v5091_v50, 2 }
 0xc20   :  { %6670 = vpow2.f32 %v5505_v23  ;;  %v5507_v36 = vmul.f32 -1.442695, %v5106_v49  ;;  %v5508_v31 = vmul.f32 -1.442695, %v5107_v57 }
 0xc21   :  { %6672 = vpow2.f32 %v5506_v9  ;;  %v5509_v24 = vmul.f32 -1.442695, %v5128_v14  ;;  %v5510_v35 = vmul.f32 -1.442695, %v5129_v8 }
 0xc22   :  { %6674 = vpow2.f32 %v5507_v36 }
 0xc23   :  { %6676 = vpow2.f32 %v5508_v31 }
 0xc24   :  { %6678 = vtanh.f32 %v5122_v53 }
 0xc25   :  { %6680 = vtanh.f32 %v5123_v25 }
 0xc26   :  { %6682 = vpow2.f32 %v5509_v24 }
 0xc27   :  { %6684 = vpow2.f32 %v5510_v35 }
 0xc2a   :  { %v6671_v52 = vpop.eup %6670 }
 0xc2b   :  { %v6673_v46 = vpop.eup %6672  ;;  %v5098_v11 = vadd.f32 1.0, %v6671_v52 }
 0xc2c   :  { %v6675_v26 = vpop.eup %6674  ;;  %v5099_v33 = vadd.f32 1.0, %v6673_v46 }
 0xc2d   :  { %v6677_v38 = vpop.eup %6676  ;;  %6686 = vrcp.f32 %v5098_v11  ;;  %v5116_v34 = vadd.f32 1.0, %v6675_v26 }
 0xc2e   :  { %6688 = vrcp.f32 %v5099_v33  ;;  %v5117_v5 = vadd.f32 1.0, %v6677_v38  ;;  %v6679_v2 = vpop.eup %6678 }
 0xc2f   :  { %6690 = vrcp.f32 %v5116_v34  ;;  %v6681_v47 = vpop.eup %6680 }
 0xc30   :  { %6692 = vrcp.f32 %v5117_v5  ;;  %v6683_v32 = vpop.eup %6682 }
 0xc31   :  { %v6685_v58 = vpop.eup %6684  ;;  %v5138_v41 = vadd.f32 1.0, %v6683_v32 }
 0xc32   :  { %v5139_v37 = vadd.f32 1.0, %v6685_v58 }
 0xc33   :  { %6694 = vrcp.f32 %v5138_v41 }
 0xc34   :  { %6696 = vrcp.f32 %v5139_v37 }
 0xc37   :  { %v6687_v10 = vpop.eup %6686 }
 0xc38   :  { %v6689_v63 = vpop.eup %6688  ;;  %v5146_v45 = vmul.f32 %v6687_v10, %v6679_v2 }
 0xc39   :  { %v6691_v42 = vpop.eup %6690  ;;  %v5147_v20 = vmul.f32 %v6689_v63, %v6681_v47 }
 0xc3a   :  { %v6693_v13 = vpop.eup %6692  ;;  %v5144_v39 = vmul.f32 %v6691_v42, %v8372_v30 }
 0xc3b   :  { %v5145_v40 = vmul.f32 %v6693_v13, %v8374_v19  ;;  %v5270_v19 = vld [vmem:[%s8504_s10 + $0x20] sm:$0xff]  ;;  %s6768_s10 = scalar_lea.vmem %s5367_s4, 32 }
 0xc3c   :  { %v5148_v7 = vadd.f32 %v5146_v45, %v5144_v39  ;;  %v6398_v60 = vpack.c.bf16 %v5271_v51, %v5270_v19  ;;  %p6769_p10 = scmp.ne.s32.totalorder %s5367_s4, %s6768_s10  ;;  %p6774_p12 = scmp.lt.s32.totalorder %s6768_s10, %s6768_s10 }
 0xc3d   :  { %v5149_v6 = vadd.f32 %v5147_v20, %v5145_v40  ;;  %v6695_v62 = vpop.eup %6694 }
 0xc3e   :  { %6698 = vtanh.f32 %v5148_v7  ;;  %v6697_v3 = vpop.eup %6696  ;;  %6399 = vmatpush3.bf16.msra.mxu0 %v6398_v60  ;;  %p6775_p13 = por %p6774_p12, %p6773_p11 }
 0xc3f   :  { %6700 = vtanh.f32 %v5149_v6  ;;  %5678 = vmatprep.subr.mxu0 %v8535_v29  ;;  %v5512_v29 = vld [vmem:[%s8505_s11] ss:$0 sm:$0xff] }
 0xc40   :  { %p6776_p0 = pnand %p6775_p13, %p6769_p10 }
 0xc42   :  { %5679 = vmatpush3.msk.msra.mxu0 %vm5284_vm9, %v5272_v1 }
 0xc48   :  { %v6699_v61 = vpop.eup %6698 }
 0xc49   :  { %v6701_v18 = vpop.eup %6700  ;;  %v5152_v0 = vmul.f32 %v6699_v61, %v6695_v62 }
 0xc4a   :  { %v5153_v4 = vmul.f32 %v6701_v18, %v6697_v3 }
 0xc4c   :  { %v5179_v27 = vcombine.low %v5152_v0, %v5153_v4 }
 0xc4e   :  { %v5186_v17 = vrot.slane %v5179_v27, %v7911_v55 }
 0xc50   :  { %v5193_v30 = vrot.slane %v5186_v17, %v7911_v55  ;;  %v5511_v55 = vld [vmem:[%s8503_s9] ss:$0 sm:$0xff] }
 0xc52   :  { %5664 = vmatmul.mubr.f32.vlgmr.msra.gmra.mrb[34].mxu1 %v5193_v30 }
 0xd25   :  { %v5261_v48 = vpop.f32.mrb[34].mxu1 }
 0xd26   :  { %v5262_v15 = vadd.f32 %v5511_v55, %v5261_v48  ;;  %v5665_v22 = vpop.f32.mrb[35].mxu1 }
 0xd28   :  { %v5265_v43 = vmax.f32 %v5262_v15, 0.0 }
 0xd2a   :  { %5681 = vmatmul.mubr.msk.f32.vlgmr.msra.gmra.mrb[34].mxu0 %vm5280_vm10, %v5265_v43 }
 0xdfd   :  { %v5354_v59 = vpop.f32.mrb[34].mxu0 }
 0xdfe   :  { %v5355_v12 = vadd.f32 %v5512_v29, %v5354_v59  ;;  %v5682_v16 = vpop.f32.mrb[35].mxu0 }
 0xe00   :  { %5359 = vst.msk [vmem:[#allocation8] sm:$0x3] %vm5358_vm11, %v5355_v12 }
 0xe01   :  { %6779 = shalt.err (!%p6776_p0)
}
 0xe02   :  { %s6780_s7 = scalar_lea.hbm %s8506_s12, 32 }
 0xe03   :  { %p6781_p1 = scmp.ne.s32.totalorder %s8506_s12, %s6780_s7  ;;  %p6784_p2 = scmp.lt.u32.totalorder %s6780_s7, %s8506_s12 }
 0xe05   :  { %p6786_p3 = pnand %p6784_p2, %p6781_p1 }
 0xe07   :  { %6789 = shalt.err (!%p6786_p3)
}
 0xe08   :  { %5369 = dma.vmem_to_hbm [thread:$0]  %s5367_s4, 32, %s8506_s12, [#allocation4]  }
 0xe09   :  { %6794 = dma.done.wait [#allocation4], 32  }
 0xe0a   :  { %6795 = vsyncadd [#allocation4], 4294967264 }
 0xe0b   :  { %5373 = vsyncpa [#allocation3], 1 }
 0xe0c   :  { %5374 = vsyncpa [#allocation6], 1 }
 0xe0d   :  { %5375 = vsyncpa [#allocation4], 1 }

</bundles_post_ra>
